<compile_context>
chip_gen: v7x
topology: tpu7x:2x2x1
jax: 0.10.0
libtpu: 0.0.40
codegen_flags: <defaults>
</compile_context>

<pallas_src>
import jax
import jax.numpy as jnp
from jax.experimental import pallas as pl
from jax.experimental.pallas import tpu as pltpu

INPUT_SIZE = 2
HIDDEN = 64
GRID_X = 4
GRID_Y = 4
GRID_CELLS = GRID_X * GRID_Y
NEIGHBORHOOD = 4.0
OBS_LEN = 6
PRED_LEN = 8
ROWS = 8          # row 0 = target, rows 1..N = neighbors, rest zero padding (one 8-sublane tile)
OUT_PAD = 128     # output lanes padded to a full vreg (lane-dense store); wrapper slices [:2]


def _social_lstm_kernel(
    pos_ref,        # (T*ROWS, 2)        positions; row 0 of each 8-row group = target
    lo_ref,         # (T*ROWS, 1) int32  flat lane offset of each row's social cell; <0 => excluded
    sel_sum_ref,    # (T, T*ROWS) f32    0/1 selector: sum the 8 rows of each step
    sel_tgt_ref,    # (T, T*ROWS) f32    0/1 selector: pick the target row of each step
    wih_ref, whh_ref, bias_ref,   # (2, 4H), (H, 4H), (1, 4H)   gate cols reordered [i|f|o|g]
    w1_ref, b1_ref,               # (G*H, H), (1, H)            social MLP layer 1 (W^T)
    w2_ref, b2_ref,               # (H, H), (1, H)              social MLP layer 2 (W^T)
    w3_ref, b3_ref,               # (H, OUT_PAD), (1, OUT_PAD)  output layer (W^T, zero-padded)
    out_ref,        # (T, OUT_PAD)
    xproj_ref,      # scratch (T*ROWS, 4H)  precomputed input projections
    hhist_ref,      # scratch (T*ROWS, H)   hidden-state history (all agents, all steps)
):
    H = HIDDEN
    T = out_ref.shape[0]

    # ---- prologue: input projection for every step / agent in ONE matmul ----
    xproj_ref[...] = (
        jnp.dot(pos_ref[...], wih_ref[...], preferred_element_type=jnp.float32)
        + bias_ref[...]
    )

    whh = whh_ref[...]
    h = jnp.zeros((ROWS, H), jnp.float32)
    c = jnp.zeros((ROWS, H), jnp.float32)

    # ---- serial recurrence: only h @ W_hh + gate math + one aligned (8,H) store ----
    # Static unroll (T = obs_len + pred_len = 14); all slices are static & 8-aligned.
    for t in range(T):
        gates = xproj_ref[t * ROWS:(t + 1) * ROWS, :] + jnp.dot(
            h, whh, preferred_element_type=jnp.float32)          # (ROWS, 4H)
        sig = jax.nn.sigmoid(gates[:, 0:3 * H])                  # contiguous 192 lanes: [i|f|o]
        g_g = jnp.tanh(gates[:, 3 * H:4 * H])                    # trailing 64 lanes: g
        i_g = sig[:, 0:H]
        f_g = sig[:, H:2 * H]
        o_g = sig[:, 2 * H:3 * H]
        c = f_g * c + i_g * g_g
        h = o_g * jnp.tanh(c)
        # TODO(synk): nn.Dropout is applied as identity (eval-mode semantics).
        hhist_ref[t * ROWS:(t + 1) * ROWS, :] = h

    # ---- epilogue (off the serial path): social grid + MLP + output, batched over T ----
    h_hist = hhist_ref[...]                                       # (T*ROWS, H)
    h_tgt = jnp.dot(sel_tgt_ref[...], h_hist,
                    preferred_element_type=jnp.float32)           # (T, H) target hidden states

    lane = jax.lax.broadcasted_iota(jnp.int32, (T * ROWS, GRID_CELLS * H), 1)
    lo = lo_ref[...]                                              # (T*ROWS, 1)
    mask = (lane >= lo) & (lane < lo + H)                         # one 64-lane block per valid row
    h_tiled = jnp.concatenate([h_hist] * GRID_CELLS, axis=1)      # (T*ROWS, G*H) lane-tiled once
    contrib = jnp.where(mask, h_tiled, 0.0)
    social = jnp.dot(sel_sum_ref[...], contrib,
                     preferred_element_type=jnp.float32)          # (T, G*H) per-step cell sums

    ctx = jnp.dot(social, w1_ref[...],
                  preferred_element_type=jnp.float32) + b1_ref[...]
    ctx = jnp.maximum(ctx, 0.0)
    ctx = jnp.dot(ctx, w2_ref[...],
                  preferred_element_type=jnp.float32) + b2_ref[...]
    combined = h_tgt + ctx                                        # (T, H)
    out_ref[...] = (jnp.dot(combined, w3_ref[...],
                            preferred_element_type=jnp.float32) + b3_ref[...])


def social_lstm_forward(target_traj, others_traj, params):
    """target_traj: (T,1,2), others_traj: (T,N,2) -> (T,1,2); torch forward(train=True)."""
    T = target_traj.shape[0]
    N = others_traj.shape[1]
    H = HIDDEN
    assert 1 <= N and N + 1 <= ROWS, "ROWS padding supports 1..7 neighbors"
    B = 1  # kernel grid is batched over independent scenes ("parallel" axis for v7x megacore);
           # the module's forward processes a single scene, so B = 1 here.

    # Pack target (row 0) + neighbors (rows 1..N) into an 8-row tile per step.
    pos = jnp.zeros((B, T, ROWS, INPUT_SIZE), jnp.float32)
    pos = pos.at[:, :, 0, :].set(target_traj.astype(jnp.float32).reshape(1, T, INPUT_SIZE))
    pos = pos.at[:, :, 1:1 + N, :].set(others_traj.astype(jnp.float32)[None])

    # ---- position-only social-grid indexing, precomputed OUTSIDE the recurrence ----
    cell_w = NEIGHBORHOOD / GRID_X
    cell_h = NEIGHBORHOOD / GRID_Y
    rel = pos - pos[:, :, 0:1, :]                                 # relative to target position
    rel_x, rel_y = rel[..., 0], rel[..., 1]
    within = (jnp.abs(rel_x) <= NEIGHBORHOOD / 2) & (jnp.abs(rel_y) <= NEIGHBORHOOD / 2)
    # float -> int cast truncates toward zero, matching torch `.long()`.
    cx = (rel_x / cell_w).astype(jnp.int32) + GRID_X // 2
    cy = (rel_y / cell_h).astype(jnp.int32) + GRID_Y // 2
    row = jnp.arange(ROWS)
    row_ok = (row >= 1) & (row <= N)                              # exclude target + padding rows
    valid = (within & (cx >= 0) & (cx < GRID_X) & (cy >= 0) & (cy < GRID_Y)
             & row_ok[None, None, :])
    lo = jnp.where(valid, (cy * GRID_X + cx) * H,
                   -(2 * GRID_CELLS * H)).astype(jnp.int32)       # invalid => mask never true
    lo = lo.reshape(B, T * ROWS, 1)
    pos_flat = pos.reshape(B, T * ROWS, INPUT_SIZE)

    # 0/1 selectors for the batched epilogue reductions (row-group sum / target-row pick).
    step_of_row = jnp.arange(T * ROWS) // ROWS
    sel_sum = (jnp.arange(T)[:, None] == step_of_row[None, :]).astype(jnp.float32)
    sel_tgt = (jnp.arange(T)[:, None] * ROWS == jnp.arange(T * ROWS)[None, :]).astype(jnp.float32)

    grid_spec = pltpu.PrefetchScalarGridSpec(
        num_scalar_prefetch=0,
        grid=(B,),   # "parallel" scene axis; recurrence + epilogue run inside one invocation
        in_specs=[
            pl.BlockSpec((None, T * ROWS, INPUT_SIZE), lambda b: (b, 0, 0)),  # positions
            pl.BlockSpec((None, T * ROWS, 1), lambda b: (b, 0, 0)),           # cell lane offsets
            pl.BlockSpec((T, T * ROWS), lambda b: (0, 0)),                    # sel_sum
            pl.BlockSpec((T, T * ROWS), lambda b: (0, 0)),                    # sel_tgt
            pl.BlockSpec((INPUT_SIZE, 4 * H), lambda b: (0, 0)),              # W_ih^T
            pl.BlockSpec((H, 4 * H), lambda b: (0, 0)),                       # W_hh^T
            pl.BlockSpec((1, 4 * H), lambda b: (0, 0)),                       # b_ih + b_hh
            pl.BlockSpec((GRID_CELLS * H, H), lambda b: (0, 0)),              # MLP W1^T
            pl.BlockSpec((1, H), lambda b: (0, 0)),                           # MLP b1
            pl.BlockSpec((H, H), lambda b: (0, 0)),                           # MLP W2^T
            pl.BlockSpec((1, H), lambda b: (0, 0)),                           # MLP b2
            pl.BlockSpec((H, OUT_PAD), lambda b: (0, 0)),                     # out W^T (padded)
            pl.BlockSpec((1, OUT_PAD), lambda b: (0, 0)),                     # out b (padded)
        ],
        out_specs=pl.BlockSpec((None, T, OUT_PAD), lambda b: (b, 0, 0)),
        scratch_shapes=[
            pltpu.VMEM((T * ROWS, 4 * H), jnp.float32),   # precomputed input projections
            pltpu.VMEM((T * ROWS, H), jnp.float32),       # hidden-state history
        ],
    )
    out = pl.pallas_call(
        _social_lstm_kernel,
        out_shape=jax.ShapeDtypeStruct((B, T, OUT_PAD), jnp.float32),
        grid_spec=grid_spec,
        compiler_params=pltpu.CompilerParams(dimension_semantics=("parallel",)),
    )(pos_flat, lo, sel_sum, sel_tgt,
      params["w_ih_t"], params["w_hh_t"], params["b_lstm"],
      params["w1_t"], params["b1"], params["w2_t"], params["b2"],
      params["w3_t"], params["b3"])
    return out[0, :, :INPUT_SIZE].reshape(T, 1, INPUT_SIZE)


def init_params(key):
    """Deterministic synthetic params with the same shapes as the torch module."""
    H = HIDDEN
    ks = jax.random.split(key, 10)

    def u(k, shape, fan_in):
        bound = 1.0 / (fan_in ** 0.5)
        return jax.random.uniform(k, shape, jnp.float32, -bound, bound)

    # torch-layout synthetic weights (LSTMCell gate row order: i, f, g, o).
    w_ih = u(ks[0], (4 * H, INPUT_SIZE), H)             # LSTMCell weight_ih
    w_hh = u(ks[1], (4 * H, H), H)                      # LSTMCell weight_hh
    b_ih = u(ks[2], (4 * H,), H)
    b_hh = u(ks[3], (4 * H,), H)
    w1 = u(ks[4], (H, GRID_CELLS * H), GRID_CELLS * H)  # Linear(G*H -> H)
    b1 = u(ks[5], (H,), GRID_CELLS * H)
    w2 = u(ks[6], (H, H), H)                            # Linear(H -> H)
    b2 = u(ks[7], (H,), H)
    w3 = u(ks[8], (INPUT_SIZE, H), H)                   # Linear(H -> 2)
    b3 = u(ks[9], (INPUT_SIZE,), H)

    # Reorder gate columns (i,f,g,o) -> (i,f,o,g): sigmoid then covers a contiguous
    # 192-lane region and tanh the trailing 64 lanes inside the kernel.
    perm = jnp.concatenate([jnp.arange(0, H), jnp.arange(H, 2 * H),
                            jnp.arange(3 * H, 4 * H), jnp.arange(2 * H, 3 * H)])
    # Pad the output layer to 128 lanes so the final kernel store is lane-dense.
    w3_pad = jnp.zeros((H, OUT_PAD), jnp.float32).at[:, :INPUT_SIZE].set(w3.T)
    b3_pad = jnp.zeros((1, OUT_PAD), jnp.float32).at[:, :INPUT_SIZE].set(b3[None, :])

    return {
        "w_ih_t": w_ih.T[:, perm],                      # (2, 4H)
        "w_hh_t": w_hh.T[:, perm],                      # (H, 4H)
        "b_lstm": (b_ih + b_hh)[perm][None, :],         # (1, 4H)
        "w1_t": w1.T,                                   # (G*H, H)
        "b1": b1[None, :],
        "w2_t": w2.T,                                   # (H, H)
        "b2": b2[None, :],
        "w3_t": w3_pad,                                 # (H, OUT_PAD)
        "b3": b3_pad,                                   # (1, OUT_PAD)
    }


if __name__ == "__main__":
    key = jax.random.PRNGKey(0)
    k_params, k_tgt, k_oth = jax.random.split(key, 3)
    params = init_params(k_params)

    # train=True path indexes obs_len + pred_len timesteps of both trajectories.
    T = OBS_LEN + PRED_LEN          # 14
    N_OTHERS = 3
    target = jax.random.normal(k_tgt, (T, 1, INPUT_SIZE), dtype=jnp.float32)
    others = jax.random.normal(k_oth, (T, N_OTHERS, INPUT_SIZE), dtype=jnp.float32) * 1.5

    out = social_lstm_forward(target, others, params)
    out = jax.block_until_ready(out)
    assert out.shape == (T, 1, INPUT_SIZE) and out.dtype == jnp.float32
    print("KERNEL_OK")
</pallas_src>

<mosaic_0001>
module attributes {stable_mosaic.version = 11 : i64} {
  func.func @_social_lstm_kernel(%arg0: i32, %arg1: memref<1x112x2xf32, #tpu.memory_space<vmem>>, %arg2: memref<1x112x1xi32, #tpu.memory_space<vmem>>, %arg3: memref<14x112xf32, #tpu.memory_space<vmem>>, %arg4: memref<14x112xf32, #tpu.memory_space<vmem>>, %arg5: memref<2x256xf32, #tpu.memory_space<vmem>>, %arg6: memref<64x256xf32, #tpu.memory_space<vmem>>, %arg7: memref<1x256xf32, #tpu.memory_space<vmem>>, %arg8: memref<1024x64xf32, #tpu.memory_space<vmem>>, %arg9: memref<1x64xf32, #tpu.memory_space<vmem>>, %arg10: memref<64x64xf32, #tpu.memory_space<vmem>>, %arg11: memref<1x64xf32, #tpu.memory_space<vmem>>, %arg12: memref<64x128xf32, #tpu.memory_space<vmem>>, %arg13: memref<1x128xf32, #tpu.memory_space<vmem>>, %arg14: memref<1x14x128xf32, #tpu.memory_space<vmem>>, %arg15: memref<112x256xf32, #tpu.memory_space<vmem>>, %arg16: memref<112x64xf32, #tpu.memory_space<vmem>>) attributes {dimension_semantics = [#tpu.dimension_semantics<parallel>], iteration_bounds = array<i64: 1>, scalar_prefetch = 0 : i64, scratch_operands = 2 : i64, tpu.core_type = #tpu.core_type<tc>, window_params = [{transform_indices = @transform_0, window_bounds = array<i64: 1, 112, 2>}, {transform_indices = @transform_1, window_bounds = array<i64: 1, 112, 1>}, {pipeline_mode = #tpu.pipeline_mode<synchronous>, transform_indices = @transform_2, window_bounds = array<i64: 14, 112>}, {pipeline_mode = #tpu.pipeline_mode<synchronous>, transform_indices = @transform_3, window_bounds = array<i64: 14, 112>}, {pipeline_mode = #tpu.pipeline_mode<synchronous>, transform_indices = @transform_4, window_bounds = array<i64: 2, 256>}, {pipeline_mode = #tpu.pipeline_mode<synchronous>, transform_indices = @transform_5, window_bounds = array<i64: 64, 256>}, {pipeline_mode = #tpu.pipeline_mode<synchronous>, transform_indices = @transform_6, window_bounds = array<i64: 1, 256>}, {pipeline_mode = #tpu.pipeline_mode<synchronous>, transform_indices = @transform_7, window_bounds = array<i64: 1024, 64>}, {pipeline_mode = #tpu.pipeline_mode<synchronous>, transform_indices = @transform_8, window_bounds = array<i64: 1, 64>}, {pipeline_mode = #tpu.pipeline_mode<synchronous>, transform_indices = @transform_9, window_bounds = array<i64: 64, 64>}, {pipeline_mode = #tpu.pipeline_mode<synchronous>, transform_indices = @transform_10, window_bounds = array<i64: 1, 64>}, {pipeline_mode = #tpu.pipeline_mode<synchronous>, transform_indices = @transform_11, window_bounds = array<i64: 64, 128>}, {pipeline_mode = #tpu.pipeline_mode<synchronous>, transform_indices = @transform_12, window_bounds = array<i64: 1, 128>}, {transform_indices = @transform_13, window_bounds = array<i64: 1, 14, 128>}]} {
    %c0 = arith.constant 0 : index
    %c0_0 = arith.constant 0 : index
    %c0_1 = arith.constant 0 : index
    %0 = vector.load %arg1[%c0, %c0_0, %c0_1] : memref<1x112x2xf32, #tpu.memory_space<vmem>>, vector<1x112x2xf32>
    %1 = vector.shape_cast %0 : vector<1x112x2xf32> to vector<112x2xf32>
    %c0_2 = arith.constant 0 : index
    %c0_3 = arith.constant 0 : index
    %2 = vector.load %arg5[%c0_2, %c0_3] : memref<2x256xf32, #tpu.memory_space<vmem>>, vector<2x256xf32>
    %cst = arith.constant dense<0.000000e+00> : vector<112x256xf32>
    %3 = tpu.matmul %1, %2, %cst {dimension_numbers = #tpu.dot_dimension_numbers<[1], [0], [0], [1], [0, 0, 1, 1], [], []>} : vector<112x2xf32>, vector<2x256xf32>, vector<112x256xf32> -> vector<112x256xf32>
    %c0_4 = arith.constant 0 : index
    %c0_5 = arith.constant 0 : index
    %4 = vector.load %arg7[%c0_4, %c0_5] : memref<1x256xf32, #tpu.memory_space<vmem>>, vector<1x256xf32>
    %5 = vector.broadcast %4 : vector<1x256xf32> to vector<112x256xf32>
    %6 = arith.addf %3, %5 : vector<112x256xf32>
    %c0_6 = arith.constant 0 : index
    %c0_7 = arith.constant 0 : index
    %7 = vector.load %arg15[%c0_6, %c0_7] : memref<112x256xf32, #tpu.memory_space<vmem>>, vector<112x256xf32>
    tpu.vector_store %arg15[%c0_6, %c0_7], %6 {strides = array<i32>} : memref<112x256xf32, #tpu.memory_space<vmem>>, vector<112x256xf32>,
    %c0_8 = arith.constant 0 : index
    %c0_9 = arith.constant 0 : index
    %8 = vector.load %arg6[%c0_8, %c0_9] : memref<64x256xf32, #tpu.memory_space<vmem>>, vector<64x256xf32>
    %cst_10 = arith.constant 0.000000e+00 : f32
    %9 = vector.broadcast %cst_10 : f32 to vector<8x64xf32>
    %cst_11 = arith.constant 0.000000e+00 : f32
    %10 = vector.broadcast %cst_11 : f32 to vector<8x64xf32>
    %c0_12 = arith.constant 0 : index
    %c0_13 = arith.constant 0 : index
    %11 = vector.load %arg15[%c0_12, %c0_13] : memref<112x256xf32, #tpu.memory_space<vmem>>, vector<8x256xf32>
    %cst_14 = arith.constant dense<0.000000e+00> : vector<8x256xf32>
    %12 = tpu.matmul %9, %8, %cst_14 {dimension_numbers = #tpu.dot_dimension_numbers<[1], [0], [0], [1], [0, 0, 1, 1], [], []>} : vector<8x64xf32>, vector<64x256xf32>, vector<8x256xf32> -> vector<8x256xf32>
    %13 = arith.addf %11, %12 : vector<8x256xf32>
    %14 = vector.extract_strided_slice %13 {offsets = [0, 0], sizes = [8, 192], strides = [1, 1]} : vector<8x256xf32> to vector<8x192xf32>
    %15 = arith.negf %14 : vector<8x192xf32>
    %16 = math.exp %15 : vector<8x192xf32>
    %cst_15 = arith.constant 1.000000e+00 : f32
    %17 = vector.broadcast %cst_15 : f32 to vector<8x192xf32>
    %18 = arith.addf %17, %16 : vector<8x192xf32>
    %19 = arith.divf %17, %18 : vector<8x192xf32>
    %20 = vector.extract_strided_slice %13 {offsets = [0, 192], sizes = [8, 64], strides = [1, 1]} : vector<8x256xf32> to vector<8x64xf32>
    %21 = math.tanh %20 : vector<8x64xf32>
    %22 = vector.extract_strided_slice %19 {offsets = [0, 0], sizes = [8, 64], strides = [1, 1]} : vector<8x192xf32> to vector<8x64xf32>
    %23 = vector.extract_strided_slice %19 {offsets = [0, 64], sizes = [8, 64], strides = [1, 1]} : vector<8x192xf32> to vector<8x64xf32>
    %24 = vector.extract_strided_slice %19 {offsets = [0, 128], sizes = [8, 64], strides = [1, 1]} : vector<8x192xf32> to vector<8x64xf32>
    %25 = arith.mulf %23, %10 : vector<8x64xf32>
    %26 = arith.mulf %22, %21 : vector<8x64xf32>
    %27 = arith.addf %25, %26 : vector<8x64xf32>
    %28 = math.tanh %27 : vector<8x64xf32>
    %29 = arith.mulf %24, %28 : vector<8x64xf32>
    %c0_16 = arith.constant 0 : index
    %c0_17 = arith.constant 0 : index
    %30 = vector.load %arg16[%c0_16, %c0_17] : memref<112x64xf32, #tpu.memory_space<vmem>>, vector<8x64xf32>
    tpu.vector_store %arg16[%c0_16, %c0_17], %29 {strides = array<i32>} : memref<112x64xf32, #tpu.memory_space<vmem>>, vector<8x64xf32>,
    %c8 = arith.constant 8 : index
    %c0_18 = arith.constant 0 : index
    %31 = vector.load %arg15[%c8, %c0_18] : memref<112x256xf32, #tpu.memory_space<vmem>>, vector<8x256xf32>
    %cst_19 = arith.constant dense<0.000000e+00> : vector<8x256xf32>
    %32 = tpu.matmul %29, %8, %cst_19 {dimension_numbers = #tpu.dot_dimension_numbers<[1], [0], [0], [1], [0, 0, 1, 1], [], []>} : vector<8x64xf32>, vector<64x256xf32>, vector<8x256xf32> -> vector<8x256xf32>
    %33 = arith.addf %31, %32 : vector<8x256xf32>
    %34 = vector.extract_strided_slice %33 {offsets = [0, 0], sizes = [8, 192], strides = [1, 1]} : vector<8x256xf32> to vector<8x192xf32>
    %35 = arith.negf %34 : vector<8x192xf32>
    %36 = math.exp %35 : vector<8x192xf32>
    %cst_20 = arith.constant 1.000000e+00 : f32
    %37 = vector.broadcast %cst_20 : f32 to vector<8x192xf32>
    %38 = arith.addf %37, %36 : vector<8x192xf32>
    %39 = arith.divf %37, %38 : vector<8x192xf32>
    %40 = vector.extract_strided_slice %33 {offsets = [0, 192], sizes = [8, 64], strides = [1, 1]} : vector<8x256xf32> to vector<8x64xf32>
    %41 = math.tanh %40 : vector<8x64xf32>
    %42 = vector.extract_strided_slice %39 {offsets = [0, 0], sizes = [8, 64], strides = [1, 1]} : vector<8x192xf32> to vector<8x64xf32>
    %43 = vector.extract_strided_slice %39 {offsets = [0, 64], sizes = [8, 64], strides = [1, 1]} : vector<8x192xf32> to vector<8x64xf32>
    %44 = vector.extract_strided_slice %39 {offsets = [0, 128], sizes = [8, 64], strides = [1, 1]} : vector<8x192xf32> to vector<8x64xf32>
    %45 = arith.mulf %43, %27 : vector<8x64xf32>
    %46 = arith.mulf %42, %41 : vector<8x64xf32>
    %47 = arith.addf %45, %46 : vector<8x64xf32>
    %48 = math.tanh %47 : vector<8x64xf32>
    %49 = arith.mulf %44, %48 : vector<8x64xf32>
    %c8_21 = arith.constant 8 : index
    %c0_22 = arith.constant 0 : index
    %50 = vector.load %arg16[%c8_21, %c0_22] : memref<112x64xf32, #tpu.memory_space<vmem>>, vector<8x64xf32>
    tpu.vector_store %arg16[%c8_21, %c0_22], %49 {strides = array<i32>} : memref<112x64xf32, #tpu.memory_space<vmem>>, vector<8x64xf32>,
    %c16 = arith.constant 16 : index
    %c0_23 = arith.constant 0 : index
    %51 = vector.load %arg15[%c16, %c0_23] : memref<112x256xf32, #tpu.memory_space<vmem>>, vector<8x256xf32>
    %cst_24 = arith.constant dense<0.000000e+00> : vector<8x256xf32>
    %52 = tpu.matmul %49, %8, %cst_24 {dimension_numbers = #tpu.dot_dimension_numbers<[1], [0], [0], [1], [0, 0, 1, 1], [], []>} : vector<8x64xf32>, vector<64x256xf32>, vector<8x256xf32> -> vector<8x256xf32>
    %53 = arith.addf %51, %52 : vector<8x256xf32>
    %54 = vector.extract_strided_slice %53 {offsets = [0, 0], sizes = [8, 192], strides = [1, 1]} : vector<8x256xf32> to vector<8x192xf32>
    %55 = arith.negf %54 : vector<8x192xf32>
    %56 = math.exp %55 : vector<8x192xf32>
    %cst_25 = arith.constant 1.000000e+00 : f32
    %57 = vector.broadcast %cst_25 : f32 to vector<8x192xf32>
    %58 = arith.addf %57, %56 : vector<8x192xf32>
    %59 = arith.divf %57, %58 : vector<8x192xf32>
    %60 = vector.extract_strided_slice %53 {offsets = [0, 192], sizes = [8, 64], strides = [1, 1]} : vector<8x256xf32> to vector<8x64xf32>
    %61 = math.tanh %60 : vector<8x64xf32>
    %62 = vector.extract_strided_slice %59 {offsets = [0, 0], sizes = [8, 64], strides = [1, 1]} : vector<8x192xf32> to vector<8x64xf32>
    %63 = vector.extract_strided_slice %59 {offsets = [0, 64], sizes = [8, 64], strides = [1, 1]} : vector<8x192xf32> to vector<8x64xf32>
    %64 = vector.extract_strided_slice %59 {offsets = [0, 128], sizes = [8, 64], strides = [1, 1]} : vector<8x192xf32> to vector<8x64xf32>
    %65 = arith.mulf %63, %47 : vector<8x64xf32>
    %66 = arith.mulf %62, %61 : vector<8x64xf32>
    %67 = arith.addf %65, %66 : vector<8x64xf32>
    %68 = math.tanh %67 : vector<8x64xf32>
    %69 = arith.mulf %64, %68 : vector<8x64xf32>
    %c16_26 = arith.constant 16 : index
    %c0_27 = arith.constant 0 : index
    %70 = vector.load %arg16[%c16_26, %c0_27] : memref<112x64xf32, #tpu.memory_space<vmem>>, vector<8x64xf32>
    tpu.vector_store %arg16[%c16_26, %c0_27], %69 {strides = array<i32>} : memref<112x64xf32, #tpu.memory_space<vmem>>, vector<8x64xf32>,
    %c24 = arith.constant 24 : index
    %c0_28 = arith.constant 0 : index
    %71 = vector.load %arg15[%c24, %c0_28] : memref<112x256xf32, #tpu.memory_space<vmem>>, vector<8x256xf32>
    %cst_29 = arith.constant dense<0.000000e+00> : vector<8x256xf32>
    %72 = tpu.matmul %69, %8, %cst_29 {dimension_numbers = #tpu.dot_dimension_numbers<[1], [0], [0], [1], [0, 0, 1, 1], [], []>} : vector<8x64xf32>, vector<64x256xf32>, vector<8x256xf32> -> vector<8x256xf32>
    %73 = arith.addf %71, %72 : vector<8x256xf32>
    %74 = vector.extract_strided_slice %73 {offsets = [0, 0], sizes = [8, 192], strides = [1, 1]} : vector<8x256xf32> to vector<8x192xf32>
    %75 = arith.negf %74 : vector<8x192xf32>
    %76 = math.exp %75 : vector<8x192xf32>
    %cst_30 = arith.constant 1.000000e+00 : f32
    %77 = vector.broadcast %cst_30 : f32 to vector<8x192xf32>
    %78 = arith.addf %77, %76 : vector<8x192xf32>
    %79 = arith.divf %77, %78 : vector<8x192xf32>
    %80 = vector.extract_strided_slice %73 {offsets = [0, 192], sizes = [8, 64], strides = [1, 1]} : vector<8x256xf32> to vector<8x64xf32>
    %81 = math.tanh %80 : vector<8x64xf32>
    %82 = vector.extract_strided_slice %79 {offsets = [0, 0], sizes = [8, 64], strides = [1, 1]} : vector<8x192xf32> to vector<8x64xf32>
    %83 = vector.extract_strided_slice %79 {offsets = [0, 64], sizes = [8, 64], strides = [1, 1]} : vector<8x192xf32> to vector<8x64xf32>
    %84 = vector.extract_strided_slice %79 {offsets = [0, 128], sizes = [8, 64], strides = [1, 1]} : vector<8x192xf32> to vector<8x64xf32>
    %85 = arith.mulf %83, %67 : vector<8x64xf32>
    %86 = arith.mulf %82, %81 : vector<8x64xf32>
    %87 = arith.addf %85, %86 : vector<8x64xf32>
    %88 = math.tanh %87 : vector<8x64xf32>
    %89 = arith.mulf %84, %88 : vector<8x64xf32>
    %c24_31 = arith.constant 24 : index
    %c0_32 = arith.constant 0 : index
    %90 = vector.load %arg16[%c24_31, %c0_32] : memref<112x64xf32, #tpu.memory_space<vmem>>, vector<8x64xf32>
    tpu.vector_store %arg16[%c24_31, %c0_32], %89 {strides = array<i32>} : memref<112x64xf32, #tpu.memory_space<vmem>>, vector<8x64xf32>,
    %c32 = arith.constant 32 : index
    %c0_33 = arith.constant 0 : index
    %91 = vector.load %arg15[%c32, %c0_33] : memref<112x256xf32, #tpu.memory_space<vmem>>, vector<8x256xf32>
    %cst_34 = arith.constant dense<0.000000e+00> : vector<8x256xf32>
    %92 = tpu.matmul %89, %8, %cst_34 {dimension_numbers = #tpu.dot_dimension_numbers<[1], [0], [0], [1], [0, 0, 1, 1], [], []>} : vector<8x64xf32>, vector<64x256xf32>, vector<8x256xf32> -> vector<8x256xf32>
    %93 = arith.addf %91, %92 : vector<8x256xf32>
    %94 = vector.extract_strided_slice %93 {offsets = [0, 0], sizes = [8, 192], strides = [1, 1]} : vector<8x256xf32> to vector<8x192xf32>
    %95 = arith.negf %94 : vector<8x192xf32>
    %96 = math.exp %95 : vector<8x192xf32>
    %cst_35 = arith.constant 1.000000e+00 : f32
    %97 = vector.broadcast %cst_35 : f32 to vector<8x192xf32>
    %98 = arith.addf %97, %96 : vector<8x192xf32>
    %99 = arith.divf %97, %98 : vector<8x192xf32>
    %100 = vector.extract_strided_slice %93 {offsets = [0, 192], sizes = [8, 64], strides = [1, 1]} : vector<8x256xf32> to vector<8x64xf32>
    %101 = math.tanh %100 : vector<8x64xf32>
    %102 = vector.extract_strided_slice %99 {offsets = [0, 0], sizes = [8, 64], strides = [1, 1]} : vector<8x192xf32> to vector<8x64xf32>
    %103 = vector.extract_strided_slice %99 {offsets = [0, 64], sizes = [8, 64], strides = [1, 1]} : vector<8x192xf32> to vector<8x64xf32>
    %104 = vector.extract_strided_slice %99 {offsets = [0, 128], sizes = [8, 64], strides = [1, 1]} : vector<8x192xf32> to vector<8x64xf32>
    %105 = arith.mulf %103, %87 : vector<8x64xf32>
    %106 = arith.mulf %102, %101 : vector<8x64xf32>
    %107 = arith.addf %105, %106 : vector<8x64xf32>
    %108 = math.tanh %107 : vector<8x64xf32>
    %109 = arith.mulf %104, %108 : vector<8x64xf32>
    %c32_36 = arith.constant 32 : index
    %c0_37 = arith.constant 0 : index
    %110 = vector.load %arg16[%c32_36, %c0_37] : memref<112x64xf32, #tpu.memory_space<vmem>>, vector<8x64xf32>
    tpu.vector_store %arg16[%c32_36, %c0_37], %109 {strides = array<i32>} : memref<112x64xf32, #tpu.memory_space<vmem>>, vector<8x64xf32>,
    %c40 = arith.constant 40 : index
    %c0_38 = arith.constant 0 : index
    %111 = vector.load %arg15[%c40, %c0_38] : memref<112x256xf32, #tpu.memory_space<vmem>>, vector<8x256xf32>
    %cst_39 = arith.constant dense<0.000000e+00> : vector<8x256xf32>
    %112 = tpu.matmul %109, %8, %cst_39 {dimension_numbers = #tpu.dot_dimension_numbers<[1], [0], [0], [1], [0, 0, 1, 1], [], []>} : vector<8x64xf32>, vector<64x256xf32>, vector<8x256xf32> -> vector<8x256xf32>
    %113 = arith.addf %111, %112 : vector<8x256xf32>
    %114 = vector.extract_strided_slice %113 {offsets = [0, 0], sizes = [8, 192], strides = [1, 1]} : vector<8x256xf32> to vector<8x192xf32>
    %115 = arith.negf %114 : vector<8x192xf32>
    %116 = math.exp %115 : vector<8x192xf32>
    %cst_40 = arith.constant 1.000000e+00 : f32
    %117 = vector.broadcast %cst_40 : f32 to vector<8x192xf32>
    %118 = arith.addf %117, %116 : vector<8x192xf32>
    %119 = arith.divf %117, %118 : vector<8x192xf32>
    %120 = vector.extract_strided_slice %113 {offsets = [0, 192], sizes = [8, 64], strides = [1, 1]} : vector<8x256xf32> to vector<8x64xf32>
    %121 = math.tanh %120 : vector<8x64xf32>
    %122 = vector.extract_strided_slice %119 {offsets = [0, 0], sizes = [8, 64], strides = [1, 1]} : vector<8x192xf32> to vector<8x64xf32>
    %123 = vector.extract_strided_slice %119 {offsets = [0, 64], sizes = [8, 64], strides = [1, 1]} : vector<8x192xf32> to vector<8x64xf32>
    %124 = vector.extract_strided_slice %119 {offsets = [0, 128], sizes = [8, 64], strides = [1, 1]} : vector<8x192xf32> to vector<8x64xf32>
    %125 = arith.mulf %123, %107 : vector<8x64xf32>
    %126 = arith.mulf %122, %121 : vector<8x64xf32>
    %127 = arith.addf %125, %126 : vector<8x64xf32>
    %128 = math.tanh %127 : vector<8x64xf32>
    %129 = arith.mulf %124, %128 : vector<8x64xf32>
    %c40_41 = arith.constant 40 : index
    %c0_42 = arith.constant 0 : index
    %130 = vector.load %arg16[%c40_41, %c0_42] : memref<112x64xf32, #tpu.memory_space<vmem>>, vector<8x64xf32>
    tpu.vector_store %arg16[%c40_41, %c0_42], %129 {strides = array<i32>} : memref<112x64xf32, #tpu.memory_space<vmem>>, vector<8x64xf32>,
    %c48 = arith.constant 48 : index
    %c0_43 = arith.constant 0 : index
    %131 = vector.load %arg15[%c48, %c0_43] : memref<112x256xf32, #tpu.memory_space<vmem>>, vector<8x256xf32>
    %cst_44 = arith.constant dense<0.000000e+00> : vector<8x256xf32>
    %132 = tpu.matmul %129, %8, %cst_44 {dimension_numbers = #tpu.dot_dimension_numbers<[1], [0], [0], [1], [0, 0, 1, 1], [], []>} : vector<8x64xf32>, vector<64x256xf32>, vector<8x256xf32> -> vector<8x256xf32>
    %133 = arith.addf %131, %132 : vector<8x256xf32>
    %134 = vector.extract_strided_slice %133 {offsets = [0, 0], sizes = [8, 192], strides = [1, 1]} : vector<8x256xf32> to vector<8x192xf32>
    %135 = arith.negf %134 : vector<8x192xf32>
    %136 = math.exp %135 : vector<8x192xf32>
    %cst_45 = arith.constant 1.000000e+00 : f32
    %137 = vector.broadcast %cst_45 : f32 to vector<8x192xf32>
    %138 = arith.addf %137, %136 : vector<8x192xf32>
    %139 = arith.divf %137, %138 : vector<8x192xf32>
    %140 = vector.extract_strided_slice %133 {offsets = [0, 192], sizes = [8, 64], strides = [1, 1]} : vector<8x256xf32> to vector<8x64xf32>
    %141 = math.tanh %140 : vector<8x64xf32>
    %142 = vector.extract_strided_slice %139 {offsets = [0, 0], sizes = [8, 64], strides = [1, 1]} : vector<8x192xf32> to vector<8x64xf32>
    %143 = vector.extract_strided_slice %139 {offsets = [0, 64], sizes = [8, 64], strides = [1, 1]} : vector<8x192xf32> to vector<8x64xf32>
    %144 = vector.extract_strided_slice %139 {offsets = [0, 128], sizes = [8, 64], strides = [1, 1]} : vector<8x192xf32> to vector<8x64xf32>
    %145 = arith.mulf %143, %127 : vector<8x64xf32>
    %146 = arith.mulf %142, %141 : vector<8x64xf32>
    %147 = arith.addf %145, %146 : vector<8x64xf32>
    %148 = math.tanh %147 : vector<8x64xf32>
    %149 = arith.mulf %144, %148 : vector<8x64xf32>
    %c48_46 = arith.constant 48 : index
    %c0_47 = arith.constant 0 : index
    %150 = vector.load %arg16[%c48_46, %c0_47] : memref<112x64xf32, #tpu.memory_space<vmem>>, vector<8x64xf32>
    tpu.vector_store %arg16[%c48_46, %c0_47], %149 {strides = array<i32>} : memref<112x64xf32, #tpu.memory_space<vmem>>, vector<8x64xf32>,
    %c56 = arith.constant 56 : index
    %c0_48 = arith.constant 0 : index
    %151 = vector.load %arg15[%c56, %c0_48] : memref<112x256xf32, #tpu.memory_space<vmem>>, vector<8x256xf32>
    %cst_49 = arith.constant dense<0.000000e+00> : vector<8x256xf32>
    %152 = tpu.matmul %149, %8, %cst_49 {dimension_numbers = #tpu.dot_dimension_numbers<[1], [0], [0], [1], [0, 0, 1, 1], [], []>} : vector<8x64xf32>, vector<64x256xf32>, vector<8x256xf32> -> vector<8x256xf32>
    %153 = arith.addf %151, %152 : vector<8x256xf32>
    %154 = vector.extract_strided_slice %153 {offsets = [0, 0], sizes = [8, 192], strides = [1, 1]} : vector<8x256xf32> to vector<8x192xf32>
    %155 = arith.negf %154 : vector<8x192xf32>
    %156 = math.exp %155 : vector<8x192xf32>
    %cst_50 = arith.constant 1.000000e+00 : f32
    %157 = vector.broadcast %cst_50 : f32 to vector<8x192xf32>
    %158 = arith.addf %157, %156 : vector<8x192xf32>
    %159 = arith.divf %157, %158 : vector<8x192xf32>
    %160 = vector.extract_strided_slice %153 {offsets = [0, 192], sizes = [8, 64], strides = [1, 1]} : vector<8x256xf32> to vector<8x64xf32>
    %161 = math.tanh %160 : vector<8x64xf32>
    %162 = vector.extract_strided_slice %159 {offsets = [0, 0], sizes = [8, 64], strides = [1, 1]} : vector<8x192xf32> to vector<8x64xf32>
    %163 = vector.extract_strided_slice %159 {offsets = [0, 64], sizes = [8, 64], strides = [1, 1]} : vector<8x192xf32> to vector<8x64xf32>
    %164 = vector.extract_strided_slice %159 {offsets = [0, 128], sizes = [8, 64], strides = [1, 1]} : vector<8x192xf32> to vector<8x64xf32>
    %165 = arith.mulf %163, %147 : vector<8x64xf32>
    %166 = arith.mulf %162, %161 : vector<8x64xf32>
    %167 = arith.addf %165, %166 : vector<8x64xf32>
    %168 = math.tanh %167 : vector<8x64xf32>
    %169 = arith.mulf %164, %168 : vector<8x64xf32>
    %c56_51 = arith.constant 56 : index
    %c0_52 = arith.constant 0 : index
    %170 = vector.load %arg16[%c56_51, %c0_52] : memref<112x64xf32, #tpu.memory_space<vmem>>, vector<8x64xf32>
    tpu.vector_store %arg16[%c56_51, %c0_52], %169 {strides = array<i32>} : memref<112x64xf32, #tpu.memory_space<vmem>>, vector<8x64xf32>,
    %c64 = arith.constant 64 : index
    %c0_53 = arith.constant 0 : index
    %171 = vector.load %arg15[%c64, %c0_53] : memref<112x256xf32, #tpu.memory_space<vmem>>, vector<8x256xf32>
    %cst_54 = arith.constant dense<0.000000e+00> : vector<8x256xf32>
    %172 = tpu.matmul %169, %8, %cst_54 {dimension_numbers = #tpu.dot_dimension_numbers<[1], [0], [0], [1], [0, 0, 1, 1], [], []>} : vector<8x64xf32>, vector<64x256xf32>, vector<8x256xf32> -> vector<8x256xf32>
    %173 = arith.addf %171, %172 : vector<8x256xf32>
    %174 = vector.extract_strided_slice %173 {offsets = [0, 0], sizes = [8, 192], strides = [1, 1]} : vector<8x256xf32> to vector<8x192xf32>
    %175 = arith.negf %174 : vector<8x192xf32>
    %176 = math.exp %175 : vector<8x192xf32>
    %cst_55 = arith.constant 1.000000e+00 : f32
    %177 = vector.broadcast %cst_55 : f32 to vector<8x192xf32>
    %178 = arith.addf %177, %176 : vector<8x192xf32>
    %179 = arith.divf %177, %178 : vector<8x192xf32>
    %180 = vector.extract_strided_slice %173 {offsets = [0, 192], sizes = [8, 64], strides = [1, 1]} : vector<8x256xf32> to vector<8x64xf32>
    %181 = math.tanh %180 : vector<8x64xf32>
    %182 = vector.extract_strided_slice %179 {offsets = [0, 0], sizes = [8, 64], strides = [1, 1]} : vector<8x192xf32> to vector<8x64xf32>
    %183 = vector.extract_strided_slice %179 {offsets = [0, 64], sizes = [8, 64], strides = [1, 1]} : vector<8x192xf32> to vector<8x64xf32>
    %184 = vector.extract_strided_slice %179 {offsets = [0, 128], sizes = [8, 64], strides = [1, 1]} : vector<8x192xf32> to vector<8x64xf32>
    %185 = arith.mulf %183, %167 : vector<8x64xf32>
    %186 = arith.mulf %182, %181 : vector<8x64xf32>
    %187 = arith.addf %185, %186 : vector<8x64xf32>
    %188 = math.tanh %187 : vector<8x64xf32>
    %189 = arith.mulf %184, %188 : vector<8x64xf32>
    %c64_56 = arith.constant 64 : index
    %c0_57 = arith.constant 0 : index
    %190 = vector.load %arg16[%c64_56, %c0_57] : memref<112x64xf32, #tpu.memory_space<vmem>>, vector<8x64xf32>
    tpu.vector_store %arg16[%c64_56, %c0_57], %189 {strides = array<i32>} : memref<112x64xf32, #tpu.memory_space<vmem>>, vector<8x64xf32>,
    %c72 = arith.constant 72 : index
    %c0_58 = arith.constant 0 : index
    %191 = vector.load %arg15[%c72, %c0_58] : memref<112x256xf32, #tpu.memory_space<vmem>>, vector<8x256xf32>
    %cst_59 = arith.constant dense<0.000000e+00> : vector<8x256xf32>
    %192 = tpu.matmul %189, %8, %cst_59 {dimension_numbers = #tpu.dot_dimension_numbers<[1], [0], [0], [1], [0, 0, 1, 1], [], []>} : vector<8x64xf32>, vector<64x256xf32>, vector<8x256xf32> -> vector<8x256xf32>
    %193 = arith.addf %191, %192 : vector<8x256xf32>
    %194 = vector.extract_strided_slice %193 {offsets = [0, 0], sizes = [8, 192], strides = [1, 1]} : vector<8x256xf32> to vector<8x192xf32>
    %195 = arith.negf %194 : vector<8x192xf32>
    %196 = math.exp %195 : vector<8x192xf32>
    %cst_60 = arith.constant 1.000000e+00 : f32
    %197 = vector.broadcast %cst_60 : f32 to vector<8x192xf32>
    %198 = arith.addf %197, %196 : vector<8x192xf32>
    %199 = arith.divf %197, %198 : vector<8x192xf32>
    %200 = vector.extract_strided_slice %193 {offsets = [0, 192], sizes = [8, 64], strides = [1, 1]} : vector<8x256xf32> to vector<8x64xf32>
    %201 = math.tanh %200 : vector<8x64xf32>
    %202 = vector.extract_strided_slice %199 {offsets = [0, 0], sizes = [8, 64], strides = [1, 1]} : vector<8x192xf32> to vector<8x64xf32>
    %203 = vector.extract_strided_slice %199 {offsets = [0, 64], sizes = [8, 64], strides = [1, 1]} : vector<8x192xf32> to vector<8x64xf32>
    %204 = vector.extract_strided_slice %199 {offsets = [0, 128], sizes = [8, 64], strides = [1, 1]} : vector<8x192xf32> to vector<8x64xf32>
    %205 = arith.mulf %203, %187 : vector<8x64xf32>
    %206 = arith.mulf %202, %201 : vector<8x64xf32>
    %207 = arith.addf %205, %206 : vector<8x64xf32>
    %208 = math.tanh %207 : vector<8x64xf32>
    %209 = arith.mulf %204, %208 : vector<8x64xf32>
    %c72_61 = arith.constant 72 : index
    %c0_62 = arith.constant 0 : index
    %210 = vector.load %arg16[%c72_61, %c0_62] : memref<112x64xf32, #tpu.memory_space<vmem>>, vector<8x64xf32>
    tpu.vector_store %arg16[%c72_61, %c0_62], %209 {strides = array<i32>} : memref<112x64xf32, #tpu.memory_space<vmem>>, vector<8x64xf32>,
    %c80 = arith.constant 80 : index
    %c0_63 = arith.constant 0 : index
    %211 = vector.load %arg15[%c80, %c0_63] : memref<112x256xf32, #tpu.memory_space<vmem>>, vector<8x256xf32>
    %cst_64 = arith.constant dense<0.000000e+00> : vector<8x256xf32>
    %212 = tpu.matmul %209, %8, %cst_64 {dimension_numbers = #tpu.dot_dimension_numbers<[1], [0], [0], [1], [0, 0, 1, 1], [], []>} : vector<8x64xf32>, vector<64x256xf32>, vector<8x256xf32> -> vector<8x256xf32>
    %213 = arith.addf %211, %212 : vector<8x256xf32>
    %214 = vector.extract_strided_slice %213 {offsets = [0, 0], sizes = [8, 192], strides = [1, 1]} : vector<8x256xf32> to vector<8x192xf32>
    %215 = arith.negf %214 : vector<8x192xf32>
    %216 = math.exp %215 : vector<8x192xf32>
    %cst_65 = arith.constant 1.000000e+00 : f32
    %217 = vector.broadcast %cst_65 : f32 to vector<8x192xf32>
    %218 = arith.addf %217, %216 : vector<8x192xf32>
    %219 = arith.divf %217, %218 : vector<8x192xf32>
    %220 = vector.extract_strided_slice %213 {offsets = [0, 192], sizes = [8, 64], strides = [1, 1]} : vector<8x256xf32> to vector<8x64xf32>
    %221 = math.tanh %220 : vector<8x64xf32>
    %222 = vector.extract_strided_slice %219 {offsets = [0, 0], sizes = [8, 64], strides = [1, 1]} : vector<8x192xf32> to vector<8x64xf32>
    %223 = vector.extract_strided_slice %219 {offsets = [0, 64], sizes = [8, 64], strides = [1, 1]} : vector<8x192xf32> to vector<8x64xf32>
    %224 = vector.extract_strided_slice %219 {offsets = [0, 128], sizes = [8, 64], strides = [1, 1]} : vector<8x192xf32> to vector<8x64xf32>
    %225 = arith.mulf %223, %207 : vector<8x64xf32>
    %226 = arith.mulf %222, %221 : vector<8x64xf32>
    %227 = arith.addf %225, %226 : vector<8x64xf32>
    %228 = math.tanh %227 : vector<8x64xf32>
    %229 = arith.mulf %224, %228 : vector<8x64xf32>
    %c80_66 = arith.constant 80 : index
    %c0_67 = arith.constant 0 : index
    %230 = vector.load %arg16[%c80_66, %c0_67] : memref<112x64xf32, #tpu.memory_space<vmem>>, vector<8x64xf32>
    tpu.vector_store %arg16[%c80_66, %c0_67], %229 {strides = array<i32>} : memref<112x64xf32, #tpu.memory_space<vmem>>, vector<8x64xf32>,
    %c88 = arith.constant 88 : index
    %c0_68 = arith.constant 0 : index
    %231 = vector.load %arg15[%c88, %c0_68] : memref<112x256xf32, #tpu.memory_space<vmem>>, vector<8x256xf32>
    %cst_69 = arith.constant dense<0.000000e+00> : vector<8x256xf32>
    %232 = tpu.matmul %229, %8, %cst_69 {dimension_numbers = #tpu.dot_dimension_numbers<[1], [0], [0], [1], [0, 0, 1, 1], [], []>} : vector<8x64xf32>, vector<64x256xf32>, vector<8x256xf32> -> vector<8x256xf32>
    %233 = arith.addf %231, %232 : vector<8x256xf32>
    %234 = vector.extract_strided_slice %233 {offsets = [0, 0], sizes = [8, 192], strides = [1, 1]} : vector<8x256xf32> to vector<8x192xf32>
    %235 = arith.negf %234 : vector<8x192xf32>
    %236 = math.exp %235 : vector<8x192xf32>
    %cst_70 = arith.constant 1.000000e+00 : f32
    %237 = vector.broadcast %cst_70 : f32 to vector<8x192xf32>
    %238 = arith.addf %237, %236 : vector<8x192xf32>
    %239 = arith.divf %237, %238 : vector<8x192xf32>
    %240 = vector.extract_strided_slice %233 {offsets = [0, 192], sizes = [8, 64], strides = [1, 1]} : vector<8x256xf32> to vector<8x64xf32>
    %241 = math.tanh %240 : vector<8x64xf32>
    %242 = vector.extract_strided_slice %239 {offsets = [0, 0], sizes = [8, 64], strides = [1, 1]} : vector<8x192xf32> to vector<8x64xf32>
    %243 = vector.extract_strided_slice %239 {offsets = [0, 64], sizes = [8, 64], strides = [1, 1]} : vector<8x192xf32> to vector<8x64xf32>
    %244 = vector.extract_strided_slice %239 {offsets = [0, 128], sizes = [8, 64], strides = [1, 1]} : vector<8x192xf32> to vector<8x64xf32>
    %245 = arith.mulf %243, %227 : vector<8x64xf32>
    %246 = arith.mulf %242, %241 : vector<8x64xf32>
    %247 = arith.addf %245, %246 : vector<8x64xf32>
    %248 = math.tanh %247 : vector<8x64xf32>
    %249 = arith.mulf %244, %248 : vector<8x64xf32>
    %c88_71 = arith.constant 88 : index
    %c0_72 = arith.constant 0 : index
    %250 = vector.load %arg16[%c88_71, %c0_72] : memref<112x64xf32, #tpu.memory_space<vmem>>, vector<8x64xf32>
    tpu.vector_store %arg16[%c88_71, %c0_72], %249 {strides = array<i32>} : memref<112x64xf32, #tpu.memory_space<vmem>>, vector<8x64xf32>,
    %c96 = arith.constant 96 : index
    %c0_73 = arith.constant 0 : index
    %251 = vector.load %arg15[%c96, %c0_73] : memref<112x256xf32, #tpu.memory_space<vmem>>, vector<8x256xf32>
    %cst_74 = arith.constant dense<0.000000e+00> : vector<8x256xf32>
    %252 = tpu.matmul %249, %8, %cst_74 {dimension_numbers = #tpu.dot_dimension_numbers<[1], [0], [0], [1], [0, 0, 1, 1], [], []>} : vector<8x64xf32>, vector<64x256xf32>, vector<8x256xf32> -> vector<8x256xf32>
    %253 = arith.addf %251, %252 : vector<8x256xf32>
    %254 = vector.extract_strided_slice %253 {offsets = [0, 0], sizes = [8, 192], strides = [1, 1]} : vector<8x256xf32> to vector<8x192xf32>
    %255 = arith.negf %254 : vector<8x192xf32>
    %256 = math.exp %255 : vector<8x192xf32>
    %cst_75 = arith.constant 1.000000e+00 : f32
    %257 = vector.broadcast %cst_75 : f32 to vector<8x192xf32>
    %258 = arith.addf %257, %256 : vector<8x192xf32>
    %259 = arith.divf %257, %258 : vector<8x192xf32>
    %260 = vector.extract_strided_slice %253 {offsets = [0, 192], sizes = [8, 64], strides = [1, 1]} : vector<8x256xf32> to vector<8x64xf32>
    %261 = math.tanh %260 : vector<8x64xf32>
    %262 = vector.extract_strided_slice %259 {offsets = [0, 0], sizes = [8, 64], strides = [1, 1]} : vector<8x192xf32> to vector<8x64xf32>
    %263 = vector.extract_strided_slice %259 {offsets = [0, 64], sizes = [8, 64], strides = [1, 1]} : vector<8x192xf32> to vector<8x64xf32>
    %264 = vector.extract_strided_slice %259 {offsets = [0, 128], sizes = [8, 64], strides = [1, 1]} : vector<8x192xf32> to vector<8x64xf32>
    %265 = arith.mulf %263, %247 : vector<8x64xf32>
    %266 = arith.mulf %262, %261 : vector<8x64xf32>
    %267 = arith.addf %265, %266 : vector<8x64xf32>
    %268 = math.tanh %267 : vector<8x64xf32>
    %269 = arith.mulf %264, %268 : vector<8x64xf32>
    %c96_76 = arith.constant 96 : index
    %c0_77 = arith.constant 0 : index
    %270 = vector.load %arg16[%c96_76, %c0_77] : memref<112x64xf32, #tpu.memory_space<vmem>>, vector<8x64xf32>
    tpu.vector_store %arg16[%c96_76, %c0_77], %269 {strides = array<i32>} : memref<112x64xf32, #tpu.memory_space<vmem>>, vector<8x64xf32>,
    %c104 = arith.constant 104 : index
    %c0_78 = arith.constant 0 : index
    %271 = vector.load %arg15[%c104, %c0_78] : memref<112x256xf32, #tpu.memory_space<vmem>>, vector<8x256xf32>
    %cst_79 = arith.constant dense<0.000000e+00> : vector<8x256xf32>
    %272 = tpu.matmul %269, %8, %cst_79 {dimension_numbers = #tpu.dot_dimension_numbers<[1], [0], [0], [1], [0, 0, 1, 1], [], []>} : vector<8x64xf32>, vector<64x256xf32>, vector<8x256xf32> -> vector<8x256xf32>
    %273 = arith.addf %271, %272 : vector<8x256xf32>
    %274 = vector.extract_strided_slice %273 {offsets = [0, 0], sizes = [8, 192], strides = [1, 1]} : vector<8x256xf32> to vector<8x192xf32>
    %275 = arith.negf %274 : vector<8x192xf32>
    %276 = math.exp %275 : vector<8x192xf32>
    %cst_80 = arith.constant 1.000000e+00 : f32
    %277 = vector.broadcast %cst_80 : f32 to vector<8x192xf32>
    %278 = arith.addf %277, %276 : vector<8x192xf32>
    %279 = arith.divf %277, %278 : vector<8x192xf32>
    %280 = vector.extract_strided_slice %273 {offsets = [0, 192], sizes = [8, 64], strides = [1, 1]} : vector<8x256xf32> to vector<8x64xf32>
    %281 = math.tanh %280 : vector<8x64xf32>
    %282 = vector.extract_strided_slice %279 {offsets = [0, 0], sizes = [8, 64], strides = [1, 1]} : vector<8x192xf32> to vector<8x64xf32>
    %283 = vector.extract_strided_slice %279 {offsets = [0, 64], sizes = [8, 64], strides = [1, 1]} : vector<8x192xf32> to vector<8x64xf32>
    %284 = vector.extract_strided_slice %279 {offsets = [0, 128], sizes = [8, 64], strides = [1, 1]} : vector<8x192xf32> to vector<8x64xf32>
    %285 = arith.mulf %283, %267 : vector<8x64xf32>
    %286 = arith.mulf %282, %281 : vector<8x64xf32>
    %287 = arith.addf %285, %286 : vector<8x64xf32>
    %288 = math.tanh %287 : vector<8x64xf32>
    %289 = arith.mulf %284, %288 : vector<8x64xf32>
    %c104_81 = arith.constant 104 : index
    %c0_82 = arith.constant 0 : index
    %290 = vector.load %arg16[%c104_81, %c0_82] : memref<112x64xf32, #tpu.memory_space<vmem>>, vector<8x64xf32>
    tpu.vector_store %arg16[%c104_81, %c0_82], %289 {strides = array<i32>} : memref<112x64xf32, #tpu.memory_space<vmem>>, vector<8x64xf32>,
    %c0_83 = arith.constant 0 : index
    %c0_84 = arith.constant 0 : index
    %291 = vector.load %arg16[%c0_83, %c0_84] : memref<112x64xf32, #tpu.memory_space<vmem>>, vector<112x64xf32>
    %c0_85 = arith.constant 0 : index
    %c0_86 = arith.constant 0 : index
    %292 = vector.load %arg4[%c0_85, %c0_86] : memref<14x112xf32, #tpu.memory_space<vmem>>, vector<14x112xf32>
    %cst_87 = arith.constant dense<0.000000e+00> : vector<14x64xf32>
    %293 = tpu.matmul %292, %291, %cst_87 {dimension_numbers = #tpu.dot_dimension_numbers<[1], [0], [0], [1], [0, 0, 1, 1], [], []>} : vector<14x112xf32>, vector<112x64xf32>, vector<14x64xf32> -> vector<14x64xf32>
    %294 = tpu.iota {dimensions = array<i32: 1>} : vector<112x1024xi32>
    %c0_88 = arith.constant 0 : index
    %c0_89 = arith.constant 0 : index
    %c0_90 = arith.constant 0 : index
    %295 = vector.load %arg2[%c0_88, %c0_89, %c0_90] : memref<1x112x1xi32, #tpu.memory_space<vmem>>, vector<1x112x1xi32>
    %296 = vector.shape_cast %295 : vector<1x112x1xi32> to vector<112x1xi32>
    %297 = vector.broadcast %296 : vector<112x1xi32> to vector<112x1024xi32>
    %298 = arith.cmpi sge, %294, %297 : vector<112x1024xi32>
    %c64_i32 = arith.constant 64 : i32
    %299 = vector.broadcast %c64_i32 : i32 to vector<112x1xi32>
    %300 = arith.addi %296, %299 : vector<112x1xi32>
    %301 = vector.broadcast %300 : vector<112x1xi32> to vector<112x1024xi32>
    %302 = arith.cmpi slt, %294, %301 : vector<112x1024xi32>
    %303 = arith.andi %298, %302 : vector<112x1024xi1>
    %304 = tpu.concatenate %291, %291, %291, %291, %291, %291, %291, %291, %291, %291, %291, %291, %291, %291, %291, %291 in 1 : vector<112x64xf32>, vector<112x64xf32>, vector<112x64xf32>, vector<112x64xf32>, vector<112x64xf32>, vector<112x64xf32>, vector<112x64xf32>, vector<112x64xf32>, vector<112x64xf32>, vector<112x64xf32>, vector<112x64xf32>, vector<112x64xf32>, vector<112x64xf32>, vector<112x64xf32>, vector<112x64xf32>, vector<112x64xf32> -> vector<112x1024xf32>
    %cst_91 = arith.constant 0.000000e+00 : f32
    %305 = vector.broadcast %cst_91 : f32 to vector<112x1024xf32>
    %306 = arith.select %303, %304, %305 : vector<112x1024xi1>, vector<112x1024xf32>
    %c0_92 = arith.constant 0 : index
    %c0_93 = arith.constant 0 : index
    %307 = vector.load %arg3[%c0_92, %c0_93] : memref<14x112xf32, #tpu.memory_space<vmem>>, vector<14x112xf32>
    %cst_94 = arith.constant dense<0.000000e+00> : vector<14x1024xf32>
    %308 = tpu.matmul %307, %306, %cst_94 {dimension_numbers = #tpu.dot_dimension_numbers<[1], [0], [0], [1], [0, 0, 1, 1], [], []>} : vector<14x112xf32>, vector<112x1024xf32>, vector<14x1024xf32> -> vector<14x1024xf32>
    %c0_95 = arith.constant 0 : index
    %c0_96 = arith.constant 0 : index
    %309 = vector.load %arg8[%c0_95, %c0_96] : memref<1024x64xf32, #tpu.memory_space<vmem>>, vector<1024x64xf32>
    %cst_97 = arith.constant dense<0.000000e+00> : vector<14x64xf32>
    %310 = tpu.matmul %308, %309, %cst_97 {dimension_numbers = #tpu.dot_dimension_numbers<[1], [0], [0], [1], [0, 0, 1, 1], [], []>} : vector<14x1024xf32>, vector<1024x64xf32>, vector<14x64xf32> -> vector<14x64xf32>
    %c0_98 = arith.constant 0 : index
    %c0_99 = arith.constant 0 : index
    %311 = vector.load %arg9[%c0_98, %c0_99] : memref<1x64xf32, #tpu.memory_space<vmem>>, vector<1x64xf32>
    %312 = vector.broadcast %311 : vector<1x64xf32> to vector<14x64xf32>
    %313 = arith.addf %310, %312 : vector<14x64xf32>
    %cst_100 = arith.constant 0.000000e+00 : f32
    %314 = vector.broadcast %cst_100 : f32 to vector<14x64xf32>
    %315 = arith.maximumf %313, %314 : vector<14x64xf32>
    %c0_101 = arith.constant 0 : index
    %c0_102 = arith.constant 0 : index
    %316 = vector.load %arg10[%c0_101, %c0_102] : memref<64x64xf32, #tpu.memory_space<vmem>>, vector<64x64xf32>
    %cst_103 = arith.constant dense<0.000000e+00> : vector<14x64xf32>
    %317 = tpu.matmul %315, %316, %cst_103 {dimension_numbers = #tpu.dot_dimension_numbers<[1], [0], [0], [1], [0, 0, 1, 1], [], []>} : vector<14x64xf32>, vector<64x64xf32>, vector<14x64xf32> -> vector<14x64xf32>
    %c0_104 = arith.constant 0 : index
    %c0_105 = arith.constant 0 : index
    %318 = vector.load %arg11[%c0_104, %c0_105] : memref<1x64xf32, #tpu.memory_space<vmem>>, vector<1x64xf32>
    %319 = vector.broadcast %318 : vector<1x64xf32> to vector<14x64xf32>
    %320 = arith.addf %317, %319 : vector<14x64xf32>
    %321 = arith.addf %293, %320 : vector<14x64xf32>
    %c0_106 = arith.constant 0 : index
    %c0_107 = arith.constant 0 : index
    %322 = vector.load %arg12[%c0_106, %c0_107] : memref<64x128xf32, #tpu.memory_space<vmem>>, vector<64x128xf32>
    %cst_108 = arith.constant dense<0.000000e+00> : vector<14x128xf32>
    %323 = tpu.matmul %321, %322, %cst_108 {dimension_numbers = #tpu.dot_dimension_numbers<[1], [0], [0], [1], [0, 0, 1, 1], [], []>} : vector<14x64xf32>, vector<64x128xf32>, vector<14x128xf32> -> vector<14x128xf32>
    %c0_109 = arith.constant 0 : index
    %c0_110 = arith.constant 0 : index
    %324 = vector.load %arg13[%c0_109, %c0_110] : memref<1x128xf32, #tpu.memory_space<vmem>>, vector<1x128xf32>
    %325 = vector.broadcast %324 : vector<1x128xf32> to vector<14x128xf32>
    %326 = arith.addf %323, %325 : vector<14x128xf32>
    %c0_111 = arith.constant 0 : index
    %c0_112 = arith.constant 0 : index
    %c0_113 = arith.constant 0 : index
    %327 = vector.load %arg14[%c0_111, %c0_112, %c0_113] : memref<1x14x128xf32, #tpu.memory_space<vmem>>, vector<1x14x128xf32>
    %328 = vector.shape_cast %327 : vector<1x14x128xf32> to vector<14x128xf32>
    %329 = vector.shape_cast %326 : vector<14x128xf32> to vector<1x14x128xf32>
    tpu.vector_store %arg14[%c0_111, %c0_112, %c0_113], %329 {strides = array<i32>} : memref<1x14x128xf32, #tpu.memory_space<vmem>>, vector<1x14x128xf32>,
    return
  }
  func.func @transform_0(%arg0: i32) -> (i32, i32, i32) {
    %c0_i32 = arith.constant 0 : i32
    %c0_i32_0 = arith.constant 0 : i32
    %c0_i32_1 = arith.constant 0 : i32
    return %arg0, %c0_i32, %c0_i32_0 : i32, i32, i32
  }
  func.func @transform_1(%arg0: i32) -> (i32, i32, i32) {
    %c0_i32 = arith.constant 0 : i32
    %c0_i32_0 = arith.constant 0 : i32
    %c0_i32_1 = arith.constant 0 : i32
    return %arg0, %c0_i32, %c0_i32_0 : i32, i32, i32
  }
  func.func @transform_2(%arg0: i32) -> (i32, i32) {
    %c0_i32 = arith.constant 0 : i32
    %c0_i32_0 = arith.constant 0 : i32
    %c0_i32_1 = arith.constant 0 : i32
    return %c0_i32, %c0_i32_0 : i32, i32
  }
  func.func @transform_3(%arg0: i32) -> (i32, i32) {
    %c0_i32 = arith.constant 0 : i32
    %c0_i32_0 = arith.constant 0 : i32
    %c0_i32_1 = arith.constant 0 : i32
    return %c0_i32, %c0_i32_0 : i32, i32
  }
  func.func @transform_4(%arg0: i32) -> (i32, i32) {
    %c0_i32 = arith.constant 0 : i32
    %c0_i32_0 = arith.constant 0 : i32
    %c0_i32_1 = arith.constant 0 : i32
    return %c0_i32, %c0_i32_0 : i32, i32
  }
  func.func @transform_5(%arg0: i32) -> (i32, i32) {
    %c0_i32 = arith.constant 0 : i32
    %c0_i32_0 = arith.constant 0 : i32
    %c0_i32_1 = arith.constant 0 : i32
    return %c0_i32, %c0_i32_0 : i32, i32
  }
  func.func @transform_6(%arg0: i32) -> (i32, i32) {
    %c0_i32 = arith.constant 0 : i32
    %c0_i32_0 = arith.constant 0 : i32
    %c0_i32_1 = arith.constant 0 : i32
    return %c0_i32, %c0_i32_0 : i32, i32
  }
  func.func @transform_7(%arg0: i32) -> (i32, i32) {
    %c0_i32 = arith.constant 0 : i32
    %c0_i32_0 = arith.constant 0 : i32
    %c0_i32_1 = arith.constant 0 : i32
    return %c0_i32, %c0_i32_0 : i32, i32
  }
  func.func @transform_8(%arg0: i32) -> (i32, i32) {
    %c0_i32 = arith.constant 0 : i32
    %c0_i32_0 = arith.constant 0 : i32
    %c0_i32_1 = arith.constant 0 : i32
    return %c0_i32, %c0_i32_0 : i32, i32
  }
  func.func @transform_9(%arg0: i32) -> (i32, i32) {
    %c0_i32 = arith.constant 0 : i32
    %c0_i32_0 = arith.constant 0 : i32
    %c0_i32_1 = arith.constant 0 : i32
    return %c0_i32, %c0_i32_0 : i32, i32
  }
  func.func @transform_10(%arg0: i32) -> (i32, i32) {
    %c0_i32 = arith.constant 0 : i32
    %c0_i32_0 = arith.constant 0 : i32
    %c0_i32_1 = arith.constant 0 : i32
    return %c0_i32, %c0_i32_0 : i32, i32
  }
  func.func @transform_11(%arg0: i32) -> (i32, i32) {
    %c0_i32 = arith.constant 0 : i32
    %c0_i32_0 = arith.constant 0 : i32
    %c0_i32_1 = arith.constant 0 : i32
    return %c0_i32, %c0_i32_0 : i32, i32
  }
  func.func @transform_12(%arg0: i32) -> (i32, i32) {
    %c0_i32 = arith.constant 0 : i32
    %c0_i32_0 = arith.constant 0 : i32
    %c0_i32_1 = arith.constant 0 : i32
    return %c0_i32, %c0_i32_0 : i32, i32
  }
  func.func @transform_13(%arg0: i32) -> (i32, i32, i32) {
    %c0_i32 = arith.constant 0 : i32
    %c0_i32_0 = arith.constant 0 : i32
    %c0_i32_1 = arith.constant 0 : i32
    return %arg0, %c0_i32, %c0_i32_0 : i32, i32, i32
  }
}

</mosaic_0001>

<bundles_post_ra>
// kernel: tpu_custom_call.1
= control target key start
LH: loop header
LB: loop body
LE: loop exit
PB: predicated region body
PF: predicated region fallthrough
CT: control target
= control target key end

     0   :  { %vm123_vm0 = vcmask 1041408   ;;  %v7133_v1 = vmov 0.0   ;;  %vm80_vm1 = vcmask 15360   ;;  %v61_v41 = vlaneseq  ;;  %s4843_s15 = smov 64   ;;  %s7108_s4 = inlined_call_operand.vmem [shape: f32[2,256], index: 4, kind: input, shape index: {}]   ;;  %s7109_s0 = inlined_call_operand.vmem [shape: f32[1,112,2], index: 0, kind: input, shape index: {}]   ;;  %s7110_s5 = inlined_call_operand.vmem [shape: f32[64,256], index: 5, kind: input, shape index: {}]   ;;  %s7111_s6 = inlined_call_operand.vmem [shape: f32[1,256], index: 6, kind: input, shape index: {}]   ;;  %s7112_s1 = inlined_call_operand.vmem [shape: s32[1,112,1], index: 1, kind: input, shape index: {}]   ;;  %s7113_s2 = inlined_call_operand.vmem [shape: f32[14,112], index: 2, kind: input, shape index: {}]   ;;  %s7114_s7 = inlined_call_operand.vmem [shape: f32[1024,64], index: 7, kind: input, shape index: {}]   ;;  %s7115_s9 = inlined_call_operand.vmem [shape: f32[64,64], index: 9, kind: input, shape index: {}]   ;;  %s7116_s11 = inlined_call_operand.vmem [shape: f32[64,128], index: 11, kind: input, shape index: {}]   ;;  %s7117_s8 = inlined_call_operand.vmem [shape: f32[1,64], index: 8, kind: input, shape index: {}]   ;;  %s7118_s3 = inlined_call_operand.vmem [shape: f32[14,112], index: 3, kind: input, shape index: {}]   ;;  %s7119_s10 = inlined_call_operand.vmem [shape: f32[1,64], index: 10, kind: input, shape index: {}]   ;;  %s7120_s12 = inlined_call_operand.vmem [shape: f32[1,128], index: 12, kind: input, shape index: {}]   ;;  %s7121_s13 = inlined_call_operand.vmem [shape: f32[1,14,128], index: 13, kind: output, shape index: {}]  }
   0x1   :  { %v3536_v0 = vld.sshfl [vmem:[%s7108_s4] sm:$0x33 pattern:$0x76325410]  ;;  %192 = vmatprep.mubr.f32.mxu0 %v7133_v1  ;;  %v306_v2 = vld [vmem:[%s7110_s5 + $0x8] sm:$0xff]  ;;  %2576 = vmatprep.mubr.f32.mxu1 %v7133_v1  ;;  %v308_v4 = vld [vmem:[%s7110_s5 + $0x18] sm:$0xff] }
   0x2   :  { %v79_v3 = vcombine.high %v3536_v0, %v3536_v0  ;;  %v305_v5 = vld [vmem:[%s7110_s5] sm:$0xff]  ;;  %v307_v6 = vld [vmem:[%s7110_s5 + $0x10] sm:$0xff]  ;;  %v4935_v8 = vpack.c.bf16 %v308_v4, %v306_v2  ;;  %v310_v10 = vld [vmem:[%s7110_s5 + $0x28] sm:$0xff]  ;;  %v62_v42 = vshrl.u32 %v61_v41, 7  ;;  %vm7122_vm2 = vcmask 523264  }
   0x3   :  { %v44_v7 = vld [vmem:[%s7109_s0] sm:$0xff]  ;;  %v4937_v9 = vpack.c.bf16 %v307_v6, %v305_v5  ;;  %v312_v11 = vld [vmem:[%s7110_s5 + $0x38] sm:$0xff]  ;;  %v311_v14 = vld [vmem:[%s7110_s5 + $0x30] sm:$0xff] }
   0x4   :  { %3537 = vmatprep.subr.msk.mxu0 %vm123_vm0, %v79_v3  ;;  %v309_v12 = vld [vmem:[%s7110_s5 + $0x20] sm:$0xff]  ;;  %v4950_v13 = vpack.c.bf16 %v312_v11, %v310_v10  ;;  %v314_v15 = vld [vmem:[%s7110_s5 + $0x48] sm:$0xff]  ;;  %v316_v18 = vld [vmem:[%s7110_s5 + $0x58] sm:$0xff]  ;;  %v67_v43 = vsub.s32 1, %v62_v42  ;;  %v63_v50 = vsub.s32 0, %v62_v42 }
   0x5   :  { %3538 = vmatpush1.msk.msra.mxu0 %vm123_vm0, %v3536_v0  ;;  %v45_v16 = vld [vmem:[%s7109_s0 + $0x8] sm:$0xff]  ;;  %v4965_v17 = vpack.c.bf16 %v311_v14, %v309_v12  ;;  %v4971_v19 = vpack.c.bf16 %v316_v18, %v314_v15  ;;  %v313_v20 = vld [vmem:[%s7110_s5 + $0x40] sm:$0xff]  ;;  %v315_v21 = vld [vmem:[%s7110_s5 + $0x50] sm:$0xff] }
   0x6   :  { %3539 = vmatmul.mubr.msk.f32.vlgmr.msra.gmra.mrb[0].mxu0 %vm80_vm1, %v44_v7  ;;  %3981 = vmatprep.subr.bf16.mxu0 %v4935_v8  ;;  %v318_v22 = vld [vmem:[%s7110_s5 + $0x68] sm:$0xff]  ;;  %v320_v23 = vld [vmem:[%s7110_s5 + $0x78] sm:$0xff]  ;;  %v46_v24 = vld [vmem:[%s7109_s0 + $0x10] sm:$0xff]  ;;  %v4991_v25 = vpack.c.bf16 %v315_v21, %v313_v20 }
   0x7   :  { %3983 = vmatpush1.bf16.msra.mxu0 %v4937_v9  ;;  %198 = vmatprep.mubr.f32.mxu0 %v7133_v1  ;;  %v4994_v26 = vpack.c.bf16 %v320_v23, %v318_v22  ;;  %v317_v27 = vld [vmem:[%s7110_s5 + $0x60] sm:$0xff]  ;;  %v319_v28 = vld [vmem:[%s7110_s5 + $0x70] sm:$0xff]  ;;  %v47_v29 = vld [vmem:[%s7109_s0 + $0x18] sm:$0xff] }
   0x8   :  { %3985 = vmatprep.subr.bf16.mxu0 %v4950_v13  ;;  %v5008_v30 = vpack.c.bf16 %v319_v28, %v317_v27  ;;  %v48_v31 = vld [vmem:[%s7109_s0 + $0x20] sm:$0xff]  ;;  %v49_v32 = vld [vmem:[%s7109_s0 + $0x28] sm:$0xff]  ;;  %v50_v33 = vld [vmem:[%s7109_s0 + $0x30] sm:$0xff] }
   0x9   :  { %v51_v34 = vld [vmem:[%s7109_s0 + $0x38] sm:$0xff]  ;;  %v52_v35 = vld [vmem:[%s7109_s0 + $0x40] sm:$0xff]  ;;  %v53_v36 = vld [vmem:[%s7109_s0 + $0x48] sm:$0xff] }
   0xa   :  { %3540 = vmatmul.mubr.msk.f32.gmra.mrb[2].mxu0 %vm80_vm1, %v45_v16  ;;  %v54_v37 = vld [vmem:[%s7109_s0 + $0x50] sm:$0xff]  ;;  %v55_v38 = vld [vmem:[%s7109_s0 + $0x58] sm:$0xff]  ;;  %v56_v39 = vld [vmem:[%s7109_s0 + $0x60] sm:$0xff] }
   0xb   :  { %204 = vmatprep.mubr.f32.mxu0 %v7133_v1  ;;  %3987 = vmatpush1.bf16.msra.mxu0 %v4965_v17  ;;  %v57_v40 = vld [vmem:[%s7109_s0 + $0x68] sm:$0xff]  ;;  %v59_v44 = vld [vmem:[%s7111_s6] sm:$0x3] }
   0xc   :  { %3989 = vmatprep.subr.bf16.mxu0 %v4971_v19  ;;  %v5079_v45 = vrot.slane %v59_v44, %v67_v43  ;;  %v5083_v51 = vrot.slane %v59_v44, %v63_v50 }
   0xe   :  { %3541 = vmatmul.mubr.msk.f32.gmra.mrb[4].mxu0 %vm80_vm1, %v46_v24 }
   0xf   :  { %210 = vmatprep.mubr.f32.mxu0 %v7133_v1  ;;  %3991 = vmatpush1.bf16.msra.mxu0 %v4991_v25 }
  0x10   :  { %3993 = vmatprep.subr.bf16.mxu0 %v4994_v26 }
  0x12   :  { %3542 = vmatmul.mubr.msk.f32.gmra.mrb[6].mxu0 %vm80_vm1, %v47_v29 }
  0x13   :  { %216 = vmatprep.mubr.f32.mxu0 %v7133_v1  ;;  %3995 = vmatpush1.bf16.msra.mxu0 %v5008_v30 }
  0x14   :  { %3997 = vmatprep.subr.bf16.mxu0 %v4935_v8 }
  0x16   :  { %3543 = vmatmul.mubr.msk.f32.gmra.mrb[8].mxu0 %vm80_vm1, %v48_v31 }
  0x17   :  { %222 = vmatprep.mubr.f32.mxu0 %v7133_v1 }
  0x1a   :  { %3544 = vmatmul.mubr.msk.f32.gmra.mrb[10].mxu0 %vm80_vm1, %v49_v32 }
  0x1b   :  { %228 = vmatprep.mubr.f32.mxu0 %v7133_v1 }
  0x1e   :  { %3545 = vmatmul.mubr.msk.f32.gmra.mrb[12].mxu0 %vm80_vm1, %v50_v33 }
  0x1f   :  { %234 = vmatprep.mubr.f32.mxu0 %v7133_v1 }
  0x22   :  { %3546 = vmatmul.mubr.msk.f32.gmra.mrb[14].mxu0 %vm80_vm1, %v51_v34 }
  0x23   :  { %240 = vmatprep.mubr.f32.mxu0 %v7133_v1 }
  0x26   :  { %3547 = vmatmul.mubr.msk.f32.gmra.mrb[16].mxu0 %vm80_vm1, %v52_v35 }
  0x27   :  { %246 = vmatprep.mubr.f32.mxu0 %v7133_v1 }
  0x2a   :  { %3548 = vmatmul.mubr.msk.f32.gmra.mrb[18].mxu0 %vm80_vm1, %v53_v36 }
  0x2b   :  { %252 = vmatprep.mubr.f32.mxu0 %v7133_v1 }
  0x2e   :  { %3549 = vmatmul.mubr.msk.f32.gmra.mrb[20].mxu0 %vm80_vm1, %v54_v37 }
  0x2f   :  { %258 = vmatprep.mubr.f32.mxu0 %v7133_v1 }
  0x32   :  { %3550 = vmatmul.mubr.msk.f32.gmra.mrb[22].mxu0 %vm80_vm1, %v55_v38 }
  0x33   :  { %264 = vmatprep.mubr.f32.mxu0 %v7133_v1 }
  0x36   :  { %3551 = vmatmul.mubr.msk.f32.gmra.mrb[24].mxu0 %vm80_vm1, %v56_v39 }
  0x37   :  { %270 = vmatprep.mubr.f32.mxu0 %v7133_v1 }
  0x3a   :  { %3552 = vmatmul.mubr.msk.f32.gmra.mrb[26].mxu0 %vm80_vm1, %v57_v40 }
  0x3b   :  { %391 = vmatprep.mubr.f32.mxu0 %v7133_v1 }
  0x3e   :  { %392 = vmatmul.mubr.f32.vlgmr.msra.gmra.mrb[0].mxu0 %v7133_v1 }
  0x3f   :  { %3999 = vmatpush1.bf16.msra.mxu0 %v4937_v9  ;;  %500 = vmatprep.mubr.f32.mxu0 %v7133_v1 }
  0x40   :  { %4001 = vmatprep.subr.bf16.mxu0 %v4950_v13 }
  0x43   :  { %4003 = vmatpush1.bf16.msra.mxu0 %v4965_v17 }
  0x44   :  { %4005 = vmatprep.subr.bf16.mxu0 %v4971_v19 }
  0x47   :  { %4007 = vmatpush1.bf16.msra.mxu0 %v4991_v25 }
  0x48   :  { %4009 = vmatprep.subr.bf16.mxu0 %v4994_v26 }
  0x4b   :  { %4011 = vmatpush1.bf16.msra.mxu0 %v5008_v30 }
  0x4c   :  { %4013 = vmatprep.subr.bf16.mxu0 %v4935_v8 }
 0x111   :  { %v393_v46 = vpop.f32.mrb[0].mxu0 }
 0x112   :  { %v395_v47 = vpop.f32.mrb[1].mxu0  ;;  %v4560_v52 = vadd.f32 %v393_v46, %v5083_v51 }
 0x113   :  { %v4561_v48 = vadd.f32 %v395_v47, %v5079_v45 }
 0x114   :  { %v3553_v53 = vmul.f32 -1.442695, %v4560_v52 }
 0x115   :  { %4660 = vtanh.f32 %v4561_v48  ;;  %v3554_v63 = vmul.f32 -1.442695, %v4561_v48 }
 0x116   :  { %4662 = vpow2.f32 %v3553_v53 }
 0x11f   :  { %v4661_v49 = vpop.eup %4660 }
 0x120   :  { %415 = vrot.lane.b32.xlu0 %v4661_v49, %s4843_s15  ;;  %v4663_v54 = vpop.eup %4662 }
 0x121   :  { %v406_v55 = vadd.f32 1.0, %v4663_v54 }
 0x123   :  { %4664 = vrcp.f32 %v406_v55 }
 0x12d   :  { %v4665_v56 = vpop.eup %4664 }
 0x12e   :  { %v413_v59 = vmul.f32 0.0, %v4665_v56 }
 0x192   :  { %v416_v57 = vpop.permute.xlu0 %415 }
 0x193   :  { %v418_v58 = vmul.f32 %v4665_v56, %v416_v57 }
 0x195   :  { %420 = vrot.lane.b32.xlu0 %v418_v58, %s4843_s15 }
 0x207   :  { %v421_v60 = vpop.permute.xlu0 %420 }
 0x208   :  { %v423_v61 = vadd.f32 %v421_v60, %v413_v59 }
 0x20a   :  { %4666 = vtanh.f32 %v423_v61 }
 0x20b   :  { %4668 = vpow2.f32 %v3554_v63 }
 0x214   :  { %v4667_v62 = vpop.eup %4666 }
 0x215   :  { %426 = vrot.lane.b32.xlu1 %v4667_v62, %s4843_s15  ;;  %v4669_v0 = vpop.eup %4668 }
 0x216   :  { %v407_v2 = vadd.f32 1.0, %v4669_v0 }
 0x218   :  { %4670 = vrcp.f32 %v407_v2 }
 0x222   :  { %v4671_v3 = vpop.eup %4670 }
 0x287   :  { %v427_v4 = vpop.permute.xlu1 %426 }
 0x288   :  { %v429_v5 = vmul.f32 %v4671_v3, %v427_v4 }
 0x28a   :  { %430 = vst.msk [vmem:[#allocation3] sm:$0xff] %vm7122_vm2, %v429_v5  ;;  %3555 = vmatmul.mubr.msk.f32.vlgmr.msra.gmra.mrb[2].mxu0 %vm7122_vm2, %v429_v5 }
 0x28b   :  { %4015 = vmatpush1.bf16.msra.mxu0 %v4937_v9  ;;  %609 = vmatprep.mubr.f32.mxu0 %v7133_v1 }
 0x28c   :  { %4017 = vmatprep.subr.bf16.mxu0 %v4950_v13 }
 0x28f   :  { %4019 = vmatpush1.bf16.msra.mxu0 %v4965_v17 }
 0x290   :  { %4021 = vmatprep.subr.bf16.mxu0 %v4971_v19 }
 0x293   :  { %4023 = vmatpush1.bf16.msra.mxu0 %v4991_v25 }
 0x294   :  { %4025 = vmatprep.subr.bf16.mxu0 %v4994_v26 }
 0x297   :  { %4027 = vmatpush1.bf16.msra.mxu0 %v5008_v30 }
 0x298   :  { %4029 = vmatprep.subr.bf16.mxu0 %v4935_v8 }
 0x35d   :  { %v502_v6 = vpop.f32.mrb[2].mxu0 }
 0x35e   :  { %v504_v7 = vpop.f32.mrb[3].mxu0  ;;  %v4562_v12 = vadd.f32 %v502_v6, %v5083_v51 }
 0x35f   :  { %v4563_v10 = vadd.f32 %v504_v7, %v5079_v45 }
 0x360   :  { %v3556_v14 = vmul.f32 -1.442695, %v4562_v12 }
 0x361   :  { %4672 = vtanh.f32 %v4563_v10  ;;  %v3557_v28 = vmul.f32 -1.442695, %v4563_v10 }
 0x362   :  { %4674 = vpow2.f32 %v3556_v14 }
 0x36b   :  { %v4673_v11 = vpop.eup %4672 }
 0x36c   :  { %524 = vrot.lane.b32.xlu1 %v4673_v11, %s4843_s15  ;;  %v4675_v15 = vpop.eup %4674 }
 0x36d   :  { %v515_v16 = vadd.f32 1.0, %v4675_v15 }
 0x36f   :  { %4676 = vrcp.f32 %v515_v16 }
 0x379   :  { %v4677_v18 = vpop.eup %4676 }
 0x37a   :  { %v522_v22 = vmul.f32 %v4677_v18, %v423_v61 }
 0x3de   :  { %v525_v20 = vpop.permute.xlu1 %524 }
 0x3df   :  { %v527_v21 = vmul.f32 %v4677_v18, %v525_v20 }
 0x3e1   :  { %529 = vrot.lane.b32.xlu0 %v527_v21, %s4843_s15 }
 0x453   :  { %v530_v23 = vpop.permute.xlu0 %529 }
 0x454   :  { %v532_v24 = vadd.f32 %v530_v23, %v522_v22 }
 0x456   :  { %4678 = vtanh.f32 %v532_v24 }
 0x457   :  { %4680 = vpow2.f32 %v3557_v28 }
 0x460   :  { %v4679_v27 = vpop.eup %4678 }
 0x461   :  { %535 = vrot.lane.b32.xlu1 %v4679_v27, %s4843_s15  ;;  %v4681_v29 = vpop.eup %4680 }
 0x462   :  { %v516_v31 = vadd.f32 1.0, %v4681_v29 }
 0x464   :  { %4682 = vrcp.f32 %v516_v31 }
 0x46e   :  { %v4683_v32 = vpop.eup %4682 }
 0x4d3   :  { %v536_v33 = vpop.permute.xlu1 %535 }
 0x4d4   :  { %v538_v34 = vmul.f32 %v4683_v32, %v536_v33 }
 0x4d6   :  { %539 = vst.msk [vmem:[#allocation3 + $0x8] sm:$0xff] %vm7122_vm2, %v538_v34  ;;  %3558 = vmatmul.mubr.msk.f32.vlgmr.msra.gmra.mrb[4].mxu0 %vm7122_vm2, %v538_v34 }
 0x4d7   :  { %4031 = vmatpush1.bf16.msra.mxu0 %v4937_v9  ;;  %718 = vmatprep.mubr.f32.mxu0 %v7133_v1 }
 0x4d8   :  { %4033 = vmatprep.subr.bf16.mxu0 %v4950_v13 }
 0x4db   :  { %4035 = vmatpush1.bf16.msra.mxu0 %v4965_v17 }
 0x4dc   :  { %4037 = vmatprep.subr.bf16.mxu0 %v4971_v19 }
 0x4df   :  { %4039 = vmatpush1.bf16.msra.mxu0 %v4991_v25 }
 0x4e0   :  { %4041 = vmatprep.subr.bf16.mxu0 %v4994_v26 }
 0x4e3   :  { %4043 = vmatpush1.bf16.msra.mxu0 %v5008_v30 }
 0x4e4   :  { %4045 = vmatprep.subr.bf16.mxu0 %v4935_v8 }
 0x5a9   :  { %v611_v35 = vpop.f32.mrb[4].mxu0 }
 0x5aa   :  { %v613_v36 = vpop.f32.mrb[5].mxu0  ;;  %v4564_v39 = vadd.f32 %v611_v35, %v5083_v51 }
 0x5ab   :  { %v4565_v37 = vadd.f32 %v613_v36, %v5079_v45 }
 0x5ac   :  { %v3559_v40 = vmul.f32 -1.442695, %v4564_v39 }
 0x5ad   :  { %4684 = vtanh.f32 %v4565_v37  ;;  %v3560_v53 = vmul.f32 -1.442695, %v4565_v37 }
 0x5ae   :  { %4686 = vpow2.f32 %v3559_v40 }
 0x5b7   :  { %v4685_v38 = vpop.eup %4684 }
 0x5b8   :  { %633 = vrot.lane.b32.xlu0 %v4685_v38, %s4843_s15  ;;  %v4687_v42 = vpop.eup %4686 }
 0x5b9   :  { %v624_v43 = vadd.f32 1.0, %v4687_v42 }
 0x5bb   :  { %4688 = vrcp.f32 %v624_v43 }
 0x5c5   :  { %v4689_v44 = vpop.eup %4688 }
 0x5c6   :  { %v631_v48 = vmul.f32 %v4689_v44, %v532_v24 }
 0x62a   :  { %v634_v46 = vpop.permute.xlu0 %633 }
 0x62b   :  { %v636_v47 = vmul.f32 %v4689_v44, %v634_v46 }
 0x62d   :  { %638 = vrot.lane.b32.xlu1 %v636_v47, %s4843_s15 }
 0x69f   :  { %v639_v49 = vpop.permute.xlu1 %638 }
 0x6a0   :  { %v641_v50 = vadd.f32 %v639_v49, %v631_v48 }
 0x6a2   :  { %4690 = vtanh.f32 %v641_v50 }
 0x6a3   :  { %4692 = vpow2.f32 %v3560_v53 }
 0x6ac   :  { %v4691_v52 = vpop.eup %4690 }
 0x6ad   :  { %644 = vrot.lane.b32.xlu0 %v4691_v52, %s4843_s15  ;;  %v4693_v54 = vpop.eup %4692 }
 0x6ae   :  { %v625_v55 = vadd.f32 1.0, %v4693_v54 }
 0x6b0   :  { %4694 = vrcp.f32 %v625_v55 }
 0x6ba   :  { %v4695_v56 = vpop.eup %4694 }
 0x71f   :  { %v645_v57 = vpop.permute.xlu0 %644 }
 0x720   :  { %v647_v58 = vmul.f32 %v4695_v56, %v645_v57 }
 0x722   :  { %648 = vst.msk [vmem:[#allocation3 + $0x10] sm:$0xff] %vm7122_vm2, %v647_v58  ;;  %3561 = vmatmul.mubr.msk.f32.vlgmr.msra.gmra.mrb[6].mxu0 %vm7122_vm2, %v647_v58 }
 0x723   :  { %4047 = vmatpush1.bf16.msra.mxu0 %v4937_v9  ;;  %827 = vmatprep.mubr.f32.mxu0 %v7133_v1 }
 0x724   :  { %4049 = vmatprep.subr.bf16.mxu0 %v4950_v13 }
 0x727   :  { %4051 = vmatpush1.bf16.msra.mxu0 %v4965_v17 }
 0x728   :  { %4053 = vmatprep.subr.bf16.mxu0 %v4971_v19 }
 0x72b   :  { %4055 = vmatpush1.bf16.msra.mxu0 %v4991_v25 }
 0x72c   :  { %4057 = vmatprep.subr.bf16.mxu0 %v4994_v26 }
 0x72f   :  { %4059 = vmatpush1.bf16.msra.mxu0 %v5008_v30 }
 0x730   :  { %4061 = vmatprep.subr.bf16.mxu0 %v4935_v8 }
 0x7f5   :  { %v720_v59 = vpop.f32.mrb[6].mxu0 }
 0x7f6   :  { %v722_v60 = vpop.f32.mrb[7].mxu0  ;;  %v4566_v63 = vadd.f32 %v720_v59, %v5083_v51 }
 0x7f7   :  { %v4567_v61 = vadd.f32 %v722_v60, %v5079_v45 }
 0x7f8   :  { %v3562_v0 = vmul.f32 -1.442695, %v4566_v63 }
 0x7f9   :  { %4696 = vtanh.f32 %v4567_v61  ;;  %v3563_v14 = vmul.f32 -1.442695, %v4567_v61 }
 0x7fa   :  { %4698 = vpow2.f32 %v3562_v0 }
 0x803   :  { %v4697_v62 = vpop.eup %4696 }
 0x804   :  { %742 = vrot.lane.b32.xlu1 %v4697_v62, %s4843_s15  ;;  %v4699_v2 = vpop.eup %4698 }
 0x805   :  { %v733_v3 = vadd.f32 1.0, %v4699_v2 }
 0x807   :  { %4700 = vrcp.f32 %v733_v3 }
 0x811   :  { %v4701_v4 = vpop.eup %4700 }
 0x812   :  { %v740_v7 = vmul.f32 %v4701_v4, %v641_v50 }
 0x876   :  { %v743_v5 = vpop.permute.xlu1 %742 }
 0x877   :  { %v745_v6 = vmul.f32 %v4701_v4, %v743_v5 }
 0x879   :  { %747 = vrot.lane.b32.xlu0 %v745_v6, %s4843_s15 }
 0x8eb   :  { %v748_v10 = vpop.permute.xlu0 %747 }
 0x8ec   :  { %v750_v11 = vadd.f32 %v748_v10, %v740_v7 }
 0x8ee   :  { %4702 = vtanh.f32 %v750_v11 }
 0x8ef   :  { %4704 = vpow2.f32 %v3563_v14 }
 0x8f8   :  { %v4703_v12 = vpop.eup %4702 }
 0x8f9   :  { %753 = vrot.lane.b32.xlu1 %v4703_v12, %s4843_s15  ;;  %v4705_v15 = vpop.eup %4704 }
 0x8fa   :  { %v734_v16 = vadd.f32 1.0, %v4705_v15 }
 0x8fc   :  { %4706 = vrcp.f32 %v734_v16 }
 0x906   :  { %v4707_v18 = vpop.eup %4706 }
 0x96b   :  { %v754_v20 = vpop.permute.xlu1 %753 }
 0x96c   :  { %v756_v21 = vmul.f32 %v4707_v18, %v754_v20 }
 0x96e   :  { %757 = vst.msk [vmem:[#allocation3 + $0x18] sm:$0xff] %vm7122_vm2, %v756_v21  ;;  %3564 = vmatmul.mubr.msk.f32.vlgmr.msra.gmra.mrb[8].mxu0 %vm7122_vm2, %v756_v21 }
 0x96f   :  { %4063 = vmatpush1.bf16.msra.mxu0 %v4937_v9  ;;  %936 = vmatprep.mubr.f32.mxu0 %v7133_v1 }
 0x970   :  { %4065 = vmatprep.subr.bf16.mxu0 %v4950_v13 }
 0x973   :  { %4067 = vmatpush1.bf16.msra.mxu0 %v4965_v17 }
 0x974   :  { %4069 = vmatprep.subr.bf16.mxu0 %v4971_v19 }
 0x977   :  { %4071 = vmatpush1.bf16.msra.mxu0 %v4991_v25 }
 0x978   :  { %4073 = vmatprep.subr.bf16.mxu0 %v4994_v26 }
 0x97b   :  { %4075 = vmatpush1.bf16.msra.mxu0 %v5008_v30 }
 0x97c   :  { %4077 = vmatprep.subr.bf16.mxu0 %v4935_v8 }
 0xa41   :  { %v829_v22 = vpop.f32.mrb[8].mxu0 }
 0xa42   :  { %v831_v23 = vpop.f32.mrb[9].mxu0  ;;  %v4568_v28 = vadd.f32 %v829_v22, %v5083_v51 }
 0xa43   :  { %v4569_v24 = vadd.f32 %v831_v23, %v5079_v45 }
 0xa44   :  { %v3565_v29 = vmul.f32 -1.442695, %v4568_v28 }
 0xa45   :  { %4708 = vtanh.f32 %v4569_v24  ;;  %v3566_v40 = vmul.f32 -1.442695, %v4569_v24 }
 0xa46   :  { %4710 = vpow2.f32 %v3565_v29 }
 0xa4f   :  { %v4709_v27 = vpop.eup %4708 }
 0xa50   :  { %851 = vrot.lane.b32.xlu0 %v4709_v27, %s4843_s15  ;;  %v4711_v31 = vpop.eup %4710 }
 0xa51   :  { %v842_v32 = vadd.f32 1.0, %v4711_v31 }
 0xa53   :  { %4712 = vrcp.f32 %v842_v32 }
 0xa5d   :  { %v4713_v33 = vpop.eup %4712 }
 0xa5e   :  { %v849_v36 = vmul.f32 %v4713_v33, %v750_v11 }
 0xac2   :  { %v852_v34 = vpop.permute.xlu0 %851 }
 0xac3   :  { %v854_v35 = vmul.f32 %v4713_v33, %v852_v34 }
 0xac5   :  { %856 = vrot.lane.b32.xlu1 %v854_v35, %s4843_s15 }
 0xb37   :  { %v857_v37 = vpop.permute.xlu1 %856 }
 0xb38   :  { %v859_v38 = vadd.f32 %v857_v37, %v849_v36 }
 0xb3a   :  { %4714 = vtanh.f32 %v859_v38 }
 0xb3b   :  { %4716 = vpow2.f32 %v3566_v40 }
 0xb44   :  { %v4715_v39 = vpop.eup %4714 }
 0xb45   :  { %862 = vrot.lane.b32.xlu0 %v4715_v39, %s4843_s15  ;;  %v4717_v42 = vpop.eup %4716 }
 0xb46   :  { %v843_v43 = vadd.f32 1.0, %v4717_v42 }
 0xb48   :  { %4718 = vrcp.f32 %v843_v43 }
 0xb52   :  { %v4719_v44 = vpop.eup %4718 }
 0xbb7   :  { %v863_v46 = vpop.permute.xlu0 %862 }
 0xbb8   :  { %v865_v47 = vmul.f32 %v4719_v44, %v863_v46 }
 0xbba   :  { %866 = vst.msk [vmem:[#allocation3 + $0x20] sm:$0xff] %vm7122_vm2, %v865_v47  ;;  %3567 = vmatmul.mubr.msk.f32.vlgmr.msra.gmra.mrb[10].mxu0 %vm7122_vm2, %v865_v47 }
 0xbbb   :  { %4079 = vmatpush1.bf16.msra.mxu0 %v4937_v9  ;;  %1045 = vmatprep.mubr.f32.mxu0 %v7133_v1 }
 0xbbc   :  { %4081 = vmatprep.subr.bf16.mxu0 %v4950_v13 }
 0xbbf   :  { %4083 = vmatpush1.bf16.msra.mxu0 %v4965_v17 }
 0xbc0   :  { %4085 = vmatprep.subr.bf16.mxu0 %v4971_v19 }
 0xbc3   :  { %4087 = vmatpush1.bf16.msra.mxu0 %v4991_v25 }
 0xbc4   :  { %4089 = vmatprep.subr.bf16.mxu0 %v4994_v26 }
 0xbc7   :  { %4091 = vmatpush1.bf16.msra.mxu0 %v5008_v30 }
 0xbc8   :  { %4093 = vmatprep.subr.bf16.mxu0 %v4935_v8 }
 0xc8d   :  { %v938_v48 = vpop.f32.mrb[10].mxu0 }
 0xc8e   :  { %v940_v49 = vpop.f32.mrb[11].mxu0  ;;  %v4570_v53 = vadd.f32 %v938_v48, %v5083_v51 }
 0xc8f   :  { %v4571_v50 = vadd.f32 %v940_v49, %v5079_v45 }
 0xc90   :  { %v3568_v54 = vmul.f32 -1.442695, %v4570_v53 }
 0xc91   :  { %4720 = vtanh.f32 %v4571_v50  ;;  %v3569_v0 = vmul.f32 -1.442695, %v4571_v50 }
 0xc92   :  { %4722 = vpow2.f32 %v3568_v54 }
 0xc9b   :  { %v4721_v52 = vpop.eup %4720 }
 0xc9c   :  { %960 = vrot.lane.b32.xlu1 %v4721_v52, %s4843_s15  ;;  %v4723_v55 = vpop.eup %4722 }
 0xc9d   :  { %v951_v56 = vadd.f32 1.0, %v4723_v55 }
 0xc9f   :  { %4724 = vrcp.f32 %v951_v56 }
 0xca9   :  { %v4725_v57 = vpop.eup %4724 }
 0xcaa   :  { %v958_v60 = vmul.f32 %v4725_v57, %v859_v38 }
 0xd0e   :  { %v961_v58 = vpop.permute.xlu1 %960 }
 0xd0f   :  { %v963_v59 = vmul.f32 %v4725_v57, %v961_v58 }
 0xd11   :  { %965 = vrot.lane.b32.xlu0 %v963_v59, %s4843_s15 }
 0xd83   :  { %v966_v61 = vpop.permute.xlu0 %965 }
 0xd84   :  { %v968_v62 = vadd.f32 %v966_v61, %v958_v60 }
 0xd86   :  { %4726 = vtanh.f32 %v968_v62 }
 0xd87   :  { %4728 = vpow2.f32 %v3569_v0 }
 0xd90   :  { %v4727_v63 = vpop.eup %4726 }
 0xd91   :  { %971 = vrot.lane.b32.xlu1 %v4727_v63, %s4843_s15  ;;  %v4729_v2 = vpop.eup %4728 }
 0xd92   :  { %v952_v3 = vadd.f32 1.0, %v4729_v2 }
 0xd94   :  { %4730 = vrcp.f32 %v952_v3 }
 0xd9e   :  { %v4731_v4 = vpop.eup %4730 }
 0xe03   :  { %v972_v5 = vpop.permute.xlu1 %971 }
 0xe04   :  { %v974_v6 = vmul.f32 %v4731_v4, %v972_v5 }
 0xe06   :  { %975 = vst.msk [vmem:[#allocation3 + $0x28] sm:$0xff] %vm7122_vm2, %v974_v6  ;;  %3570 = vmatmul.mubr.msk.f32.vlgmr.msra.gmra.mrb[12].mxu0 %vm7122_vm2, %v974_v6 }
 0xe07   :  { %4095 = vmatpush1.bf16.msra.mxu0 %v4937_v9  ;;  %1154 = vmatprep.mubr.f32.mxu0 %v7133_v1 }
 0xe08   :  { %4097 = vmatprep.subr.bf16.mxu0 %v4950_v13 }
 0xe0b   :  { %4099 = vmatpush1.bf16.msra.mxu0 %v4965_v17 }
 0xe0c   :  { %4101 = vmatprep.subr.bf16.mxu0 %v4971_v19 }
 0xe0f   :  { %4103 = vmatpush1.bf16.msra.mxu0 %v4991_v25 }
 0xe10   :  { %4105 = vmatprep.subr.bf16.mxu0 %v4994_v26 }
 0xe13   :  { %4107 = vmatpush1.bf16.msra.mxu0 %v5008_v30 }
 0xe14   :  { %4109 = vmatprep.subr.bf16.mxu0 %v4935_v8 }
 0xed9   :  { %v1047_v7 = vpop.f32.mrb[12].mxu0 }
 0xeda   :  { %v1049_v10 = vpop.f32.mrb[13].mxu0  ;;  %v4572_v14 = vadd.f32 %v1047_v7, %v5083_v51 }
 0xedb   :  { %v4573_v11 = vadd.f32 %v1049_v10, %v5079_v45 }
 0xedc   :  { %v3571_v15 = vmul.f32 -1.442695, %v4572_v14 }
 0xedd   :  { %4732 = vtanh.f32 %v4573_v11  ;;  %v3572_v29 = vmul.f32 -1.442695, %v4573_v11 }
 0xede   :  { %4734 = vpow2.f32 %v3571_v15 }
 0xee7   :  { %v4733_v12 = vpop.eup %4732 }
 0xee8   :  { %1069 = vrot.lane.b32.xlu0 %v4733_v12, %s4843_s15  ;;  %v4735_v16 = vpop.eup %4734 }
 0xee9   :  { %v1060_v18 = vadd.f32 1.0, %v4735_v16 }
 0xeeb   :  { %4736 = vrcp.f32 %v1060_v18 }
 0xef5   :  { %v4737_v20 = vpop.eup %4736 }
 0xef6   :  { %v1067_v23 = vmul.f32 %v4737_v20, %v968_v62 }
 0xf5a   :  { %v1070_v21 = vpop.permute.xlu0 %1069 }
 0xf5b   :  { %v1072_v22 = vmul.f32 %v4737_v20, %v1070_v21 }
 0xf5d   :  { %1074 = vrot.lane.b32.xlu1 %v1072_v22, %s4843_s15 }
 0xfcf   :  { %v1075_v24 = vpop.permute.xlu1 %1074 }
 0xfd0   :  { %v1077_v27 = vadd.f32 %v1075_v24, %v1067_v23 }
 0xfd2   :  { %4738 = vtanh.f32 %v1077_v27 }
 0xfd3   :  { %4740 = vpow2.f32 %v3572_v29 }
 0xfdc   :  { %v4739_v28 = vpop.eup %4738 }
 0xfdd   :  { %1080 = vrot.lane.b32.xlu0 %v4739_v28, %s4843_s15  ;;  %v4741_v31 = vpop.eup %4740 }
 0xfde   :  { %v1061_v32 = vadd.f32 1.0, %v4741_v31 }
 0xfe0   :  { %4742 = vrcp.f32 %v1061_v32 }
 0xfea   :  { %v4743_v33 = vpop.eup %4742 }
0x104f   :  { %v1081_v34 = vpop.permute.xlu0 %1080 }
0x1050   :  { %v1083_v35 = vmul.f32 %v4743_v33, %v1081_v34 }
0x1052   :  { %1084 = vst.msk [vmem:[#allocation3 + $0x30] sm:$0xff] %vm7122_vm2, %v1083_v35  ;;  %3573 = vmatmul.mubr.msk.f32.vlgmr.msra.gmra.mrb[14].mxu0 %vm7122_vm2, %v1083_v35 }
0x1053   :  { %4111 = vmatpush1.bf16.msra.mxu0 %v4937_v9  ;;  %1263 = vmatprep.mubr.f32.mxu0 %v7133_v1 }
0x1054   :  { %4113 = vmatprep.subr.bf16.mxu0 %v4950_v13 }
0x1057   :  { %4115 = vmatpush1.bf16.msra.mxu0 %v4965_v17 }
0x1058   :  { %4117 = vmatprep.subr.bf16.mxu0 %v4971_v19 }
0x105b   :  { %4119 = vmatpush1.bf16.msra.mxu0 %v4991_v25 }
0x105c   :  { %4121 = vmatprep.subr.bf16.mxu0 %v4994_v26 }
0x105f   :  { %4123 = vmatpush1.bf16.msra.mxu0 %v5008_v30 }
0x1060   :  { %4125 = vmatprep.subr.bf16.mxu0 %v4935_v8 }
0x1125   :  { %v1156_v36 = vpop.f32.mrb[14].mxu0 }
0x1126   :  { %v1158_v37 = vpop.f32.mrb[15].mxu0  ;;  %v4574_v40 = vadd.f32 %v1156_v36, %v5083_v51 }
0x1127   :  { %v4575_v38 = vadd.f32 %v1158_v37, %v5079_v45 }
0x1128   :  { %v3574_v42 = vmul.f32 -1.442695, %v4574_v40 }
0x1129   :  { %4744 = vtanh.f32 %v4575_v38  ;;  %v3575_v54 = vmul.f32 -1.442695, %v4575_v38 }
0x112a   :  { %4746 = vpow2.f32 %v3574_v42 }
0x1133   :  { %v4745_v39 = vpop.eup %4744 }
0x1134   :  { %1178 = vrot.lane.b32.xlu1 %v4745_v39, %s4843_s15  ;;  %v4747_v43 = vpop.eup %4746 }
0x1135   :  { %v1169_v44 = vadd.f32 1.0, %v4747_v43 }
0x1137   :  { %4748 = vrcp.f32 %v1169_v44 }
0x1141   :  { %v4749_v46 = vpop.eup %4748 }
0x1142   :  { %v1176_v49 = vmul.f32 %v4749_v46, %v1077_v27 }
0x11a6   :  { %v1179_v47 = vpop.permute.xlu1 %1178 }
0x11a7   :  { %v1181_v48 = vmul.f32 %v4749_v46, %v1179_v47 }
0x11a9   :  { %1183 = vrot.lane.b32.xlu0 %v1181_v48, %s4843_s15 }
0x121b   :  { %v1184_v50 = vpop.permute.xlu0 %1183 }
0x121c   :  { %v1186_v52 = vadd.f32 %v1184_v50, %v1176_v49 }
0x121e   :  { %4750 = vtanh.f32 %v1186_v52 }
0x121f   :  { %4752 = vpow2.f32 %v3575_v54 }
0x1228   :  { %v4751_v53 = vpop.eup %4750 }
0x1229   :  { %1189 = vrot.lane.b32.xlu1 %v4751_v53, %s4843_s15  ;;  %v4753_v55 = vpop.eup %4752 }
0x122a   :  { %v1170_v56 = vadd.f32 1.0, %v4753_v55 }
0x122c   :  { %4754 = vrcp.f32 %v1170_v56 }
0x1236   :  { %v4755_v57 = vpop.eup %4754 }
0x129b   :  { %v1190_v58 = vpop.permute.xlu1 %1189 }
0x129c   :  { %v1192_v59 = vmul.f32 %v4755_v57, %v1190_v58 }
0x129e   :  { %1193 = vst.msk [vmem:[#allocation3 + $0x38] sm:$0xff] %vm7122_vm2, %v1192_v59  ;;  %3576 = vmatmul.mubr.msk.f32.vlgmr.msra.gmra.mrb[16].mxu0 %vm7122_vm2, %v1192_v59 }
0x129f   :  { %4127 = vmatpush1.bf16.msra.mxu0 %v4937_v9  ;;  %1372 = vmatprep.mubr.f32.mxu0 %v7133_v1 }
0x12a0   :  { %4129 = vmatprep.subr.bf16.mxu0 %v4950_v13 }
0x12a3   :  { %4131 = vmatpush1.bf16.msra.mxu0 %v4965_v17 }
0x12a4   :  { %4133 = vmatprep.subr.bf16.mxu0 %v4971_v19 }
0x12a7   :  { %4135 = vmatpush1.bf16.msra.mxu0 %v4991_v25 }
0x12a8   :  { %4137 = vmatprep.subr.bf16.mxu0 %v4994_v26 }
0x12ab   :  { %4139 = vmatpush1.bf16.msra.mxu0 %v5008_v30 }
0x12ac   :  { %4141 = vmatprep.subr.bf16.mxu0 %v4935_v8 }
0x1371   :  { %v1265_v60 = vpop.f32.mrb[16].mxu0 }
0x1372   :  { %v1267_v61 = vpop.f32.mrb[17].mxu0  ;;  %v4576_v0 = vadd.f32 %v1265_v60, %v5083_v51 }
0x1373   :  { %v4577_v62 = vadd.f32 %v1267_v61, %v5079_v45 }
0x1374   :  { %v3577_v2 = vmul.f32 -1.442695, %v4576_v0 }
0x1375   :  { %4756 = vtanh.f32 %v4577_v62  ;;  %v3578_v15 = vmul.f32 -1.442695, %v4577_v62 }
0x1376   :  { %4758 = vpow2.f32 %v3577_v2 }
0x137f   :  { %v4757_v63 = vpop.eup %4756 }
0x1380   :  { %1287 = vrot.lane.b32.xlu0 %v4757_v63, %s4843_s15  ;;  %v4759_v3 = vpop.eup %4758 }
0x1381   :  { %v1278_v4 = vadd.f32 1.0, %v4759_v3 }
0x1383   :  { %4760 = vrcp.f32 %v1278_v4 }
0x138d   :  { %v4761_v5 = vpop.eup %4760 }
0x138e   :  { %v1285_v10 = vmul.f32 %v4761_v5, %v1186_v52 }
0x13f2   :  { %v1288_v6 = vpop.permute.xlu0 %1287 }
0x13f3   :  { %v1290_v7 = vmul.f32 %v4761_v5, %v1288_v6 }
0x13f5   :  { %1292 = vrot.lane.b32.xlu1 %v1290_v7, %s4843_s15 }
0x1467   :  { %v1293_v11 = vpop.permute.xlu1 %1292 }
0x1468   :  { %v1295_v12 = vadd.f32 %v1293_v11, %v1285_v10 }
0x146a   :  { %4762 = vtanh.f32 %v1295_v12 }
0x146b   :  { %4764 = vpow2.f32 %v3578_v15 }
0x1474   :  { %v4763_v14 = vpop.eup %4762 }
0x1475   :  { %1298 = vrot.lane.b32.xlu0 %v4763_v14, %s4843_s15  ;;  %v4765_v16 = vpop.eup %4764 }
0x1476   :  { %v1279_v18 = vadd.f32 1.0, %v4765_v16 }
0x1478   :  { %4766 = vrcp.f32 %v1279_v18 }
0x1482   :  { %v4767_v20 = vpop.eup %4766 }
0x14e7   :  { %v1299_v21 = vpop.permute.xlu0 %1298 }
0x14e8   :  { %v1301_v22 = vmul.f32 %v4767_v20, %v1299_v21 }
0x14ea   :  { %1302 = vst.msk [vmem:[#allocation3 + $0x40] sm:$0xff] %vm7122_vm2, %v1301_v22  ;;  %3579 = vmatmul.mubr.msk.f32.vlgmr.msra.gmra.mrb[18].mxu0 %vm7122_vm2, %v1301_v22 }
0x14eb   :  { %4143 = vmatpush1.bf16.msra.mxu0 %v4937_v9  ;;  %1481 = vmatprep.mubr.f32.mxu0 %v7133_v1 }
0x14ec   :  { %4145 = vmatprep.subr.bf16.mxu0 %v4950_v13 }
0x14ef   :  { %4147 = vmatpush1.bf16.msra.mxu0 %v4965_v17 }
0x14f0   :  { %4149 = vmatprep.subr.bf16.mxu0 %v4971_v19 }
0x14f3   :  { %4151 = vmatpush1.bf16.msra.mxu0 %v4991_v25 }
0x14f4   :  { %4153 = vmatprep.subr.bf16.mxu0 %v4994_v26 }
0x14f7   :  { %4155 = vmatpush1.bf16.msra.mxu0 %v5008_v30 }
0x14f8   :  { %4157 = vmatprep.subr.bf16.mxu0 %v4935_v8 }
0x15bd   :  { %v1374_v23 = vpop.f32.mrb[18].mxu0 }
0x15be   :  { %v1376_v24 = vpop.f32.mrb[19].mxu0  ;;  %v4578_v29 = vadd.f32 %v1374_v23, %v5083_v51 }
0x15bf   :  { %v4579_v27 = vadd.f32 %v1376_v24, %v5079_v45 }
0x15c0   :  { %v3580_v31 = vmul.f32 -1.442695, %v4578_v29 }
0x15c1   :  { %4768 = vtanh.f32 %v4579_v27  ;;  %v3581_v42 = vmul.f32 -1.442695, %v4579_v27 }
0x15c2   :  { %4770 = vpow2.f32 %v3580_v31 }
0x15cb   :  { %v4769_v28 = vpop.eup %4768 }
0x15cc   :  { %1396 = vrot.lane.b32.xlu1 %v4769_v28, %s4843_s15  ;;  %v4771_v32 = vpop.eup %4770 }
0x15cd   :  { %v1387_v33 = vadd.f32 1.0, %v4771_v32 }
0x15cf   :  { %4772 = vrcp.f32 %v1387_v33 }
0x15d9   :  { %v4773_v34 = vpop.eup %4772 }
0x15da   :  { %v1394_v37 = vmul.f32 %v4773_v34, %v1295_v12 }
0x163e   :  { %v1397_v35 = vpop.permute.xlu1 %1396 }
0x163f   :  { %v1399_v36 = vmul.f32 %v4773_v34, %v1397_v35 }
0x1641   :  { %1401 = vrot.lane.b32.xlu0 %v1399_v36, %s4843_s15 }
0x16b3   :  { %v1402_v38 = vpop.permute.xlu0 %1401 }
0x16b4   :  { %v1404_v39 = vadd.f32 %v1402_v38, %v1394_v37 }
0x16b6   :  { %4774 = vtanh.f32 %v1404_v39 }
0x16b7   :  { %4776 = vpow2.f32 %v3581_v42 }
0x16c0   :  { %v4775_v40 = vpop.eup %4774 }
0x16c1   :  { %1407 = vrot.lane.b32.xlu1 %v4775_v40, %s4843_s15  ;;  %v4777_v43 = vpop.eup %4776 }
0x16c2   :  { %v1388_v44 = vadd.f32 1.0, %v4777_v43 }
0x16c4   :  { %4778 = vrcp.f32 %v1388_v44 }
0x16ce   :  { %v4779_v46 = vpop.eup %4778 }
0x1733   :  { %v1408_v47 = vpop.permute.xlu1 %1407 }
0x1734   :  { %v1410_v48 = vmul.f32 %v4779_v46, %v1408_v47 }
0x1736   :  { %1411 = vst.msk [vmem:[#allocation3 + $0x48] sm:$0xff] %vm7122_vm2, %v1410_v48  ;;  %3582 = vmatmul.mubr.msk.f32.vlgmr.msra.gmra.mrb[20].mxu0 %vm7122_vm2, %v1410_v48 }
0x1737   :  { %4159 = vmatpush1.bf16.msra.mxu0 %v4937_v9  ;;  %1590 = vmatprep.mubr.f32.mxu0 %v7133_v1 }
0x1738   :  { %4161 = vmatprep.subr.bf16.mxu0 %v4950_v13 }
0x173b   :  { %4163 = vmatpush1.bf16.msra.mxu0 %v4965_v17 }
0x173c   :  { %4165 = vmatprep.subr.bf16.mxu0 %v4971_v19 }
0x173f   :  { %4167 = vmatpush1.bf16.msra.mxu0 %v4991_v25 }
0x1740   :  { %4169 = vmatprep.subr.bf16.mxu0 %v4994_v26 }
0x1743   :  { %4171 = vmatpush1.bf16.msra.mxu0 %v5008_v30 }
0x1744   :  { %4173 = vmatprep.subr.bf16.mxu0 %v4935_v8 }
0x1809   :  { %v1483_v49 = vpop.f32.mrb[20].mxu0 }
0x180a   :  { %v1485_v50 = vpop.f32.mrb[21].mxu0  ;;  %v4580_v54 = vadd.f32 %v1483_v49, %v5083_v51 }
0x180b   :  { %v4581_v52 = vadd.f32 %v1485_v50, %v5079_v45 }
0x180c   :  { %v3583_v55 = vmul.f32 -1.442695, %v4580_v54 }
0x180d   :  { %4780 = vtanh.f32 %v4581_v52  ;;  %v3584_v2 = vmul.f32 -1.442695, %v4581_v52 }
0x180e   :  { %4782 = vpow2.f32 %v3583_v55 }
0x1817   :  { %v4781_v53 = vpop.eup %4780 }
0x1818   :  { %1505 = vrot.lane.b32.xlu0 %v4781_v53, %s4843_s15  ;;  %v4783_v56 = vpop.eup %4782 }
0x1819   :  { %v1496_v57 = vadd.f32 1.0, %v4783_v56  ;;  %v4844_v56 = vmov 0  }
0x181a   :  { %4623 = vset.pattern.permute.xlu0 %v4844_v56  ;;  %4624 = vset.pattern.permute.xlu1 %v4844_v56 }
0x181b   :  { %4784 = vrcp.f32 %v1496_v57 }
0x1825   :  { %v4785_v58 = vpop.eup %4784 }
0x1826   :  { %v1503_v61 = vmul.f32 %v4785_v58, %v1404_v39 }
0x188a   :  { %v1506_v59 = vpop.permute.xlu0 %1505 }
0x188b   :  { %v1508_v60 = vmul.f32 %v4785_v58, %v1506_v59  ;;  %v1874_v58 = vld [vmem:[%s7112_s1 + $0x8] sm:$0xff] }
0x188d   :  { %1510 = vrot.lane.b32.xlu1 %v1508_v60, %s4843_s15 }
0x18ff   :  { %v1511_v62 = vpop.permute.xlu1 %1510 }
0x1900   :  { %v1513_v63 = vadd.f32 %v1511_v62, %v1503_v61 }
0x1902   :  { %4786 = vtanh.f32 %v1513_v63 }
0x1903   :  { %4788 = vpow2.f32 %v3584_v2  ;;  %v1873_v2 = vld [vmem:[%s7112_s1] sm:$0xff] }
0x190c   :  { %v4787_v0 = vpop.eup %4786 }
0x190d   :  { %1516 = vrot.lane.b32.xlu0 %v4787_v0, %s4843_s15  ;;  %v4789_v3 = vpop.eup %4788 }
0x190e   :  { %v1497_v4 = vadd.f32 1.0, %v4789_v3  ;;  %v2042_v3 = vadd.s32 64, %v1874_v58 }
0x1910   :  { %4790 = vrcp.f32 %v1497_v4 }
0x191a   :  { %v4791_v5 = vpop.eup %4790 }
0x197f   :  { %v1517_v6 = vpop.permute.xlu0 %1516 }
0x1980   :  { %v1519_v7 = vmul.f32 %v4791_v5, %v1517_v6  ;;  %v1877_v5 = vld [vmem:[%s7112_s1 + $0x20] sm:$0xff] }
0x1981   :  { %v2045_v6 = vadd.s32 64, %v1877_v5 }
0x1982   :  { %1520 = vst.msk [vmem:[#allocation3 + $0x50] sm:$0xff] %vm7122_vm2, %v1519_v7  ;;  %3585 = vmatmul.mubr.msk.f32.vlgmr.msra.gmra.mrb[22].mxu0 %vm7122_vm2, %v1519_v7  ;;  %v5303_v7 = vld [vmem:[#allocation3 + $0x18] sm:$0xff] }
0x1983   :  { %4175 = vmatpush1.bf16.msra.mxu0 %v4937_v9  ;;  %1699 = vmatprep.mubr.f32.mxu0 %v7133_v1 }
0x1984   :  { %4177 = vmatprep.subr.bf16.mxu0 %v4950_v13 }
0x1987   :  { %4179 = vmatpush1.bf16.msra.mxu0 %v4965_v17 }
0x1988   :  { %4181 = vmatprep.subr.bf16.mxu0 %v4971_v19 }
0x198b   :  { %4183 = vmatpush1.bf16.msra.mxu0 %v4991_v25 }
0x198c   :  { %4185 = vmatprep.subr.bf16.mxu0 %v4994_v26 }
0x198f   :  { %4187 = vmatpush1.bf16.msra.mxu0 %v5008_v30 }
0x1990   :  { %4189 = vmatprep.subr.bf16.mxu0 %v4935_v8 }
0x1a55   :  { %v1592_v10 = vpop.f32.mrb[22].mxu0 }
0x1a56   :  { %v1594_v11 = vpop.f32.mrb[23].mxu0  ;;  %v4582_v15 = vadd.f32 %v1592_v10, %v5083_v51  ;;  %v5305_v10 = vld [vmem:[#allocation3 + $0x10] sm:$0xff] }
0x1a57   :  { %v4583_v12 = vadd.f32 %v1594_v11, %v5079_v45  ;;  %v4630_v11 = vpack.i.bf16 %v5303_v7, %v5305_v10 }
0x1a58   :  { %v3586_v16 = vmul.f32 -1.442695, %v4582_v15  ;;  %v1881_v15 = vld [vmem:[%s7112_s1 + $0x40] sm:$0xff] }
0x1a59   :  { %4792 = vtanh.f32 %v4583_v12  ;;  %v3587_v29 = vmul.f32 -1.442695, %v4583_v12  ;;  %v1880_v12 = vld [vmem:[%s7112_s1 + $0x38] sm:$0xff] }
0x1a5a   :  { %4794 = vpow2.f32 %v3586_v16  ;;  %v2049_v16 = vadd.s32 64, %v1881_v15 }
0x1a63   :  { %v4793_v14 = vpop.eup %4792 }
0x1a64   :  { %1614 = vrot.lane.b32.xlu1 %v4793_v14, %s4843_s15  ;;  %v4795_v18 = vpop.eup %4794  ;;  %v2048_v14 = vadd.s32 64, %v1880_v12 }
0x1a65   :  { %v1605_v20 = vadd.f32 1.0, %v4795_v18  ;;  %v5316_v18 = vld [vmem:[#allocation3 + $0x38] sm:$0xff] }
0x1a67   :  { %4796 = vrcp.f32 %v1605_v20  ;;  %v5318_v20 = vld [vmem:[#allocation3 + $0x30] sm:$0xff] }
0x1a71   :  { %v4797_v21 = vpop.eup %4796 }
0x1a72   :  { %v1612_v8 = vmul.f32 %v4797_v21, %v1513_v63 }
0x1ad6   :  { %v1615_v22 = vpop.permute.xlu1 %1614 }
0x1ad7   :  { %v1617_v23 = vmul.f32 %v4797_v21, %v1615_v22  ;;  %v4640_v21 = vpack.i.bf16 %v5316_v18, %v5318_v20  ;;  %v1884_v22 = vld [vmem:[%s7112_s1 + $0x58] sm:$0xff] }
0x1ad9   :  { %1619 = vrot.lane.b32.xlu0 %v1617_v23, %s4843_s15  ;;  %v2052_v23 = vadd.s32 64, %v1884_v22 }
0x1b4b   :  { %v1620_v24 = vpop.permute.xlu0 %1619 }
0x1b4c   :  { %v1622_v27 = vadd.f32 %v1620_v24, %v1612_v8  ;;  %v1885_v8 = vld [vmem:[%s7112_s1 + $0x60] sm:$0xff] }
0x1b4d   :  { %v2053_v24 = vadd.s32 64, %v1885_v8 }
0x1b4e   :  { %4798 = vtanh.f32 %v1622_v27 }
0x1b4f   :  { %4800 = vpow2.f32 %v3587_v29 }
0x1b58   :  { %v4799_v28 = vpop.eup %4798 }
0x1b59   :  { %1625 = vrot.lane.b32.xlu1 %v4799_v28, %s4843_s15  ;;  %v4801_v31 = vpop.eup %4800  ;;  %v5331_v28 = vld [vmem:[#allocation3 + $0x50] sm:$0xff] }
0x1b5a   :  { %v1606_v32 = vadd.f32 1.0, %v4801_v31 }
0x1b5c   :  { %4802 = vrcp.f32 %v1606_v32 }
0x1b66   :  { %v4803_v33 = vpop.eup %4802 }
0x1bcb   :  { %v1626_v34 = vpop.permute.xlu1 %1625 }
0x1bcc   :  { %v1628_v35 = vmul.f32 %v4803_v33, %v1626_v34 }
0x1bce   :  { %1629 = vst.msk [vmem:[#allocation3 + $0x58] sm:$0xff] %vm7122_vm2, %v1628_v35  ;;  %3588 = vmatmul.mubr.msk.f32.vlgmr.msra.gmra.mrb[24].mxu0 %vm7122_vm2, %v1628_v35  ;;  %v2041_v35 = vadd.s32 64, %v1873_v2 }
0x1bcf   :  { %4191 = vmatpush1.bf16.msra.mxu0 %v4937_v9  ;;  %1808 = vmatprep.mubr.f32.mxu0 %v7133_v1 }
0x1bd0   :  { %4193 = vmatprep.subr.bf16.mxu0 %v4950_v13 }
0x1bd3   :  { %4195 = vmatpush1.bf16.msra.mxu0 %v4965_v17 }
0x1bd4   :  { %4197 = vmatprep.subr.bf16.mxu0 %v4971_v19 }
0x1bd7   :  { %4199 = vmatpush1.bf16.msra.mxu0 %v4991_v25 }
0x1bd8   :  { %4201 = vmatprep.subr.bf16.mxu0 %v4994_v26 }
0x1bdb   :  { %4203 = vmatpush1.bf16.msra.mxu0 %v5008_v30 }
0x1ca1   :  { %v1701_v36 = vpop.f32.mrb[24].mxu0 }
0x1ca2   :  { %v1703_v37 = vpop.f32.mrb[25].mxu0  ;;  %v4584_v13 = vadd.f32 %v1701_v36, %v5083_v51  ;;  %v1875_v36 = vld [vmem:[%s7112_s1 + $0x10] sm:$0xff] }
0x1ca3   :  { %v4585_v38 = vadd.f32 %v1703_v37, %v5079_v45  ;;  %v2043_v37 = vadd.s32 64, %v1875_v36 }
0x1ca4   :  { %v3589_v39 = vmul.f32 -1.442695, %v4584_v13 }
0x1ca5   :  { %4804 = vtanh.f32 %v4585_v38  ;;  %v3590_v46 = vmul.f32 -1.442695, %v4585_v38  ;;  %v5341_v38 = vld [vmem:[#allocation3 + $0x8] sm:$0xff] }
0x1ca6   :  { %4806 = vpow2.f32 %v3589_v39  ;;  %v1878_v39 = vld [vmem:[%s7112_s1 + $0x28] sm:$0xff] }
0x1caf   :  { %v4805_v9 = vpop.eup %4804 }
0x1cb0   :  { %1723 = vrot.lane.b32.xlu0 %v4805_v9, %s4843_s15  ;;  %v4807_v17 = vpop.eup %4806  ;;  %v5343_v9 = vld [vmem:[#allocation3] sm:$0xff] }
0x1cb1   :  { %v1714_v19 = vadd.f32 1.0, %v4807_v17  ;;  %v4625_v13 = vpack.i.bf16 %v5341_v38, %v5343_v9  ;;  %v2046_v17 = vadd.s32 64, %v1878_v39 }
0x1cb3   :  { %4808 = vrcp.f32 %v1714_v19  ;;  %v1879_v19 = vld [vmem:[%s7112_s1 + $0x30] sm:$0xff] }
0x1cbd   :  { %v4809_v25 = vpop.eup %4808 }
0x1cbe   :  { %v1721_v30 = vmul.f32 %v4809_v25, %v1622_v27  ;;  %v5329_v27 = vld [vmem:[#allocation3 + $0x58] sm:$0xff] }
0x1cbf   :  { %v4650_v29 = vpack.i.bf16 %v5329_v27, %v5331_v28 }
0x1d22   :  { %v1724_v40 = vpop.permute.xlu0 %1723 }
0x1d23   :  { %v1726_v26 = vmul.f32 %v4809_v25, %v1724_v40  ;;  %v2047_v25 = vadd.s32 64, %v1879_v19  ;;  %v5354_v40 = vld [vmem:[#allocation3 + $0x28] sm:$0xff] }
0x1d25   :  { %1728 = vrot.lane.b32.xlu1 %v1726_v26, %s4843_s15  ;;  %v5356_v26 = vld [vmem:[#allocation3 + $0x20] sm:$0xff] }
0x1d97   :  { %v1729_v42 = vpop.permute.xlu1 %1728 }
0x1d98   :  { %v5278_v43 = vadd.f32 %v1729_v42, %v1721_v30  ;;  %v4635_v30 = vpack.i.bf16 %v5354_v40, %v5356_v26  ;;  %v1882_v42 = vld [vmem:[%s7112_s1 + $0x48] sm:$0xff] }
0x1d9a   :  { %4810 = vtanh.f32 %v5278_v43 }
0x1d9b   :  { %4812 = vpow2.f32 %v3590_v46 }
0x1da4   :  { %v4811_v44 = vpop.eup %4810 }
0x1da5   :  { %1734 = vrot.lane.b32.xlu0 %v4811_v44, %s4843_s15  ;;  %v4813_v47 = vpop.eup %4812  ;;  %v1883_v44 = vld [vmem:[%s7112_s1 + $0x50] sm:$0xff] }
0x1da6   :  { %v1715_v48 = vadd.f32 1.0, %v4813_v47  ;;  %v2051_v46 = vadd.s32 64, %v1883_v44  ;;  %v5367_v47 = vld [vmem:[#allocation3 + $0x48] sm:$0xff] }
0x1da8   :  { %4814 = vrcp.f32 %v1715_v48  ;;  %v5369_v48 = vld [vmem:[#allocation3 + $0x40] sm:$0xff] }
0x1db2   :  { %v4815_v49 = vpop.eup %4814 }
0x1e17   :  { %v1735_v50 = vpop.permute.xlu0 %1734 }
0x1e18   :  { %v1737_v52 = vmul.f32 %v4815_v49, %v1735_v50  ;;  %v4645_v49 = vpack.i.bf16 %v5367_v47, %v5369_v48  ;;  %v1886_v50 = vld [vmem:[%s7112_s1 + $0x68] sm:$0xff] }
0x1e1a   :  { %1738 = vst.msk [vmem:[#allocation3 + $0x60] sm:$0xff] %vm7122_vm2, %v1737_v52  ;;  %3591 = vmatmul.mubr.msk.f32.vlgmr.msra.gmra.mrb[26].mxu0 %vm7122_vm2, %v1737_v52  ;;  %v2054_v52 = vadd.s32 64, %v1886_v50 }
0x1eed   :  { %v1810_v53 = vpop.f32.mrb[26].mxu0 }
0x1eee   :  { %v1812_v54 = vpop.f32.mrb[27].mxu0  ;;  %v4586_v59 = vadd.f32 %v1810_v53, %v5083_v51  ;;  %v1876_v51 = vld [vmem:[%s7112_s1 + $0x18] sm:$0xff] }
0x1eef   :  { %v5285_v55 = vadd.f32 %v1812_v54, %v5079_v45  ;;  %v2044_v4 = vadd.s32 64, %v1876_v51 }
0x1ef0   :  { %v3592_v60 = vmul.f32 -1.442695, %v4586_v59 }
0x1ef1   :  { %4816 = vtanh.f32 %v5285_v55  ;;  %v3593_v54 = vmul.f32 -1.442695, %v5285_v55 }
0x1ef2   :  { %4818 = vpow2.f32 %v3592_v60 }
0x1efb   :  { %v4817_v57 = vpop.eup %4816 }
0x1efc   :  { %1832 = vrot.lane.b32.xlu1 %v4817_v57, %s4843_s15  ;;  %v4819_v61 = vpop.eup %4818 }
0x1efd   :  { %v1823_v45 = vadd.f32 1.0, %v4819_v61 }
0x1eff   :  { %4820 = vrcp.f32 %v1823_v45 }
0x1f00   :  { %1891 = vperm.xlu1 %4624, %v1874_v58  }
0x1f09   :  { %v4821_v62 = vpop.eup %4820 }
0x1f0a   :  { %v1830_v31 = vmul.f32 %v4821_v62, %v5278_v43  ;;  %v2050_v43 = vadd.s32 64, %v1882_v42 }
0x1f6e   :  { %v1833_v63 = vpop.permute.xlu1 %1832 }
0x1f6f   :  { %v1835_v0 = vmul.f32 %v4821_v62, %v1833_v63 }
0x1f71   :  { %1837 = vrot.lane.b32.xlu0 %v1835_v0, %s4843_s15 }
0x1f75   :  { %1888 = vperm.xlu0 %4623, %v1873_v2  }
0x1f79   :  { %2059 = vperm.xlu0 %4623, %v2042_v3   ;;  %v5396_v3 = vand.u32 127, %v61_v41 }
0x1f7b   :  { %v5414_v41 = vadd.s32 256, %v5396_v3 }
0x1f7d   :  { %1897 = vperm.xlu0 %4623, %v1876_v51  }
0x1f7f   :  { %v5388_v45 = vpop.permute.xlu1 %1891 }
0x1f80   :  { %vm1939_vm7 = vcmp.ge.s32.totalorder %v5414_v41, %v5388_v45  ;;  %vm1937_vm9 = vcmp.ge.s32.totalorder %v5396_v3, %v5388_v45 }
0x1f81   :  { %2065 = vperm.xlu0 %4623, %v2044_v4   ;;  %v5400_v4 = vld [vmem:[#allocation3 + $0x60] sm:$0xff] }
0x1f85   :  { %1900 = vperm.xlu0 %4623, %v1877_v5  }
0x1f89   :  { %2068 = vperm.xlu0 %4623, %v2045_v6  }
0x1f8d   :  { %4631 = vrot.lane.b32.xlu0 %v4630_v11, %s4843_s15  ;;  %v5407_v11 = vadd.s32 128, %v5396_v3 }
0x1f8f   :  { %vm1938_vm3 = vcmp.ge.s32.totalorder %v5407_v11, %v5388_v45 }
0x1f91   :  { %1909 = vperm.xlu0 %4623, %v1880_v12   ;;  %v5410_v12 = vadd.s32 384, %v5396_v3 }
0x1f93   :  { %vm1940_vm5 = vcmp.ge.s32.totalorder %v5410_v12, %v5388_v45 }
0x1f95   :  { %2077 = vperm.xlu0 %4623, %v2048_v14  }
0x1f99   :  { %1912 = vperm.xlu0 %4623, %v1881_v15  }
0x1f9d   :  { %2080 = vperm.xlu0 %4623, %v2049_v16  }
0x1fa1   :  { %4641 = vrot.lane.b32.xlu0 %v4640_v21, %s4843_s15  ;;  %v7158_v21 = vmov 0 }
0x1fa5   :  { %1921 = vperm.xlu0 %4623, %v1884_v22   ;;  %v7160_v22 = vmov 0 }
0x1fa9   :  { %2089 = vperm.xlu0 %4623, %v2052_v23   ;;  %v5461_v23 = vadd.s32 640, %v5396_v3 }
0x1fad   :  { %1924 = vperm.xlu0 %4623, %v1885_v8  }
0x1fb1   :  { %2092 = vperm.xlu0 %4623, %v2053_v24   ;;  %v7162_v24 = vmov 0 }
0x1fb5   :  { %4651 = vrot.lane.b32.xlu0 %v4650_v29, %s4843_s15  ;;  %v7164_v29 = vmov 0 }
0x1fe3   :  { %v1838_v32 = vpop.permute.xlu0 %1837 }
0x1fe4   :  { %v1840_v33 = vadd.f32 %v1838_v32, %v1830_v31 }
0x1fe6   :  { %4822 = vtanh.f32 %v1840_v33  ;;  %v5484_v33 = vadd.s32 512, %v5396_v3 }
0x1fe7   :  { %4824 = vpow2.f32 %v3593_v54 }
0x1ff0   :  { %v4823_v34 = vpop.eup %4822 }
0x1ff1   :  { %1843 = vrot.lane.b32.xlu1 %v4823_v34, %s4843_s15  ;;  %v4825_v58 = vpop.eup %4824  ;;  %v7168_v34 = vmov 0 }
0x1ff2   :  { %v1824_v59 = vadd.f32 1.0, %v4825_v58 }
0x1ff4   :  { %v5377_v53 = vpop.permute.xlu0 %1888  ;;  %4826 = vrcp.f32 %v1824_v59 }
0x1ff5   :  { %2056 = vperm.xlu1 %4624, %v2041_v35   ;;  %vm1930_vm13 = vcmp.ge.s32.totalorder %v5407_v11, %v5377_v53  ;;  %vm1932_vm1 = vcmp.ge.s32.totalorder %v5410_v12, %v5377_v53 }
0x1ff8   :  { %v5380_v56 = vpop.permute.xlu0 %2059 }
0x1ff9   :  { %1894 = vperm.xlu1 %4624, %v1875_v36   ;;  %vm2106_vm4 = vcmp.lt.s32.totalorder %v5407_v11, %v5380_v56  ;;  %vm2108_vm6 = vcmp.lt.s32.totalorder %v5410_v12, %v5380_v56  ;;  %vm2107_vm8 = vcmp.lt.s32.totalorder %v5414_v41, %v5380_v56  ;;  %vm2105_vm10 = vcmp.lt.s32.totalorder %v5396_v3, %v5380_v56 }
0x1ffa   :  { %vm5444_vm15 = vmand %vm1938_vm3, %vm2106_vm4  ;;  %v7170_v36 = vmov 0 }
0x1ffb   :  { %vm5448_vm0 = vmand %vm1940_vm5, %vm2108_vm6 }
0x1ffc   :  { %v5382_v57 = vpop.permute.xlu0 %1897  ;;  %v7159_v21 = vsel %vm5448_vm0, 4294967295, %v7158_v21  ;;  %vm5456_vm3 = vmand %vm1939_vm7, %vm2107_vm8  ;;  %vm1931_vm7 = vcmp.ge.s32.totalorder %v5414_v41, %v5377_v53  ;;  %vm1941_vm0 = vcmp.ge.s32.totalorder %v5484_v33, %v5388_v45 }
0x1ffd   :  { %2062 = vperm.xlu1 %4624, %v2043_v37   ;;  %vm1954_vm11 = vcmp.ge.s32.totalorder %v5407_v11, %v5382_v57  ;;  %v7161_v22 = vsel %vm5456_vm3, 4294967295, %v7160_v22  ;;  %vm5465_vm4 = vmand %vm1937_vm9, %vm2105_vm10 }
0x1ffe   :  { %v4827_v63 = vpop.eup %4826  ;;  %v7163_v24 = vsel %vm5465_vm4, 4294967295, %v7162_v24 }
0x2000   :  { %v5384_v60 = vpop.permute.xlu0 %2065 }
0x2001   :  { %4626 = vrot.lane.b32.xlu1 %v4625_v13, %s4843_s15  ;;  %vm2122_vm12 = vcmp.lt.s32.totalorder %v5407_v11, %v5384_v60 }
0x2002   :  { %vm5469_vm5 = vmand %vm1954_vm11, %vm2122_vm12 }
0x2003   :  { %v7165_v29 = vsel %vm5469_vm5, 4294967295, %v7164_v29  ;;  %vm2109_vm5 = vcmp.lt.s32.totalorder %v5484_v33, %v5380_v56 }
0x2004   :  { %v5386_v61 = vpop.permute.xlu0 %1900 }
0x2005   :  { %1903 = vperm.xlu1 %4624, %v1878_v39  }
0x2008   :  { %v5390_v62 = vpop.permute.xlu0 %2068 }
0x2009   :  { %2071 = vperm.xlu1 %4624, %v2046_v17   ;;  %v7175_v17 = vmov 0 }
0x200c   :  { %v5393_v55 = vpop.permute.xlu0 %4631 }
0x200d   :  { %1906 = vperm.xlu1 %4624, %v1879_v19   ;;  %v4634_v37 = vunpack.i.h.bf16 %v5393_v55  ;;  %v4633_v13 = vunpack.i.l.bf16 %v5393_v55  ;;  %v7204_v55 = vmov 0 }
0x2010   :  { %v5398_v51 = vpop.permute.xlu0 %1909 }
0x2011   :  { %2074 = vperm.xlu1 %4624, %v2047_v25   ;;  %v7178_v25 = vmov 0 }
0x2014   :  { %v5416_v14 = vpop.permute.xlu0 %2077 }
0x2015   :  { %4636 = vrot.lane.b32.xlu1 %v4635_v30, %s4843_s15 }
0x2018   :  { %v5473_v31 = vpop.permute.xlu0 %1912 }
0x2019   :  { %1915 = vperm.xlu1 %4624, %v1882_v42  }
0x201c   :  { %v5535_v19 = vpop.permute.xlu0 %2080 }
0x201d   :  { %2083 = vperm.xlu1 %4624, %v2050_v43   ;;  %v7182_v43 = vmov 0 }
0x2021   :  { %1918 = vperm.xlu1 %4624, %v1883_v44  }
0x2025   :  { %2086 = vperm.xlu1 %4624, %v2051_v46  }
0x2029   :  { %4646 = vrot.lane.b32.xlu1 %v4645_v49, %s4843_s15 }
0x202d   :  { %1927 = vperm.xlu1 %4624, %v1886_v50  }
0x2031   :  { %2095 = vperm.xlu1 %4624, %v2054_v52   ;;  %v7188_v52 = vmov 0 }
0x2063   :  { %v1844_v0 = vpop.permute.xlu1 %1843 }
0x2064   :  { %v1846_v2 = vmul.f32 %v4827_v63, %v1844_v0  ;;  %v7199_v0 = vmov 0 }
0x2066   :  { %1847 = vst.msk [vmem:[#allocation3 + $0x68] sm:$0xff] %vm7122_vm2, %v1846_v2 }
0x206d   :  { %v5402_v5 = vld [vmem:[#allocation3 + $0x68] sm:$0xff] }
0x206e   :  { %v4655_v6 = vpack.i.bf16 %v5402_v5, %v5400_v4 }
0x2070   :  { %4656 = vrot.lane.b32.xlu1 %v4655_v6, %s4843_s15 }
0x2074   :  { %v5426_v15 = vpop.permute.xlu1 %2056 }
0x2075   :  { %vm2098_vm14 = vcmp.lt.s32.totalorder %v5407_v11, %v5426_v15  ;;  %vm2100_vm2 = vcmp.lt.s32.totalorder %v5410_v12, %v5426_v15  ;;  %vm2099_vm8 = vcmp.lt.s32.totalorder %v5414_v41, %v5426_v15  ;;  %vm2097_vm11 = vcmp.lt.s32.totalorder %v5396_v3, %v5426_v15 }
0x2076   :  { %vm5475_vm6 = vmand %vm1930_vm13, %vm2098_vm14  ;;  %vm1942_vm13 = vcmp.ge.s32.totalorder %v5461_v23, %v5388_v45  ;;  %vm1953_vm14 = vcmp.ge.s32.totalorder %v5396_v3, %v5382_v57 }
0x2077   :  { %vm5486_vm9 = vmand %vm1932_vm1, %vm2100_vm2  ;;  %vm2110_vm2 = vcmp.lt.s32.totalorder %v5461_v23, %v5380_v56  ;;  %vm2121_vm1 = vcmp.lt.s32.totalorder %v5396_v3, %v5384_v60 }
0x2078   :  { %v5463_v8 = vpop.permute.xlu1 %1894  ;;  %v7169_v34 = vsel %vm5486_vm9, 4294967295, %v7168_v34  ;;  %vm5508_vm10 = vmand %vm1931_vm7, %vm2099_vm8  ;;  %vm7172_vm7 = vcmp.ge.s32.totalorder %v5396_v3, %v5377_v53 }
0x2079   :  { %v7171_v36 = vsel %vm5508_vm10, 4294967295, %v7170_v36  ;;  %vm5527_vm8 = vmand %vm7172_vm7, %vm2097_vm11  ;;  %vm1946_vm10 = vcmp.ge.s32.totalorder %v5407_v11, %v5463_v8  ;;  %vm1948_vm7 = vcmp.ge.s32.totalorder %v5410_v12, %v5463_v8 }
0x207a   :  { %vm5531_vm4 = vmand %vm1942_vm13, %vm2110_vm2 }
0x207b   :  { %v7176_v17 = vsel %vm5531_vm4, 4294967295, %v7175_v17  ;;  %vm5543_vm3 = vmand %vm1953_vm14, %vm2121_vm1  ;;  %vm7185_vm14 = vnez %v7163_v24 }
0x207c   :  { %v5502_v35 = vpop.permute.xlu1 %2062  ;;  %7177 = vst [vmem:[#allocation4_spill] sm:$0xff] %v7176_v17  ;;  %v7179_v25 = vsel %vm5543_vm3, 4294967295, %v7178_v25  ;;  %vm5553_vm2 = vmand %vm1941_vm0, %vm2109_vm5 }
0x207d   :  { %vm2114_vm12 = vcmp.lt.s32.totalorder %v5407_v11, %v5502_v35  ;;  %vm2116_vm11 = vcmp.lt.s32.totalorder %v5410_v12, %v5502_v35  ;;  %v7183_v43 = vsel %vm5553_vm2, 4294967295, %v7182_v43  ;;  %vm2113_vm5 = vcmp.lt.s32.totalorder %v5396_v3, %v5502_v35 }
0x207e   :  { %vm5549_vm13 = vmand %vm1946_vm10, %vm2114_vm12  ;;  %7184 = vst [vmem:[#allocation5_spill] sm:$0xff] %v7183_v43  ;;  %vm2115_vm10 = vcmp.lt.s32.totalorder %v5414_v41, %v5502_v35  ;;  %vm7186_vm12 = vcmask 523264  }
0x207f   :  { %v2380_v49 = vsel %vm7186_vm12, %v5303_v7, %v4634_v37  ;;  %vm7187_vm0 = vmmov %vm7186_vm12  ;;  %vm7192_vm12 = vnez %v7165_v29  ;;  %v7211_v29 = vmov 0 }
0x2080   :  { %v4627_v30 = vpop.permute.xlu1 %4626  ;;  %v2379_v50 = vsel %vm7187_vm0, %v5305_v10, %v4633_v13  ;;  %vm5571_vm9 = vmand %vm1948_vm7, %vm2116_vm11  ;;  %vm1947_vm11 = vcmp.ge.s32.totalorder %v5414_v41, %v5463_v8  ;;  %vm2102_vm7 = vcmp.lt.s32.totalorder %v5461_v23, %v5426_v15  ;;  %v7215_v13 = vmov 0 }
0x2081   :  { %v4629_v44 = vunpack.i.h.bf16 %v4627_v30  ;;  %v4628_v46 = vunpack.i.l.bf16 %v4627_v30  ;;  %v7189_v52 = vsel %vm5571_vm9, 4294967295, %v7188_v52  ;;  %vm7190_vm3 = vmmov %vm7187_vm0  ;;  %vm2101_vm9 = vcmp.lt.s32.totalorder %v5484_v33, %v5426_v15 }
0x2082   :  { %vm7191_vm2 = vmmov %vm7187_vm0  ;;  %vm1933_vm0 = vcmp.ge.s32.totalorder %v5484_v33, %v5377_v53  ;;  %v5607_v63 = vpack.c.bf16 %v2380_v49, %v2379_v50  ;;  %v7252_v50 = vmov 0 }
0x2083   :  { %v2378_v54 = vsel %vm7190_vm3, %v5341_v38, %v4629_v44  ;;  %v2377_v58 = vsel %vm7191_vm2, %v5343_v9, %v4628_v46  ;;  %vm1945_vm3 = vcmp.ge.s32.totalorder %v5396_v3, %v5463_v8  ;;  %vm5595_vm1 = vmand %vm1947_vm11, %vm2115_vm10  ;;  %v4642_v9 = vpop.permute.xlu0 %4641  ;;  %v7285_v44 = vmov 0 }
0x2084   :  { %v5589_v7 = vpack.c.bf16 %v2378_v54, %v2377_v58  ;;  %v5591_v10 = vpop.permute.xlu1 %1903  ;;  %vm5599_vm2 = vmand %vm1945_vm3, %vm2113_vm5  ;;  %vm7198_vm5 = vcmp.ge.s32.totalorder %v5461_v23, %v5377_v53  ;;  %v4644_v30 = vunpack.i.h.bf16 %v4642_v9  ;;  %v4643_v42 = vunpack.i.l.bf16 %v4642_v9 }
0x2085   :  { %vm7197_vm10 = vmpackc.low %vm5444_vm15, %vm5475_vm6 }
0x2086   :  { %4206 = vmatprep.subr.msk.bf16.mxu1 %vm7197_vm10, %v5589_v7  ;;  %vm5618_vm11 = vmand %vm7198_vm5, %vm2102_vm7  ;;  %vm7208_vm10 = vnez %v7179_v25  ;;  %v7283_v25 = vmov 0 }
0x2087   :  { %v7200_v0 = vsel %vm5618_vm11, 4294967295, %v7199_v0  ;;  %vm7202_vm3 = vmpackc.low %vm7185_vm14, %vm5527_vm8  ;;  %v5656_v6 = vpop.permute.xlu0 %1921  ;;  %vm2129_vm14 = vcmp.lt.s32.totalorder %v5396_v3, %v5390_v62  ;;  %vm1971_vm8 = vcmp.ge.s32.totalorder %v5414_v41, %v5591_v10 }
0x2088   :  { %7201 = vst [vmem:[#allocation6_spill] sm:$0xff] %v7200_v0  ;;  %4209 = vmatpush1.bf16.msk.msra.mxu1 %vm7202_vm3, %v5589_v7  ;;  %v5632_v2 = vpop.permute.xlu1 %2071  ;;  %vm7203_vm6 = vmpackc.low %vm7192_vm12, %vm5549_vm13  ;;  %vm1962_vm3 = vcmp.ge.s32.totalorder %v5407_v11, %v5386_v61  ;;  %vm2130_vm13 = vcmp.lt.s32.totalorder %v5407_v11, %v5390_v62 }
0x2089   :  { %4212 = vmatprep.subr.msk.bf16.mxu1 %vm7203_vm6, %v5607_v63  ;;  %vm5640_vm7 = vmand %vm1933_vm0, %vm2101_vm9  ;;  %vm2140_vm9 = vcmp.lt.s32.totalorder %v5410_v12, %v5632_v2  ;;  %vm2138_vm12 = vcmp.lt.s32.totalorder %v5407_v11, %v5632_v2  ;;  %vm2139_vm6 = vcmp.lt.s32.totalorder %v5414_v41, %v5632_v2 }
0x208a   :  { %v7205_v55 = vsel %vm5640_vm7, 4294967295, %v7204_v55  ;;  %vm4214_vm5 = vmpackc.low %vm7208_vm10, %vm5599_vm2  ;;  %vm1972_vm2 = vcmp.ge.s32.totalorder %v5410_v12, %v5591_v10  ;;  %vm1970_vm10 = vcmp.ge.s32.totalorder %v5407_v11, %v5591_v10  ;;  %vm2154_vm7 = vcmp.lt.s32.totalorder %v5407_v11, %v5416_v14 }
0x208b   :  { %7206 = vst [vmem:[#allocation7_spill] sm:$0xff] %v7205_v55  ;;  %vm5665_vm0 = vmand %vm1962_vm3, %vm2130_vm13  ;;  %vm1986_vm13 = vcmp.ge.s32.totalorder %v5407_v11, %v5398_v51  ;;  %v5703_v39 = vpop.permute.xlu0 %2089  ;;  %v7229_v55 = vmov 0 }
0x208c   :  { %4215 = vmatpush1.bf16.msk.msra.mxu1 %vm4214_vm5, %v5607_v63  ;;  %v5661_v16 = vpop.permute.xlu1 %1906  ;;  %vm1961_vm5 = vcmp.ge.s32.totalorder %v5396_v3, %v5386_v61  ;;  %vm5679_vm15 = vmand %vm1972_vm2, %vm2140_vm9  ;;  %vm1985_vm9 = vcmp.ge.s32.totalorder %v5396_v3, %v5398_v51 }
0x208d   :  { %v7212_v29 = vsel %vm5679_vm15, 4294967295, %v7211_v29  ;;  %vm5683_vm3 = vmand %vm1970_vm10, %vm2138_vm12  ;;  %vm2153_vm12 = vcmp.lt.s32.totalorder %v5396_v3, %v5416_v14  ;;  %vm2137_vm10 = vcmp.lt.s32.totalorder %v5396_v3, %v5632_v2 }
0x208e   :  { %vm5699_vm2 = vmand %vm1971_vm8, %vm2139_vm6 }
0x208f   :  { %v7216_v13 = vsel %vm5699_vm2, 4294967295, %v7215_v13  ;;  %vm5707_vm11 = vmand %vm1961_vm5, %vm2129_vm14  ;;  %vm1969_vm14 = vcmp.ge.s32.totalorder %v5396_v3, %v5591_v10 }
0x2090   :  { %v5693_v37 = vpop.permute.xlu1 %2074  ;;  %vm5713_vm15 = vmand %vm1986_vm13, %vm2154_vm7  ;;  %vm1978_vm13 = vcmp.ge.s32.totalorder %v5407_v11, %v5661_v16 }
0x2091   :  { %vm2146_vm4 = vcmp.lt.s32.totalorder %v5407_v11, %v5693_v37  ;;  %vm5723_vm6 = vmand %vm1985_vm9, %vm2153_vm12  ;;  %vm2148_vm5 = vcmp.lt.s32.totalorder %v5410_v12, %v5693_v37  ;;  %vm1980_vm9 = vcmp.ge.s32.totalorder %v5410_v12, %v5661_v16  ;;  %vm2147_vm12 = vcmp.lt.s32.totalorder %v5414_v41, %v5693_v37 }
0x2092   :  { %vm5729_vm7 = vmand %vm1969_vm14, %vm2137_vm10  ;;  %vm7227_vm10 = vcmask 523264  }
0x2093   :  { %vm5735_vm8 = vmand %vm1978_vm13, %vm2146_vm4  ;;  %v2384_v59 = vsel %vm7227_vm10, %v5316_v18, %v4644_v30  ;;  %v7247_v30 = vmov 0 }
0x2094   :  { %v4637_v49 = vpop.permute.xlu1 %4636  ;;  %vm7228_vm14 = vmmov %vm7227_vm10 }
0x2095   :  { %v4639_v54 = vunpack.i.h.bf16 %v4637_v49  ;;  %v4638_v58 = vunpack.i.l.bf16 %v4637_v49  ;;  %v2383_v1 = vsel %vm7228_vm14, %v5318_v20, %v4643_v42  ;;  %vm5747_vm2 = vmand %vm1980_vm9, %vm2148_vm5  ;;  %v5751_v49 = vpop.permute.xlu0 %1924  ;;  %vm1979_vm14 = vcmp.ge.s32.totalorder %v5414_v41, %v5661_v16 }
0x2096   :  { %v7230_v55 = vsel %vm5747_vm2, 4294967295, %v7229_v55  ;;  %vm7232_vm4 = vmmov %vm7227_vm10  ;;  %vm2118_vm5 = vcmp.lt.s32.totalorder %v5461_v23, %v5502_v35  ;;  %vm2145_vm9 = vcmp.lt.s32.totalorder %v5396_v3, %v5693_v37 }
0x2097   :  { %7231 = vst [vmem:[#allocation8_spill] sm:$0xff] %v7230_v55  ;;  %v2382_v43 = vsel %vm7232_vm4, %v5354_v40, %v4639_v54  ;;  %vm7233_vm13 = vmmov %vm7232_vm4  ;;  %v7234_v40 = vmov 0  ;;  %v7287_v54 = vmov 0 }
0x2098   :  { %v2381_v0 = vsel %vm7233_vm13, %v5356_v26, %v4638_v58  ;;  %vm4220_vm10 = vmpackc.low %vm5729_vm7, %vm5707_vm11  ;;  %v5767_v20 = vpop.permute.xlu1 %1915  ;;  %vm1950_vm7 = vcmp.ge.s32.totalorder %v5461_v23, %v5463_v8  ;;  %vm2117_vm13 = vcmp.lt.s32.totalorder %v5484_v33, %v5502_v35  ;;  %v5783_v26 = vpack.c.bf16 %v2384_v59, %v2383_v1 }
0x2099   :  { %v5765_v18 = vpack.c.bf16 %v2382_v43, %v2381_v0  ;;  %vm5771_vm4 = vmand %vm1979_vm14, %vm2147_vm12  ;;  %vm1977_vm14 = vcmp.ge.s32.totalorder %v5396_v3, %v5661_v16  ;;  %v7239_v43 = vmov 0  ;;  %v7242_v0 = vmov 0  ;;  %v5807_v24 = vpop.permute.xlu0 %2092 }
0x209a   :  { %v7235_v40 = vsel %vm5771_vm4, 4294967295, %v7234_v40  ;;  %vm4223_vm11 = vmpackc.low %vm5713_vm15, %vm5735_vm8  ;;  %7237 = vst [vmem:[#allocation10_spill] sm:$0xff] %v5783_v26  ;;  %vm1949_vm8 = vcmp.ge.s32.totalorder %v5484_v33, %v5463_v8 }
0x209b   :  { %7236 = vst [vmem:[#allocation9_spill] sm:$0xff] %v7235_v40  ;;  %vm7238_vm12 = vmpackc.low %vm5683_vm3, %vm5665_vm0  ;;  %vm1994_vm3 = vcmp.ge.s32.totalorder %v5407_v11, %v5473_v31 }
0x209c   :  { %4218 = vmatprep.subr.msk.bf16.mxu1 %vm7238_vm12, %v5765_v18  ;;  %vm5793_vm4 = vmand %vm1950_vm7, %vm2118_vm5  ;;  %v5800_v1 = vpop.permute.xlu1 %2083  ;;  %vm1993_vm12 = vcmp.ge.s32.totalorder %v5396_v3, %v5473_v31 }
0x209d   :  { %v7240_v43 = vsel %vm5793_vm4, 4294967295, %v7239_v43  ;;  %4221 = vmatpush1.bf16.msk.msra.mxu1 %vm4220_vm10, %v5765_v18  ;;  %vm2257_vm15 = vmand %vm1977_vm14, %vm2145_vm9  ;;  %vm2162_vm10 = vcmp.lt.s32.totalorder %v5407_v11, %v5535_v19  ;;  %vm2172_vm5 = vcmp.lt.s32.totalorder %v5410_v12, %v5800_v1  ;;  %vm2170_vm9 = vcmp.lt.s32.totalorder %v5407_v11, %v5800_v1  ;;  %v4652_v42 = vpop.permute.xlu0 %4651 }
0x209e   :  { %7241 = vst [vmem:[#allocation11_spill] sm:$0xff] %v7240_v43  ;;  %4224 = vmatprep.subr.msk.bf16.mxu1 %vm4223_vm11, %v5783_v26  ;;  %vm5803_vm2 = vmand %vm1949_vm8, %vm2117_vm13  ;;  %vm2171_vm7 = vcmp.lt.s32.totalorder %v5414_v41, %v5800_v1  ;;  %vm2002_vm13 = vcmp.ge.s32.totalorder %v5407_v11, %v5767_v20  ;;  %vm2161_vm14 = vcmp.lt.s32.totalorder %v5396_v3, %v5535_v19  ;;  %v4654_v58 = vunpack.i.h.bf16 %v4652_v42  ;;  %v7360_v38 = vld [vmem:[#allocation8_spill] sm:$0xff] }
0x209f   :  { %v7243_v0 = vsel %vm5803_vm2, 4294967295, %v7242_v0  ;;  %vm4226_vm0 = vmpackc.low %vm5723_vm6, %vm2257_vm15  ;;  %vm2004_vm6 = vcmp.ge.s32.totalorder %v5410_v12, %v5767_v20  ;;  %v4653_v9 = vunpack.i.l.bf16 %v4652_v42 }
0x20a0   :  { %7244 = vst [vmem:[#allocation12_spill] sm:$0xff] %v7243_v0  ;;  %v5818_v32 = vpop.permute.xlu1 %1918  ;;  %vm5822_vm11 = vmand %vm1994_vm3, %vm2162_vm10  ;;  %vm2186_vm3 = vcmp.lt.s32.totalorder %v5407_v11, %v5703_v39  ;;  %vm2003_vm10 = vcmp.ge.s32.totalorder %v5414_v41, %v5767_v20 }
0x20a1   :  { %4227 = vmatpush1.bf16.msk.msra.mxu1 %vm4226_vm0, %v5783_v26  ;;  %vm5836_vm15 = vmand %vm2004_vm6, %vm2172_vm5  ;;  %vm2018_vm0 = vcmp.ge.s32.totalorder %v5407_v11, %v5656_v6  ;;  %v7265_v26 = vmov 0 }
0x20a2   :  { %v7248_v30 = vsel %vm5836_vm15, 4294967295, %v7247_v30  ;;  %vm5840_vm8 = vmand %vm2002_vm13, %vm2170_vm9  ;;  %vm2169_vm9 = vcmp.lt.s32.totalorder %v5396_v3, %v5800_v1  ;;  %vm2141_vm15 = vcmp.lt.s32.totalorder %v5484_v33, %v5632_v2 }
0x20a3   :  { %7249 = vst [vmem:[#allocation13_spill] sm:$0xff] %v7248_v30  ;;  %vm5852_vm5 = vmand %vm2003_vm10, %vm2171_vm7  ;;  %vm2012_vm7 = vcmp.ge.s32.totalorder %v5410_v12, %v5818_v32 }
0x20a4   :  { %v5850_v46 = vpop.permute.xlu1 %2086  ;;  %v7253_v50 = vsel %vm5852_vm5, 4294967295, %v7252_v50  ;;  %vm5858_vm6 = vmand %vm1993_vm12, %vm2161_vm14  ;;  %vm2001_vm12 = vcmp.ge.s32.totalorder %v5396_v3, %v5767_v20 }
0x20a5   :  { %7254 = vst [vmem:[#allocation14_spill] sm:$0xff] %v7253_v50  ;;  %vm2178_vm13 = vcmp.lt.s32.totalorder %v5407_v11, %v5850_v46  ;;  %vm5864_vm2 = vmand %vm2018_vm0, %vm2186_vm3  ;;  %vm2180_vm14 = vcmp.lt.s32.totalorder %v5410_v12, %v5850_v46  ;;  %vm2010_vm0 = vcmp.ge.s32.totalorder %v5407_v11, %v5818_v32  ;;  %vm2179_vm4 = vcmp.lt.s32.totalorder %v5414_v41, %v5850_v46 }
0x20a6   :  { %vm5876_vm10 = vmand %vm2001_vm12, %vm2169_vm9  ;;  %vm7263_vm9 = vcmask 523264   ;;  %v6004_v50 = vadd.s32 768, %v5396_v3 }
0x20a7   :  { %vm5882_vm3 = vmand %vm2010_vm0, %vm2178_vm13  ;;  %v2388_v30 = vsel %vm7263_vm9, %v5329_v27, %v4654_v58  ;;  %v7289_v58 = vmov 0 }
0x20a8   :  { %v4647_v0 = vpop.permute.xlu1 %4646  ;;  %vm7264_vm12 = vmmov %vm7263_vm9 }
0x20a9   :  { %v4649_v43 = vunpack.i.h.bf16 %v4647_v0  ;;  %v4648_v17 = vunpack.i.l.bf16 %v4647_v0  ;;  %v2387_v40 = vsel %vm7264_vm12, %v5331_v28, %v4653_v9  ;;  %vm5894_vm5 = vmand %vm2012_vm7, %vm2180_vm14  ;;  %vm2142_vm7 = vcmp.lt.s32.totalorder %v5461_v23, %v5632_v2 }
0x20aa   :  { %v7266_v26 = vsel %vm5894_vm5, 4294967295, %v7265_v26  ;;  %vm7267_vm13 = vmmov %vm7263_vm9  ;;  %vm2177_vm14 = vcmp.lt.s32.totalorder %v5396_v3, %v5850_v46  ;;  %v7269_v28 = vmov 0  ;;  %v7299_v9 = vmov 0 }
0x20ab   :  { %v2386_v0 = vsel %vm7267_vm13, %v5367_v47, %v4649_v43  ;;  %vm7268_vm0 = vmmov %vm7263_vm9  ;;  %vm2011_vm9 = vcmp.ge.s32.totalorder %v5414_v41, %v5818_v32  ;;  %v5926_v47 = vpack.c.bf16 %v2388_v30, %v2387_v40  ;;  %v7279_v40 = vmov 0 }
0x20ac   :  { %v2385_v55 = vsel %vm7268_vm0, %v5369_v48, %v4648_v17  ;;  %vm5914_vm12 = vmand %vm2011_vm9, %vm2179_vm4  ;;  %vm1974_vm0 = vcmp.ge.s32.totalorder %v5461_v23, %v5591_v10  ;;  %vm2009_vm9 = vcmp.ge.s32.totalorder %v5396_v3, %v5818_v32  ;;  %v7272_v48 = vmov 0  ;;  %v6094_v59 = vpop.permute.xlu1 %1927 }
0x20ad   :  { %v5910_v27 = vpack.c.bf16 %v2386_v0, %v2385_v55  ;;  %v7270_v28 = vsel %vm5914_vm12, 4294967295, %v7269_v28  ;;  %vm4235_vm13 = vmpackc.low %vm5864_vm2, %vm5882_vm3  ;;  %vm2017_vm2 = vcmp.ge.s32.totalorder %v5396_v3, %v5656_v6  ;;  %vm2185_vm3 = vcmp.lt.s32.totalorder %v5396_v3, %v5703_v39 }
0x20ae   :  { %vm7271_vm4 = vmpackc.low %vm5840_vm8, %vm5822_vm11  ;;  %v7275_v17 = vmov 0  ;;  %v7277_v55 = vmov 0  ;;  %v7281_v43 = vmov 0  ;;  %v5997_v30 = vadd.s32 896, %v5396_v3 }
0x20af   :  { %4230 = vmatprep.subr.msk.bf16.mxu1 %vm7271_vm4, %v5910_v27  ;;  %vm5940_vm12 = vmand %vm1974_vm0, %vm2142_vm7  ;;  %vm1973_vm4 = vcmp.ge.s32.totalorder %v5484_v33, %v5591_v10 }
0x20b0   :  { %v7273_v48 = vsel %vm5940_vm12, 4294967295, %v7272_v48  ;;  %vm7274_vm11 = vmpackc.low %vm5876_vm10, %vm5858_vm6  ;;  %vm2150_vm12 = vcmp.lt.s32.totalorder %v5461_v23, %v5693_v37  ;;  %vm1982_vm6 = vcmp.ge.s32.totalorder %v5461_v23, %v5661_v16  ;;  %vm2149_vm10 = vcmp.lt.s32.totalorder %v5484_v33, %v5693_v37  ;;  %v6120_v42 = vpop.permute.xlu1 %2095 }
0x20b1   :  { %4233 = vmatpush1.bf16.msk.msra.mxu1 %vm7274_vm11, %v5910_v27  ;;  %vm2289_vm8 = vmand %vm2009_vm9, %vm2177_vm14  ;;  %vm2005_vm11 = vcmp.ge.s32.totalorder %v5484_v33, %v5767_v20 }
0x20b2   :  { %4236 = vmatprep.subr.msk.bf16.mxu1 %vm4235_vm13, %v5926_v47  ;;  %vm5953_vm5 = vmand %vm1973_vm4, %vm2141_vm15  ;;  %vm1981_vm15 = vcmp.ge.s32.totalorder %v5484_v33, %v5661_v16  ;;  %vm2174_vm13 = vcmp.lt.s32.totalorder %v5461_v23, %v5800_v1 }
0x20b3   :  { %v7276_v17 = vsel %vm5953_vm5, 4294967295, %v7275_v17  ;;  %vm2297_vm7 = vmand %vm2017_vm2, %vm2185_vm3  ;;  %vm2006_vm2 = vcmp.ge.s32.totalorder %v5461_v23, %v5767_v20  ;;  %vm2173_vm3 = vcmp.lt.s32.totalorder %v5484_v33, %v5800_v1 }
0x20b4   :  { %vm4238_vm0 = vmpackc.low %vm2297_vm7, %vm2289_vm8  ;;  %vm2182_vm8 = vcmp.lt.s32.totalorder %v5461_v23, %v5850_v46  ;;  %vm2014_vm7 = vcmp.ge.s32.totalorder %v5461_v23, %v5818_v32 }
0x20b5   :  { %4239 = vmatpush1.bf16.msk.msra.mxu1 %vm4238_vm0, %v5926_v47  ;;  %vm5964_vm14 = vmand %vm1982_vm6, %vm2150_vm12  ;;  %vm2181_vm0 = vcmp.lt.s32.totalorder %v5484_v33, %v5850_v46 }
0x20b6   :  { %v7278_v55 = vsel %vm5964_vm14, 4294967295, %v7277_v55  ;;  %vm5972_vm9 = vmand %vm1981_vm15, %vm2149_vm10  ;;  %vm2013_vm10 = vcmp.ge.s32.totalorder %v5484_v33, %v5818_v32  ;;  %vm7341_vm14 = vcmask 916480  }
0x20b7   :  { %v7280_v40 = vsel %vm5972_vm9, 4294967295, %v7279_v40  ;;  %vm5980_vm12 = vmand %vm2006_vm2, %vm2174_vm13  ;;  %vm1944_vm13 = vcmp.ge.s32.totalorder %v5997_v30, %v5388_v45  ;;  %vm2112_vm2 = vcmp.lt.s32.totalorder %v5997_v30, %v5380_v56  ;;  %vm2131_vm9 = vcmp.lt.s32.totalorder %v5414_v41, %v5390_v62 }
0x20b8   :  { %v7282_v43 = vsel %vm5980_vm12, 4294967295, %v7281_v43  ;;  %vm5988_vm4 = vmand %vm2005_vm11, %vm2173_vm3  ;;  %vm1943_vm3 = vcmp.ge.s32.totalorder %v6004_v50, %v5388_v45  ;;  %vm2111_vm11 = vcmp.lt.s32.totalorder %v6004_v50, %v5380_v56  ;;  %v7291_v45 = vmov 0 }
0x20b9   :  { %v7284_v25 = vsel %vm5988_vm4, 4294967295, %v7283_v25  ;;  %vm5999_vm6 = vmand %vm2014_vm7, %vm2182_vm8  ;;  %vm1936_vm8 = vcmp.ge.s32.totalorder %v5997_v30, %v5377_v53  ;;  %vm2104_vm7 = vcmp.lt.s32.totalorder %v5997_v30, %v5426_v15  ;;  %v7293_v56 = vmov 0 }
0x20ba   :  { %v7286_v44 = vsel %vm5999_vm6, 4294967295, %v7285_v44  ;;  %vm6008_vm15 = vmand %vm2013_vm10, %vm2181_vm0  ;;  %vm1935_vm10 = vcmp.ge.s32.totalorder %v6004_v50, %v5377_v53  ;;  %v7295_v53 = vmov 0 }
0x20bb   :  { %v7288_v54 = vsel %vm6008_vm15, 4294967295, %v7287_v54  ;;  %vm6024_vm0 = vmand %vm1944_vm13, %vm2112_vm2  ;;  %vm2103_vm15 = vcmp.lt.s32.totalorder %v6004_v50, %v5426_v15  ;;  %vm2120_vm2 = vcmp.lt.s32.totalorder %v5997_v30, %v5502_v35  ;;  %v7297_v15 = vmov 0 }
0x20bc   :  { %v7290_v58 = vsel %vm6024_vm0, 4294967295, %v7289_v58  ;;  %vm6032_vm6 = vmand %vm1943_vm3, %vm2111_vm11  ;;  %vm1952_vm11 = vcmp.ge.s32.totalorder %v5997_v30, %v5463_v8  ;;  %vm1976_vm3 = vcmp.ge.s32.totalorder %v5997_v30, %v5591_v10 }
0x20bd   :  { %v7292_v45 = vsel %vm6032_vm6, 4294967295, %v7291_v45  ;;  %vm6036_vm4 = vmand %vm1936_vm8, %vm2104_vm7  ;;  %vm2119_vm8 = vcmp.lt.s32.totalorder %v6004_v50, %v5502_v35  ;;  %v7301_v35 = vmov 0 }
0x20be   :  { %v7294_v56 = vsel %vm6036_vm4, 4294967295, %v7293_v56  ;;  %vm6046_vm12 = vmand %vm1935_vm10, %vm2103_vm15  ;;  %vm1951_vm15 = vcmp.ge.s32.totalorder %v6004_v50, %v5463_v8  ;;  %vm2144_vm10 = vcmp.lt.s32.totalorder %v5997_v30, %v5632_v2  ;;  %v7303_v8 = vmov 0 }
0x20bf   :  { %v7296_v53 = vsel %vm6046_vm12, 4294967295, %v7295_v53  ;;  %vm6058_vm7 = vmand %vm1952_vm11, %vm2120_vm2  ;;  %vm2143_vm12 = vcmp.lt.s32.totalorder %v6004_v50, %v5632_v2  ;;  %vm1975_vm11 = vcmp.ge.s32.totalorder %v6004_v50, %v5591_v10  ;;  %v7305_v2 = vmov 0 }
0x20c0   :  { %v7298_v15 = vsel %vm6058_vm7, 4294967295, %v7297_v15  ;;  %vm6066_vm13 = vmand %vm1951_vm15, %vm2119_vm8  ;;  %vm2152_vm7 = vcmp.lt.s32.totalorder %v5997_v30, %v5693_v37  ;;  %vm1984_vm15 = vcmp.ge.s32.totalorder %v5997_v30, %v5661_v16  ;;  %v7307_v10 = vmov 0 }
0x20c1   :  { %v7300_v9 = vsel %vm6066_vm13, 4294967295, %v7299_v9  ;;  %vm6074_vm2 = vmand %vm1976_vm3, %vm2144_vm10  ;;  %vm2151_vm13 = vcmp.lt.s32.totalorder %v6004_v50, %v5693_v37  ;;  %vm1983_vm10 = vcmp.ge.s32.totalorder %v6004_v50, %v5661_v16  ;;  %v7310_v37 = vmov 0 }
0x20c2   :  { %v7302_v35 = vsel %vm6074_vm2, 4294967295, %v7301_v35  ;;  %vm6082_vm8 = vmand %vm1975_vm11, %vm2143_vm12  ;;  %vm2176_vm12 = vcmp.lt.s32.totalorder %v5997_v30, %v5800_v1  ;;  %vm2184_vm2 = vcmp.lt.s32.totalorder %v5997_v30, %v5850_v46  ;;  %v7313_v16 = vmov 0 }
0x20c3   :  { %v7304_v8 = vsel %vm6082_vm8, 4294967295, %v7303_v8  ;;  %vm6090_vm3 = vmand %vm1984_vm15, %vm2152_vm7  ;;  %vm2008_vm8 = vcmp.ge.s32.totalorder %v5997_v30, %v5767_v20  ;;  %vm2175_vm7 = vcmp.lt.s32.totalorder %v6004_v50, %v5800_v1  ;;  %vm2034_vm4 = vcmp.ge.s32.totalorder %v5407_v11, %v6094_v59  ;;  %v2870_v1 = vld [vmem:[%s7114_s7 + $0x190] sm:$0xff] }
0x20c4   :  { %v7306_v2 = vsel %vm6090_vm3, 4294967295, %v7305_v2  ;;  %vm6100_vm11 = vmand %vm1983_vm10, %vm2151_vm13  ;;  %vm2007_vm3 = vcmp.ge.s32.totalorder %v6004_v50, %v5767_v20  ;;  %vm2026_vm10 = vcmp.ge.s32.totalorder %v5407_v11, %v5751_v49  ;;  %v7316_v20 = vmov 0 }
0x20c5   :  { %v7308_v10 = vsel %vm6100_vm11, 4294967295, %v7307_v10  ;;  %vm6108_vm15 = vmand %vm2008_vm8, %vm2176_vm12  ;;  %vm2194_vm8 = vcmp.lt.s32.totalorder %v5407_v11, %v5807_v24  ;;  %vm2016_vm12 = vcmp.ge.s32.totalorder %v5997_v30, %v5818_v32  ;;  %vm2202_vm11 = vcmp.lt.s32.totalorder %v5407_v11, %v6120_v42 }
0x20c6   :  { %7309 = vst [vmem:[#allocation15_spill] sm:$0xff] %v7308_v10  ;;  %v7311_v37 = vsel %vm6108_vm15, 4294967295, %v7310_v37  ;;  %vm6116_vm13 = vmand %vm2007_vm3, %vm2175_vm7  ;;  %vm2183_vm3 = vcmp.lt.s32.totalorder %v6004_v50, %v5850_v46  ;;  %vm2025_vm7 = vcmp.ge.s32.totalorder %v5396_v3, %v5751_v49  ;;  %v7321_v46 = vmov 0 }
0x20c7   :  { %7312 = vst [vmem:[#allocation16_spill] sm:$0xff] %v7311_v37  ;;  %v7314_v16 = vsel %vm6116_vm13, 4294967295, %v7313_v16  ;;  %vm6128_vm15 = vmand %vm2016_vm12, %vm2184_vm2  ;;  %vm2193_vm13 = vcmp.lt.s32.totalorder %v5396_v3, %v5807_v24  ;;  %vm2015_vm2 = vcmp.ge.s32.totalorder %v6004_v50, %v5818_v32  ;;  %vm2201_vm12 = vcmp.lt.s32.totalorder %v5396_v3, %v6120_v42  ;;  %v7387_v37 = vld [vmem:[#allocation5_spill] sm:$0xff] }
0x20c8   :  { %7315 = vst [vmem:[#allocation17_spill] sm:$0xff] %v7314_v16  ;;  %v7317_v20 = vsel %vm6128_vm15, 4294967295, %v7316_v20  ;;  %vm6140_vm6 = vmand %vm2026_vm10, %vm2194_vm8  ;;  %vm2208_vm10 = vcmp.lt.s32.totalorder %v5997_v30, %v6120_v42  ;;  %v7332_v10 = vmov 0 }
0x20c9   :  { %7318 = vst [vmem:[#allocation18_spill] sm:$0xff] %v7317_v20  ;;  %vm6148_vm15 = vmand %vm2015_vm2, %vm2183_vm3  ;;  %vm2033_vm3 = vcmp.ge.s32.totalorder %v5396_v3, %v6094_v59  ;;  %v7392_v20 = vld [vmem:[#allocation11_spill] sm:$0xff] }
0x20ca   :  { %v7322_v46 = vsel %vm6148_vm15, 4294967295, %v7321_v46  ;;  %vm6154_vm0 = vmand %vm2025_vm7, %vm2193_vm13  ;;  %vm2040_vm13 = vcmp.ge.s32.totalorder %v5997_v30, %v6094_v59  ;;  %vm7330_vm7 = vcmask 523264  }
0x20cb   :  { %7323 = vst [vmem:[#allocation19_spill] sm:$0xff] %v7322_v46  ;;  %vm6160_vm8 = vmand %vm2034_vm4, %vm2202_vm11  ;;  %vm2207_vm11 = vcmp.lt.s32.totalorder %v6004_v50, %v6120_v42  ;;  %v7367_v46 = vld [vmem:[#allocation9_spill] sm:$0xff] }
0x20cc   :  { %vm6166_vm2 = vmand %vm2033_vm3, %vm2201_vm12 }
0x20cd   :  { %vm7331_vm15 = vmmov %vm7330_vm7 }
0x20ce   :  { %vm6176_vm4 = vmand %vm2040_vm13, %vm2208_vm10  ;;  %vm2124_vm10 = vcmp.lt.s32.totalorder %v5410_v12, %v5384_v60  ;;  %vm2039_vm13 = vcmp.ge.s32.totalorder %v6004_v50, %v6094_v59 }
0x20cf   :  { %v7333_v10 = vsel %vm6176_vm4, 4294967295, %v7332_v10  ;;  %vm4241_vm12 = vmpackc.low %vm6160_vm8, %vm6140_vm6  ;;  %vm2123_vm6 = vcmp.lt.s32.totalorder %v5414_v41, %v5384_v60 }
0x20d0   :  { %vm4244_vm3 = vmpackc.low %vm6166_vm2, %vm6154_vm0  ;;  %vm1964_vm2 = vcmp.ge.s32.totalorder %v5410_v12, %v5386_v61  ;;  %vm1963_vm0 = vcmp.ge.s32.totalorder %v5414_v41, %v5386_v61 }
0x20d1   :  { %vm6203_vm8 = vmand %vm2039_vm13, %vm2207_vm11  ;;  %vm7336_vm11 = vnez %v7159_v21  ;;  %vm7337_vm13 = vnez %v7169_v34  ;;  %v7348_v34 = vmov 0.0   ;;  %v7389_v21 = vld [vmem:[#allocation7_spill] sm:$0xff] }
0x20e2   :  { %v4657_v0 = vpop.permute.xlu1 %4656 }
0x20e3   :  { %v4659_v16 = vunpack.i.h.bf16 %v4657_v0  ;;  %v4658_v32 = vunpack.i.l.bf16 %v4657_v0 }
0x20e5   :  { %v2390_v11 = vsel %vm7330_vm7, %v5402_v5, %v4659_v16  ;;  %v2389_v0 = vsel %vm7331_vm15, %v5400_v4, %v4658_v32  ;;  %vm1956_vm15 = vcmp.ge.s32.totalorder %v5410_v12, %v5382_v57  ;;  %vm1955_vm7 = vcmp.ge.s32.totalorder %v5414_v41, %v5382_v57  ;;  %v6211_v5 = vld [vmem:[%s7113_s2] sm:$0xff]  ;;  %v6253_v16 = vld [vmem:[%s7113_s2 + $0x8] sm:$0x3f]  ;;  %v7369_v32 = vld [vmem:[#allocation13_spill] sm:$0xff] }
0x20e6   :  { %v6182_v3 = vpack.c.bf16 %v2390_v11, %v2389_v0  ;;  %v7334_v4 = vmov 0  ;;  %vm6223_vm4 = vmand %vm1955_vm7, %vm2123_vm6  ;;  %vm7344_vm7 = vnez %v7161_v22  ;;  %vm7345_vm6 = vnez %v7171_v36  ;;  %v7373_v0 = vld [vmem:[#allocation14_spill] sm:$0xff]  ;;  %v2833_v11 = vld [vmem:[%s7114_s7 + $0x68] sm:$0xff] }
0x20e7   :  { %v7335_v4 = vsel %vm6203_vm8, 4294967295, %v7334_v4  ;;  %vm7338_vm8 = vmpackc.low %vm7336_vm11, %vm7337_vm13  ;;  %vm7347_vm11 = vnez %v7189_v52  ;;  %vm1987_vm13 = vcmp.ge.s32.totalorder %v5414_v41, %v5398_v51  ;;  %v7398_v52 = vld [vmem:[#allocation12_spill] sm:$0xff] }
0x20e8   :  { %4242 = vmatprep.subr.msk.bf16.mxu1 %vm4241_vm12, %v6182_v3  ;;  %vm2132_vm12 = vcmp.lt.s32.totalorder %v5410_v12, %v5390_v62 }
0x20e9   :  { %4245 = vmatpush1.bf16.msk.msra.mxu1 %vm4244_vm3, %v6182_v3  ;;  %vm2236_vm3 = vmand %vm1956_vm15, %vm2124_vm10  ;;  %vm1988_vm15 = vcmp.ge.s32.totalorder %v5410_v12, %v5398_v51  ;;  %vm2156_vm10 = vcmp.lt.s32.totalorder %v5410_v12, %v5416_v14 }
0x20ea   :  { %4248 = vmatprep.subr.msk.bf16.mxu1 %vm7338_vm8, %v5589_v7  ;;  %vm6233_vm5 = vmand %vm1964_vm2, %vm2132_vm12 }
0x20eb   :  { %vm7346_vm8 = vmpackc.low %vm7344_vm7, %vm7345_vm6 }
0x20ec   :  { %3622 = vmatmul.mubr.msk.f32.vlgmr.msra.gmra.mrb[0].mxu1 %vm7341_vm14, %v6211_v5  ;;  %vm4253_vm14 = vmpackc.low %vm2236_vm3, %vm7347_vm11  ;;  %vm2155_vm3 = vcmp.lt.s32.totalorder %v5414_v41, %v5416_v14  ;;  %vm2163_vm11 = vcmp.lt.s32.totalorder %v5414_v41, %v5535_v19 }
0x20ed   :  { %4251 = vmatpush1.bf16.msk.msra.mxu1 %vm7346_vm8, %v5589_v7  ;;  %2582 = vmatprep.mubr.f32.mxu1 %v7348_v34  ;;  %vm6256_vm2 = vmand %vm1963_vm0, %vm2131_vm9  ;;  %vm1996_vm9 = vcmp.ge.s32.totalorder %v5410_v12, %v5473_v31  ;;  %vm2164_vm0 = vcmp.lt.s32.totalorder %v5410_v12, %v5535_v19  ;;  %vm1995_vm8 = vcmp.ge.s32.totalorder %v5414_v41, %v5473_v31 }
0x20ee   :  { %4254 = vmatprep.subr.msk.bf16.mxu1 %vm4253_vm14, %v5607_v63  ;;  %vm6260_vm12 = vmand %vm1988_vm15, %vm2156_vm10  ;;  %vm7353_vm15 = vcmask 916480   ;;  %vm7354_vm10 = vnez %v7212_v29  ;;  %v7362_v29 = vld [vmem:[#allocation10_spill] sm:$0xff] }
0x20ef   :  { %vm4256_vm7 = vmpackc.low %vm6223_vm4, %vm5595_vm1 }
0x20f0   :  { %3623 = vmatmul.mubr.msk.f32.gmra.mrb[2].mxu1 %vm7353_vm15, %v6253_v16  ;;  %vm4259_vm6 = vmpackc.low %vm7354_vm10, %vm6233_vm5  ;;  %vm7359_vm5 = vnez %v7216_v13  ;;  %vm2019_vm15 = vcmp.ge.s32.totalorder %v5414_v41, %v5656_v6  ;;  %vm2187_vm10 = vcmp.lt.s32.totalorder %v5414_v41, %v5703_v39 }
0x20f1   :  { %4257 = vmatpush1.bf16.msk.msra.mxu1 %vm4256_vm7, %v5607_v63  ;;  %2653 = vmatprep.mubr.f32.mxu1 %v7348_v34  ;;  %vm6285_vm1 = vmand %vm1987_vm13, %vm2155_vm3  ;;  %vm2020_vm13 = vcmp.ge.s32.totalorder %v5410_v12, %v5656_v6  ;;  %vm2188_vm3 = vcmp.lt.s32.totalorder %v5410_v12, %v5703_v39  ;;  %vm7361_vm7 = vnez %v7360_v38  ;;  %v2853_v38 = vld [vmem:[%s7114_s7 + $0x108] sm:$0xff] }
0x20f2   :  { %4260 = vmatprep.subr.msk.bf16.mxu1 %vm4259_vm6, %v5765_v18  ;;  %vm6289_vm4 = vmand %vm1996_vm9, %vm2164_vm0  ;;  %vm7368_vm6 = vnez %v7367_v46 }
0x20f3   :  { %vm4262_vm14 = vmpackc.low %vm7359_vm5, %vm6256_vm2 }
0x20f4   :  { %vm4265_vm9 = vmpackc.low %vm6260_vm12, %vm7361_vm7  ;;  %vm7375_vm7 = vnez %v7266_v26 }
0x20f5   :  { %4263 = vmatpush1.bf16.msk.msra.mxu1 %vm4262_vm14, %v5765_v18  ;;  %vm6311_vm0 = vmand %vm1995_vm8, %vm2163_vm11  ;;  %vm7370_vm8 = vnez %v7369_v32  ;;  %vm2204_vm14 = vcmp.lt.s32.totalorder %v5410_v12, %v6120_v42  ;;  %v2832_v32 = vld [vmem:[%s7114_s7 + $0x60] sm:$0xff] }
0x20f6   :  { %4266 = vmatprep.subr.msk.bf16.mxu1 %vm4265_vm9, %v7362_v29  ;;  %vm6315_vm2 = vmand %vm2020_vm13, %vm2188_vm3  ;;  %vm2028_vm3 = vcmp.ge.s32.totalorder %v5410_v12, %v5751_v49 }
0x20f7   :  { %vm4268_vm12 = vmpackc.low %vm6285_vm1, %vm7368_vm6  ;;  %vm7374_vm1 = vnez %v7373_v0  ;;  %vm2203_vm6 = vcmp.lt.s32.totalorder %v5414_v41, %v6120_v42  ;;  %v2850_v0 = vld [vmem:[%s7114_s7 + $0xf0] sm:$0xff] }
0x20f8   :  { %vm4271_vm11 = vmpackc.low %vm7370_vm8, %vm6289_vm4  ;;  %vm2196_vm4 = vcmp.lt.s32.totalorder %v5410_v12, %v5807_v24 }
0x20f9   :  { %4269 = vmatpush1.bf16.msk.msra.mxu1 %vm4268_vm12, %v7362_v29  ;;  %vm6333_vm5 = vmand %vm2019_vm15, %vm2187_vm10  ;;  %vm2036_vm15 = vcmp.ge.s32.totalorder %v5410_v12, %v6094_v59  ;;  %vm7376_vm12 = vnez %v7270_v28  ;;  %v7377_v12 = vld [vmem:[#allocation4_spill] sm:$0xff] }
0x20fa   :  { %4272 = vmatprep.subr.msk.bf16.mxu1 %vm4271_vm11, %v5910_v27  ;;  %vm4274_vm13 = vmpackc.low %vm7374_vm1, %vm6311_vm0  ;;  %vm2035_vm1 = vcmp.ge.s32.totalorder %v5414_v41, %v6094_v59  ;;  %v2834_v28 = vld [vmem:[%s7114_s7 + $0x70] sm:$0xff] }
0x20fb   :  { %vm4277_vm9 = vmpackc.low %vm6315_vm2, %vm7375_vm7  ;;  %vm2027_vm2 = vcmp.ge.s32.totalorder %v5414_v41, %v5751_v49 }
0x20fc   :  { %vm2316_vm10 = vmand %vm2036_vm15, %vm2204_vm14  ;;  %vm2195_vm14 = vcmp.lt.s32.totalorder %v5414_v41, %v5807_v24  ;;  %vm2125_vm15 = vcmp.lt.s32.totalorder %v5484_v33, %v5384_v60  ;;  %v7379_v41 = vld [vmem:[#allocation6_spill] sm:$0xff] }
0x20fd   :  { %4275 = vmatpush1.bf16.msk.msra.mxu1 %vm4274_vm13, %v5910_v27  ;;  %vm2308_vm0 = vmand %vm2028_vm3, %vm2196_vm4  ;;  %vm1958_vm4 = vcmp.ge.s32.totalorder %v5461_v23, %v5382_v57 }
0x20fe   :  { %4278 = vmatprep.subr.msk.bf16.mxu1 %vm4277_vm9, %v5926_v47  ;;  %vm4280_vm8 = vmpackc.low %vm6333_vm5, %vm7376_vm12  ;;  %vm2126_vm5 = vcmp.lt.s32.totalorder %v5461_v23, %v5384_v60  ;;  %vm1957_vm9 = vcmp.ge.s32.totalorder %v5484_v33, %v5382_v57  ;;  %vm7380_vm12 = vnez %v7379_v41  ;;  %v4398_v41 = vpack.c.bf16 %v2833_v11, %v2832_v32 }
0x20ff   :  { %vm4283_vm11 = vmpackc.low %vm2316_vm10, %vm2308_vm0  ;;  %vm1966_vm10 = vcmp.ge.s32.totalorder %v5461_v23, %v5386_v61  ;;  %vm2134_vm0 = vcmp.lt.s32.totalorder %v5461_v23, %v5390_v62 }
0x2100   :  { %vm2315_vm13 = vmand %vm2035_vm1, %vm2203_vm6  ;;  %vm7378_vm6 = vnez %v7377_v12  ;;  %vm1965_vm1 = vcmp.ge.s32.totalorder %v5484_v33, %v5386_v61  ;;  %v2851_v12 = vld [vmem:[%s7114_s7 + $0xf8] sm:$0xff] }
0x2101   :  { %4281 = vmatpush1.bf16.msk.msra.mxu1 %vm4280_vm8, %v5926_v47  ;;  %vm2307_vm3 = vmand %vm2027_vm2, %vm2195_vm14  ;;  %vm2133_vm14 = vcmp.lt.s32.totalorder %v5484_v33, %v5390_v62  ;;  %v4400_v26 = vpack.c.bf16 %v2851_v12, %v2850_v0  ;;  %v2884_v0 = vld [vmem:[%s7114_s7 + $0x200] sm:$0xff]  ;;  %v2885_v12 = vld [vmem:[%s7114_s7 + $0x208] sm:$0xff] }
0x2102   :  { %4284 = vmatprep.subr.msk.bf16.mxu1 %vm4283_vm11, %v6182_v3  ;;  %vm4286_vm7 = vmpackc.low %vm2315_vm13, %vm2307_vm3  ;;  %vm7384_vm13 = vcmask 916480  }
0x2103   :  { %vm7381_vm8 = vmpackc.low %vm7378_vm6, %vm7380_vm12  ;;  %vm7393_vm6 = vnez %v7392_v20  ;;  %v2869_v20 = vld [vmem:[%s7114_s7 + $0x188] sm:$0xff] }
0x2104   :  { %vm2238_vm11 = vmand %vm1958_vm4, %vm2126_vm5  ;;  %vm1990_vm4 = vcmp.ge.s32.totalorder %v5461_v23, %v5398_v51  ;;  %vm2158_vm5 = vcmp.lt.s32.totalorder %v5461_v23, %v5416_v14 }
0x2105   :  { %4287 = vmatpush1.bf16.msk.msra.mxu1 %vm4286_vm7, %v6182_v3  ;;  %vm6388_vm2 = vmand %vm1957_vm9, %vm2125_vm15  ;;  %vm7388_vm7 = vnez %v7387_v37  ;;  %vm7390_vm9 = vnez %v7389_v21  ;;  %v2835_v37 = vld [vmem:[%s7114_s7 + $0x78] sm:$0xff]  ;;  %v2868_v21 = vld [vmem:[%s7114_s7 + $0x180] sm:$0xff] }
0x2106   :  { %4290 = vmatprep.subr.msk.bf16.mxu1 %vm7381_vm8, %v5589_v7  ;;  %vm6398_vm3 = vmand %vm1966_vm10, %vm2134_vm0  ;;  %vm1989_vm8 = vcmp.ge.s32.totalorder %v5484_v33, %v5398_v51  ;;  %v4402_v22 = vpack.c.bf16 %v2835_v37, %v2834_v28  ;;  %v4404_v36 = vpack.c.bf16 %v2869_v20, %v2868_v21  ;;  %v4438_v37 = vpack.c.bf16 %v2885_v12, %v2884_v0 }
0x2107   :  { %vm7391_vm15 = vmpackc.low %vm7388_vm7, %vm7390_vm9 }
0x2108   :  { %3652 = vmatmul.mubr.msk.f32.vlgmr.msra.gmra.mrb[4].mxu1 %vm7384_vm13, %v6211_v5  ;;  %vm4295_vm12 = vmpackc.low %vm2238_vm11, %vm7393_vm6  ;;  %vm2157_vm13 = vcmp.lt.s32.totalorder %v5484_v33, %v5416_v14  ;;  %vm7399_vm11 = vnez %v7398_v52  ;;  %vm1997_vm6 = vcmp.ge.s32.totalorder %v5484_v33, %v5473_v31  ;;  %v2852_v52 = vld [vmem:[%s7114_s7 + $0x100] sm:$0xff] }
0x2109   :  { %4293 = vmatpush1.bf16.msk.msra.mxu1 %vm7391_vm15, %v5589_v7  ;;  %2659 = vmatprep.mubr.f32.mxu1 %v7348_v34  ;;  %vm6416_vm10 = vmand %vm1965_vm1, %vm2133_vm14  ;;  %vm7400_vm1 = vcmask 916480   ;;  %vm1998_vm14 = vcmp.ge.s32.totalorder %v5461_v23, %v5473_v31 }
0x210a   :  { %4296 = vmatprep.subr.msk.bf16.mxu1 %vm4295_vm12, %v5607_v63  ;;  %vm6420_vm0 = vmand %vm1990_vm4, %vm2158_vm5  ;;  %vm2166_vm4 = vcmp.lt.s32.totalorder %v5461_v23, %v5535_v19  ;;  %vm7401_vm5 = vnez %v7273_v48  ;;  %vm2165_vm12 = vcmp.lt.s32.totalorder %v5484_v33, %v5535_v19  ;;  %v2871_v48 = vld [vmem:[%s7114_s7 + $0x198] sm:$0xff] }
0x210b   :  { %vm4298_vm7 = vmpackc.low %vm6388_vm2, %vm7399_vm11 }
0x210c   :  { %3653 = vmatmul.mubr.msk.f32.gmra.mrb[6].mxu1 %vm7400_vm1, %v6253_v16  ;;  %vm4301_vm9 = vmpackc.low %vm7401_vm5, %vm6398_vm3  ;;  %vm7406_vm3 = vnez %v7276_v17  ;;  %vm2189_vm5 = vcmp.lt.s32.totalorder %v5484_v33, %v5703_v39 }
0x210d   :  { %4299 = vmatpush1.bf16.msk.msra.mxu1 %vm4298_vm7, %v5607_v63  ;;  %2730 = vmatprep.mubr.f32.mxu1 %v7348_v34  ;;  %vm6445_vm2 = vmand %vm1989_vm8, %vm2157_vm13  ;;  %vm2022_vm8 = vcmp.ge.s32.totalorder %v5461_v23, %v5656_v6  ;;  %vm2190_vm13 = vcmp.lt.s32.totalorder %v5461_v23, %v5703_v39  ;;  %vm7407_vm7 = vnez %v7278_v55  ;;  %v4406_v55 = vpack.c.bf16 %v2853_v38, %v2852_v52  ;;  %v2904_v52 = vld [vmem:[%s7114_s7 + $0x2a0] sm:$0xff]  ;;  %v2905_v38 = vld [vmem:[%s7114_s7 + $0x2a8] sm:$0xff] }
0x210e   :  { %4302 = vmatprep.subr.msk.bf16.mxu1 %vm4301_vm9, %v5765_v18  ;;  %vm6449_vm15 = vmand %vm1998_vm14, %vm2166_vm4  ;;  %vm2021_vm4 = vcmp.ge.s32.totalorder %v5484_v33, %v5656_v6  ;;  %vm7412_vm9 = vnez %v7280_v40  ;;  %v2841_v40 = vld [vmem:[%s7114_s7 + $0xa8] sm:$0xff] }
0x210f   :  { %vm4304_vm11 = vmpackc.low %vm7406_vm3, %vm6416_vm10 }
0x2110   :  { %vm4307_vm1 = vmpackc.low %vm6420_vm0, %vm7407_vm7  ;;  %vm7417_vm7 = vnez %v7286_v44  ;;  %v2825_v44 = vld [vmem:[%s7114_s7 + $0x28] sm:$0xff] }
0x2111   :  { %4305 = vmatpush1.bf16.msk.msra.mxu1 %vm4304_vm11, %v5765_v18  ;;  %vm6471_vm14 = vmand %vm1997_vm6, %vm2165_vm12  ;;  %vm7413_vm6 = vnez %v7282_v43  ;;  %vm2206_vm11 = vcmp.lt.s32.totalorder %v5461_v23, %v6120_v42 }
0x2112   :  { %4308 = vmatprep.subr.msk.bf16.mxu1 %vm4307_vm1, %v7362_v29  ;;  %vm6475_vm10 = vmand %vm2022_vm8, %vm2190_vm13  ;;  %vm2030_vm13 = vcmp.ge.s32.totalorder %v5461_v23, %v5751_v49 }
0x2113   :  { %vm4310_vm0 = vmpackc.low %vm6445_vm2, %vm7412_vm9  ;;  %vm7416_vm2 = vnez %v7284_v25  ;;  %vm2205_vm9 = vcmp.lt.s32.totalorder %v5484_v33, %v6120_v42  ;;  %v2847_v42 = vld [vmem:[%s7114_s7 + $0xd8] sm:$0xff] }
0x2114   :  { %vm4313_vm12 = vmpackc.low %vm7413_vm6, %vm6449_vm15  ;;  %vm2198_vm15 = vcmp.lt.s32.totalorder %v5461_v23, %v5807_v24 }
0x2115   :  { %4311 = vmatpush1.bf16.msk.msra.mxu1 %vm4310_vm0, %v7362_v29  ;;  %vm6493_vm3 = vmand %vm2021_vm4, %vm2189_vm5  ;;  %vm2038_vm4 = vcmp.ge.s32.totalorder %v5461_v23, %v6094_v59  ;;  %vm7418_vm0 = vnez %v7288_v54  ;;  %v7444_v23 = vld [vmem:[#allocation19_spill] sm:$0xff]  ;;  %v2843_v54 = vld [vmem:[%s7114_s7 + $0xb8] sm:$0xff] }
0x2116   :  { %4314 = vmatprep.subr.msk.bf16.mxu1 %vm4313_vm12, %v5910_v27  ;;  %vm4316_vm8 = vmpackc.low %vm7416_vm2, %vm6471_vm14  ;;  %vm2037_vm2 = vcmp.ge.s32.totalorder %v5484_v33, %v6094_v59  ;;  %v2829_v59 = vld [vmem:[%s7114_s7 + $0x48] sm:$0xff] }
0x2117   :  { %vm4319_vm1 = vmpackc.low %vm6475_vm10, %vm7417_vm7  ;;  %vm2029_vm10 = vcmp.ge.s32.totalorder %v5484_v33, %v5751_v49 }
0x2118   :  { %vm2318_vm5 = vmand %vm2038_vm4, %vm2206_vm11  ;;  %vm2197_vm11 = vcmp.lt.s32.totalorder %v5484_v33, %v5807_v24  ;;  %vm2127_vm4 = vcmp.lt.s32.totalorder %v6004_v50, %v5384_v60  ;;  %v2837_v33 = vld [vmem:[%s7114_s7 + $0x88] sm:$0xff] }
0x2119   :  { %4317 = vmatpush1.bf16.msk.msra.mxu1 %vm4316_vm8, %v5910_v27  ;;  %vm2310_vm14 = vmand %vm2030_vm13, %vm2198_vm15  ;;  %vm1960_vm15 = vcmp.ge.s32.totalorder %v5997_v30, %v5382_v57 }
0x211a   :  { %4320 = vmatprep.subr.msk.bf16.mxu1 %vm4319_vm1, %v5926_v47  ;;  %vm4322_vm6 = vmpackc.low %vm6493_vm3, %vm7418_vm0  ;;  %vm2128_vm3 = vcmp.lt.s32.totalorder %v5997_v30, %v5384_v60  ;;  %vm1959_vm1 = vcmp.ge.s32.totalorder %v6004_v50, %v5382_v57  ;;  %v4408_v60 = vpack.c.bf16 %v2871_v48, %v2870_v1  ;;  %v4444_v48 = vpack.c.bf16 %v2905_v38, %v2904_v52  ;;  %v2940_v52 = vld [vmem:[%s7114_s7 + $0x3c0] sm:$0xff]  ;;  %v2941_v38 = vld [vmem:[%s7114_s7 + $0x3c8] sm:$0xff] }
0x211b   :  { %vm4325_vm12 = vmpackc.low %vm2318_vm5, %vm2310_vm14  ;;  %vm7419_vm5 = vnez %v7290_v58  ;;  %vm7420_vm14 = vnez %v7294_v56  ;;  %v2826_v56 = vld [vmem:[%s7114_s7 + $0x30] sm:$0xff] }
0x211c   :  { %vm2317_vm8 = vmand %vm2037_vm2, %vm2205_vm9 }
0x211d   :  { %4323 = vmatpush1.bf16.msk.msra.mxu1 %vm4322_vm6, %v5926_v47  ;;  %vm2309_vm13 = vmand %vm2029_vm10, %vm2197_vm11  ;;  %vm1968_vm6 = vcmp.ge.s32.totalorder %v5997_v30, %v5386_v61  ;;  %vm7422_vm10 = vcmask 916480   ;;  %vm1967_vm11 = vcmp.ge.s32.totalorder %v6004_v50, %v5386_v61  ;;  %v7436_v61 = vld [vmem:[#allocation15_spill] sm:$0xff] }
0x211e   :  { %4326 = vmatprep.subr.msk.bf16.mxu1 %vm4325_vm12, %v6182_v3  ;;  %vm4328_vm7 = vmpackc.low %vm2317_vm8, %vm2309_vm13  ;;  %vm2136_vm12 = vcmp.lt.s32.totalorder %v5997_v30, %v5390_v62  ;;  %vm2135_vm8 = vcmp.lt.s32.totalorder %v6004_v50, %v5390_v62  ;;  %vm7425_vm13 = vnez %v7292_v45  ;;  %v7438_v62 = vld [vmem:[#allocation16_spill] sm:$0xff] }
0x211f   :  { %vm7421_vm9 = vmpackc.low %vm7419_vm5, %vm7420_vm14  ;;  %vm1992_vm14 = vcmp.ge.s32.totalorder %v5997_v30, %v5398_v51 }
0x2120   :  { %vm2240_vm0 = vmand %vm1960_vm15, %vm2128_vm3  ;;  %vm7426_vm15 = vnez %v7296_v53  ;;  %v2827_v53 = vld [vmem:[%s7114_s7 + $0x38] sm:$0xff] }
0x2121   :  { %4329 = vmatpush1.bf16.msk.msra.mxu1 %vm4328_vm7, %v6182_v3  ;;  %vm6550_vm2 = vmand %vm1959_vm1, %vm2127_vm4  ;;  %vm7428_vm7 = vnez %v7298_v15  ;;  %v2844_v15 = vld [vmem:[%s7114_s7 + $0xc0] sm:$0xff] }
0x2122   :  { %4332 = vmatprep.subr.msk.bf16.mxu1 %vm7421_vm9, %v5589_v7  ;;  %vm7427_vm3 = vmpackc.low %vm7425_vm13, %vm7426_vm15  ;;  %vm2160_vm9 = vcmp.lt.s32.totalorder %v5997_v30, %v5416_v14  ;;  %vm7432_vm13 = vcmask 916480  }
0x2123   :  { %vm4337_vm5 = vmpackc.low %vm2240_vm0, %vm7428_vm7  ;;  %vm2168_vm7 = vcmp.lt.s32.totalorder %v5997_v30, %v5535_v19 }
0x2124   :  { %3682 = vmatmul.mubr.msk.f32.vlgmr.msra.gmra.mrb[8].mxu1 %vm7422_vm10, %v6211_v5  ;;  %vm2248_vm1 = vmand %vm1968_vm6, %vm2136_vm12  ;;  %vm7431_vm10 = vnez %v7300_v9  ;;  %vm1991_vm6 = vcmp.ge.s32.totalorder %v6004_v50, %v5398_v51  ;;  %vm2159_vm12 = vcmp.lt.s32.totalorder %v6004_v50, %v5416_v14  ;;  %v7440_v51 = vld [vmem:[#allocation17_spill] sm:$0xff]  ;;  %v7442_v14 = vld [vmem:[#allocation18_spill] sm:$0xff] }
0x2125   :  { %4335 = vmatpush1.bf16.msk.msra.mxu1 %vm7427_vm3, %v5589_v7  ;;  %2736 = vmatprep.mubr.f32.mxu1 %v7348_v34  ;;  %vm6568_vm4 = vmand %vm1967_vm11, %vm2135_vm8  ;;  %vm7433_vm11 = vnez %v7302_v35  ;;  %vm2000_vm3 = vcmp.ge.s32.totalorder %v5997_v30, %v5473_v31  ;;  %v2820_v7 = vld [vmem:[%s7114_s7] sm:$0xff]  ;;  %v2845_v9 = vld [vmem:[%s7114_s7 + $0xc8] sm:$0xff]  ;;  %v4386_v35 = vpack.c.bf16 %v2827_v53, %v2826_v56 }
0x2126   :  { %4338 = vmatprep.subr.msk.bf16.mxu1 %vm4337_vm5, %v5607_v63  ;;  %vm4340_vm0 = vmpackc.low %vm6550_vm2, %vm7431_vm10  ;;  %vm7434_vm5 = vnez %v7304_v8  ;;  %v4388_v8 = vpack.c.bf16 %v2845_v9, %v2844_v15  ;;  %v2862_v56 = vld [vmem:[%s7114_s7 + $0x150] sm:$0xff]  ;;  %v2863_v53 = vld [vmem:[%s7114_s7 + $0x158] sm:$0xff] }
0x2127   :  { %vm4343_vm8 = vmpackc.low %vm7433_vm11, %vm2248_vm1  ;;  %vm1999_vm1 = vcmp.ge.s32.totalorder %v6004_v50, %v5473_v31  ;;  %v2836_v31 = vld [vmem:[%s7114_s7 + $0x80] sm:$0xff]  ;;  %v2881_v9 = vld [vmem:[%s7114_s7 + $0x1e8] sm:$0xff] }
0x2128   :  { %3683 = vmatmul.mubr.msk.f32.gmra.mrb[10].mxu1 %vm7432_vm13, %v6253_v16  ;;  %vm2272_vm15 = vmand %vm1992_vm14, %vm2160_vm9  ;;  %vm7435_vm14 = vnez %v7306_v2  ;;  %v2828_v2 = vld [vmem:[%s7114_s7 + $0x40] sm:$0xff] }
0x2129   :  { %4341 = vmatpush1.bf16.msk.msra.mxu1 %vm4340_vm0, %v5607_v63  ;;  %2807 = vmatprep.mubr.f32.mxu1 %v7348_v34  ;;  %vm2271_vm2 = vmand %vm1991_vm6, %vm2159_vm12  ;;  %vm2167_vm0 = vcmp.lt.s32.totalorder %v6004_v50, %v5535_v19  ;;  %vm7437_vm12 = vnez %v7436_v61  ;;  %v4372_v19 = vpack.c.bf16 %v2837_v33, %v2836_v31  ;;  %v2821_v63 = vld [vmem:[%s7114_s7 + $0x8] sm:$0xff]  ;;  %v2854_v61 = vld [vmem:[%s7114_s7 + $0x110] sm:$0xff] }
0x212a   :  { %4344 = vmatprep.subr.msk.bf16.mxu1 %vm4343_vm8, %v5765_v18  ;;  %vm4346_vm10 = vmpackc.low %vm7434_vm5, %vm6568_vm4  ;;  %vm7439_vm4 = vnez %v7438_v62  ;;  %vm2024_vm5 = vcmp.ge.s32.totalorder %v5997_v30, %v5656_v6  ;;  %v2855_v62 = vld [vmem:[%s7114_s7 + $0x118] sm:$0xff]  ;;  %v2880_v15 = vld [vmem:[%s7114_s7 + $0x1e0] sm:$0xff] }
0x212b   :  { %vm4349_vm9 = vmpackc.low %vm2272_vm15, %vm7435_vm14  ;;  %vm7441_vm15 = vnez %v7440_v51  ;;  %v2872_v51 = vld [vmem:[%s7114_s7 + $0x1a0] sm:$0xff] }
0x212c   :  { %vm2280_vm13 = vmand %vm2000_vm3, %vm2168_vm7  ;;  %vm2023_vm7 = vcmp.ge.s32.totalorder %v6004_v50, %v5656_v6  ;;  %v2838_v6 = vld [vmem:[%s7114_s7 + $0x90] sm:$0xff] }
0x212d   :  { %4347 = vmatpush1.bf16.msk.msra.mxu1 %vm4346_vm10, %v5765_v18  ;;  %vm2279_vm6 = vmand %vm1999_vm1, %vm2167_vm0  ;;  %vm2192_vm10 = vcmp.lt.s32.totalorder %v5997_v30, %v5703_v39  ;;  %vm7443_vm0 = vnez %v7442_v14  ;;  %v2873_v14 = vld [vmem:[%s7114_s7 + $0x1a8] sm:$0xff] }
0x212e   :  { %4350 = vmatprep.subr.msk.bf16.mxu1 %vm4349_vm9, %v7362_v29  ;;  %vm4352_vm11 = vmpackc.low %vm2271_vm2, %vm7437_vm12  ;;  %vm2191_vm2 = vcmp.lt.s32.totalorder %v6004_v50, %v5703_v39  ;;  %vm2032_vm9 = vcmp.ge.s32.totalorder %v5997_v30, %v5751_v49  ;;  %vm7445_vm12 = vnez %v7444_v23  ;;  %v2839_v39 = vld [vmem:[%s7114_s7 + $0x98] sm:$0xff]  ;;  %v4410_v23 = vpack.c.bf16 %v2855_v62, %v2854_v61 }
0x212f   :  { %vm4355_vm8 = vmpackc.low %vm7439_vm4, %vm2280_vm13  ;;  %vm2200_vm13 = vcmp.lt.s32.totalorder %v5997_v30, %v5807_v24  ;;  %v4376_v18 = vpack.c.bf16 %v2839_v39, %v2838_v6  ;;  %v2824_v30 = vld [vmem:[%s7114_s7 + $0x20] sm:$0xff]  ;;  %v4412_v33 = vpack.c.bf16 %v2873_v14, %v2872_v51  ;;  %v2874_v6 = vld [vmem:[%s7114_s7 + $0x1b0] sm:$0xff] }
0x2130   :  { %vm4358_vm3 = vmpackc.low %vm7441_vm15, %vm2279_vm6  ;;  %v4382_v58 = vpack.c.bf16 %v2825_v44, %v2824_v30  ;;  %v2875_v39 = vld [vmem:[%s7114_s7 + $0x1b8] sm:$0xff]  ;;  %v2860_v30 = vld [vmem:[%s7114_s7 + $0x140] sm:$0xff] }
0x2131   :  { %4353 = vmatpush1.bf16.msk.msra.mxu1 %vm4352_vm11, %v7362_v29  ;;  %vm2304_vm1 = vmand %vm2024_vm5, %vm2192_vm10  ;;  %vm2199_vm5 = vcmp.lt.s32.totalorder %v6004_v50, %v5807_v24  ;;  %vm7446_vm10 = vnez %v7333_v10  ;;  %v2822_v24 = vld [vmem:[%s7114_s7 + $0x10] sm:$0xff]  ;;  %v2849_v29 = vld [vmem:[%s7114_s7 + $0xe8] sm:$0xff] }
0x2132   :  { %4356 = vmatprep.subr.msk.bf16.mxu1 %vm4355_vm8, %v5910_v27  ;;  %vm4361_vm14 = vmpackc.low %vm2304_vm1, %vm7443_vm0  ;;  %vm2031_vm8 = vcmp.ge.s32.totalorder %v6004_v50, %v5751_v49  ;;  %v4374_v49 = vpack.c.bf16 %v2821_v63, %v2820_v7  ;;  %vm7448_vm1 = vcmask 916480   ;;  %v2842_v50 = vld [vmem:[%s7114_s7 + $0xb0] sm:$0xff]  ;;  %v2857_v7 = vld [vmem:[%s7114_s7 + $0x128] sm:$0xff] }
0x2133   :  { %vm2303_vm6 = vmand %vm2023_vm7, %vm2191_vm2  ;;  %vm7447_vm7 = vnez %v7335_v4  ;;  %v4384_v45 = vpack.c.bf16 %v2843_v54, %v2842_v50  ;;  %v2846_v10 = vld [vmem:[%s7114_s7 + $0xd0] sm:$0xff]  ;;  %v2861_v44 = vld [vmem:[%s7114_s7 + $0x148] sm:$0xff] }
0x2134   :  { %vm4364_vm11 = vmpackc.low %vm2303_vm6, %vm7445_vm12  ;;  %v4392_v4 = vpack.c.bf16 %v2847_v42, %v2846_v10  ;;  %v2878_v50 = vld [vmem:[%s7114_s7 + $0x1d0] sm:$0xff]  ;;  %v2879_v54 = vld [vmem:[%s7114_s7 + $0x1d8] sm:$0xff] }
0x2135   :  { %4359 = vmatpush1.bf16.msk.msra.mxu1 %vm4358_vm3, %v5910_v27  ;;  %vm2312_vm4 = vmand %vm2032_vm9, %vm2200_vm13  ;;  %v2823_v27 = vld [vmem:[%s7114_s7 + $0x18] sm:$0xff]  ;;  %v2882_v10 = vld [vmem:[%s7114_s7 + $0x1f0] sm:$0xff] }
0x2136   :  { %4362 = vmatprep.subr.msk.bf16.mxu1 %vm4361_vm14, %v5926_v47  ;;  %vm4367_vm15 = vmpackc.low %vm7446_vm10, %vm2312_vm4  ;;  %v4378_v43 = vpack.c.bf16 %v2823_v27, %v2822_v24  ;;  %v2858_v24 = vld [vmem:[%s7114_s7 + $0x130] sm:$0xff]  ;;  %v2859_v27 = vld [vmem:[%s7114_s7 + $0x138] sm:$0xff]  ;;  %vm7450_vm14 = vcmask 523264  }
0x2137   :  { %vm2311_vm3 = vmand %vm2031_vm8, %vm2199_vm5  ;;  %v2883_v42 = vld [vmem:[%s7114_s7 + $0x1f8] sm:$0xff]  ;;  %v2890_v51 = vld [vmem:[%s7114_s7 + $0x230] sm:$0xff] }
0x2138   :  { %vm4370_vm2 = vmpackc.low %vm7447_vm7, %vm2311_vm3  ;;  %v2891_v14 = vld [vmem:[%s7114_s7 + $0x238] sm:$0xff] }
0x2139   :  { %4365 = vmatpush1.bf16.msk.msra.mxu1 %vm4364_vm11, %v5926_v47  ;;  %v2840_v47 = vld [vmem:[%s7114_s7 + $0xa0] sm:$0xff]  ;;  %vm7449_vm0 = vmmov %vm7448_vm1 }
0x213a   :  { %4368 = vmatprep.subr.msk.bf16.mxu1 %vm4367_vm15, %v6182_v3  ;;  %v4380_v25 = vpack.c.bf16 %v2841_v40, %v2840_v47  ;;  %v2876_v47 = vld [vmem:[%s7114_s7 + $0x1c0] sm:$0xff]  ;;  %v2877_v40 = vld [vmem:[%s7114_s7 + $0x1c8] sm:$0xff]  ;;  %vm7451_vm9 = vmmov %vm7450_vm14 }
0x213b   :  { %vm7452_vm13 = vmmov %vm7449_vm0 }
0x213c   :  { %vm7453_vm6 = vmmov %vm7449_vm0 }
0x213d   :  { %4371 = vmatpush1.bf16.msk.msra.mxu1 %vm4370_vm2, %v6182_v3  ;;  %v4390_v3 = vpack.c.bf16 %v2829_v59, %v2828_v2  ;;  %v2864_v2 = vld [vmem:[%s7114_s7 + $0x160] sm:$0xff]  ;;  %v2865_v59 = vld [vmem:[%s7114_s7 + $0x168] sm:$0xff]  ;;  %vm7454_vm12 = vmmov %vm7451_vm9 }
0x213e   :  { %4373 = vmatprep.subr.bf16.mxu1 %v4372_v19  ;;  %v2856_v19 = vld [vmem:[%s7114_s7 + $0x120] sm:$0xff]  ;;  %vm7455_vm11 = vmmov %vm7451_vm9 }
0x2140   :  { %3712 = vmatmul.mubr.msk.f32.vlgmr.msra.gmra.mrb[12].mxu1 %vm7448_vm1, %v6211_v5  ;;  %v2830_v5 = vld [vmem:[%s7114_s7 + $0x50] sm:$0xff] }
0x2141   :  { %2813 = vmatprep.mubr.f32.mxu1 %v7348_v34  ;;  %4375 = vmatpush3.bf16.msra.mxu1 %v4374_v49  ;;  %v2831_v34 = vld [vmem:[%s7114_s7 + $0x58] sm:$0xff]  ;;  %v4414_v49 = vpack.c.bf16 %v2857_v7, %v2856_v19  ;;  %v2892_v7 = vld [vmem:[%s7114_s7 + $0x240] sm:$0xff] }
0x2142   :  { %4377 = vmatprep.subr.bf16.mxu1 %v4376_v18  ;;  %v4394_v13 = vpack.c.bf16 %v2831_v34, %v2830_v5  ;;  %v4416_v18 = vpack.c.bf16 %v2875_v39, %v2874_v6  ;;  %v2866_v5 = vld [vmem:[%s7114_s7 + $0x170] sm:$0xff]  ;;  %v2867_v34 = vld [vmem:[%s7114_s7 + $0x178] sm:$0xff] }
0x2143   :  { %v2910_v6 = vld [vmem:[%s7114_s7 + $0x2d0] sm:$0xff]  ;;  %v2911_v39 = vld [vmem:[%s7114_s7 + $0x2d8] sm:$0xff] }
0x2144   :  { %3713 = vmatmul.mubr.msk.f32.gmra.mrb[14].mxu1 %vm7449_vm0, %v6253_v16  ;;  %v2848_v16 = vld [vmem:[%s7114_s7 + $0xe0] sm:$0xff] }
0x2145   :  { %4379 = vmatpush3.bf16.msra.mxu1 %v4378_v43  ;;  %v4396_v46 = vpack.c.bf16 %v2849_v29, %v2848_v16  ;;  %v4418_v43 = vpack.c.bf16 %v2859_v27, %v2858_v24  ;;  %v2900_v16 = vld [vmem:[%s7114_s7 + $0x280] sm:$0xff]  ;;  %v2901_v29 = vld [vmem:[%s7114_s7 + $0x288] sm:$0xff]  ;;  %v2894_v24 = vld [vmem:[%s7114_s7 + $0x250] sm:$0xff] }
0x2146   :  { %4381 = vmatprep.subr.bf16.mxu1 %v4380_v25  ;;  %v4420_v25 = vpack.c.bf16 %v2877_v40, %v2876_v47  ;;  %v4436_v11 = vpack.c.bf16 %v2901_v29, %v2900_v16  ;;  %v2895_v27 = vld [vmem:[%s7114_s7 + $0x258] sm:$0xff]  ;;  %v2912_v47 = vld [vmem:[%s7114_s7 + $0x2e0] sm:$0xff]  ;;  %v2913_v40 = vld [vmem:[%s7114_s7 + $0x2e8] sm:$0xff] }
0x2149   :  { %4383 = vmatpush3.bf16.msra.mxu1 %v4382_v58  ;;  %v4422_v58 = vpack.c.bf16 %v2861_v44, %v2860_v30  ;;  %v2896_v30 = vld [vmem:[%s7114_s7 + $0x260] sm:$0xff]  ;;  %v2897_v44 = vld [vmem:[%s7114_s7 + $0x268] sm:$0xff] }
0x214a   :  { %4385 = vmatprep.subr.bf16.mxu1 %v4384_v45  ;;  %v4424_v45 = vpack.c.bf16 %v2879_v54, %v2878_v50  ;;  %v2914_v50 = vld [vmem:[%s7114_s7 + $0x2f0] sm:$0xff]  ;;  %v2915_v54 = vld [vmem:[%s7114_s7 + $0x2f8] sm:$0xff] }
0x214d   :  { %4387 = vmatpush3.bf16.msra.mxu1 %v4386_v35  ;;  %v4426_v35 = vpack.c.bf16 %v2863_v53, %v2862_v56  ;;  %v4464_v56 = vpack.c.bf16 %v2915_v54, %v2914_v50  ;;  %v2898_v53 = vld [vmem:[%s7114_s7 + $0x270] sm:$0xff] }
0x214e   :  { %4389 = vmatprep.subr.bf16.mxu1 %v4388_v8  ;;  %v4428_v8 = vpack.c.bf16 %v2881_v9, %v2880_v15  ;;  %v2899_v15 = vld [vmem:[%s7114_s7 + $0x278] sm:$0xff] }
0x2151   :  { %4391 = vmatpush3.bf16.msra.mxu1 %v4390_v3  ;;  %v4430_v3 = vpack.c.bf16 %v2865_v59, %v2864_v2  ;;  %v4466_v2 = vpack.c.bf16 %v2899_v15, %v2898_v53  ;;  %v3261_v53 = vld [vmem:[%s7115_s9 + $0x20] sm:$0xff]  ;;  %v3262_v15 = vld [vmem:[%s7115_s9 + $0x28] sm:$0xff] }
0x2152   :  { %4393 = vmatprep.subr.bf16.mxu1 %v4392_v4  ;;  %v4432_v4 = vpack.c.bf16 %v2883_v42, %v2882_v10  ;;  %v2916_v42 = vld [vmem:[%s7114_s7 + $0x300] sm:$0xff] }
0x2155   :  { %4395 = vmatpush3.bf16.msra.mxu1 %v4394_v13 }
0x2156   :  { %4397 = vmatprep.subr.bf16.mxu1 %v4396_v46  ;;  %v4434_v46 = vpack.c.bf16 %v2867_v34, %v2866_v5  ;;  %v2934_v5 = vld [vmem:[%s7114_s7 + $0x390] sm:$0xff]  ;;  %v2935_v34 = vld [vmem:[%s7114_s7 + $0x398] sm:$0xff] }
0x2157   :  { %v4472_v29 = vpack.c.bf16 %v2935_v34, %v2934_v5 }
0x2159   :  { %4399 = vmatpush3.bf16.msra.mxu1 %v4398_v41  ;;  %v2902_v41 = vld [vmem:[%s7114_s7 + $0x290] sm:$0xff] }
0x215a   :  { %4401 = vmatprep.subr.bf16.mxu1 %v4400_v26  ;;  %v2903_v26 = vld [vmem:[%s7114_s7 + $0x298] sm:$0xff] }
0x215b   :  { %v4440_v20 = vpack.c.bf16 %v2903_v26, %v2902_v41  ;;  %v2920_v41 = vld [vmem:[%s7114_s7 + $0x320] sm:$0xff]  ;;  %v2921_v26 = vld [vmem:[%s7114_s7 + $0x328] sm:$0xff] }
0x215d   :  { %4403 = vmatpush3.bf16.msra.mxu1 %v4402_v22  ;;  %v2886_v22 = vld [vmem:[%s7114_s7 + $0x210] sm:$0xff] }
0x215e   :  { %4405 = vmatprep.subr.bf16.mxu1 %v4404_v36  ;;  %v2887_v36 = vld [vmem:[%s7114_s7 + $0x218] sm:$0xff] }
0x215f   :  { %v4442_v1 = vpack.c.bf16 %v2887_v36, %v2886_v22  ;;  %v2922_v22 = vld [vmem:[%s7114_s7 + $0x330] sm:$0xff]  ;;  %v2923_v36 = vld [vmem:[%s7114_s7 + $0x338] sm:$0xff] }
0x21bf   :  { %v2578_v17 = vpop.f32.mrb[0].mxu1 }
0x21c0   :  { %v2580_v57 = vpop.f32.mrb[1].mxu1 }
0x21c1   :  { %3019 = vmatprep.mubr.f32.mxu1 %v2580_v57  ;;  %v2906_v57 = vld [vmem:[%s7114_s7 + $0x2b0] sm:$0xff] }
0x21c2   :  { %3020 = vmatmul.mubr.f32.vlgmr.msra.gmra.mrb[16].mxu1 %v2578_v17  ;;  %v2888_v17 = vld [vmem:[%s7114_s7 + $0x220] sm:$0xff] }
0x21c3   :  { %4407 = vmatpush3.bf16.msra.mxu1 %v4406_v55  ;;  %v2584_v31 = vpop.f32.mrb[2].mxu1  ;;  %v2889_v55 = vld [vmem:[%s7114_s7 + $0x228] sm:$0xff] }
0x21c4   :  { %4409 = vmatprep.subr.bf16.mxu1 %v4408_v60  ;;  %v2586_v63 = vpop.f32.mrb[3].mxu1  ;;  %v2907_v60 = vld [vmem:[%s7114_s7 + $0x2b8] sm:$0xff]  ;;  %v4446_v61 = vpack.c.bf16 %v2889_v55, %v2888_v17  ;;  %v2924_v17 = vld [vmem:[%s7114_s7 + $0x340] sm:$0xff]  ;;  %v2925_v55 = vld [vmem:[%s7114_s7 + $0x348] sm:$0xff] }
0x21c5   :  { %3024 = vmatprep.mubr.f32.mxu1 %v2586_v63  ;;  %v4448_v62 = vpack.c.bf16 %v2907_v60, %v2906_v57  ;;  %v2893_v63 = vld [vmem:[%s7114_s7 + $0x248] sm:$0xff]  ;;  %v2942_v57 = vld [vmem:[%s7114_s7 + $0x3d0] sm:$0xff]  ;;  %v2943_v60 = vld [vmem:[%s7114_s7 + $0x3d8] sm:$0xff] }
0x21c6   :  { %3025 = vmatmul.mubr.f32.gmra.mrb[18].mxu1 %v2584_v31  ;;  %v2909_v31 = vld [vmem:[%s7114_s7 + $0x2c8] sm:$0xff] }
0x21c7   :  { %4411 = vmatpush3.bf16.msra.mxu1 %v4410_v23  ;;  %v2908_v23 = vld [vmem:[%s7114_s7 + $0x2c0] sm:$0xff] }
0x21c8   :  { %4413 = vmatprep.subr.bf16.mxu1 %v4412_v33  ;;  %v4450_v33 = vpack.c.bf16 %v2891_v14, %v2890_v51  ;;  %v4452_v19 = vpack.c.bf16 %v2909_v31, %v2908_v23  ;;  %v2926_v51 = vld [vmem:[%s7114_s7 + $0x350] sm:$0xff]  ;;  %v2927_v14 = vld [vmem:[%s7114_s7 + $0x358] sm:$0xff]  ;;  %v2944_v23 = vld [vmem:[%s7114_s7 + $0x3e0] sm:$0xff] }
0x21c9   :  { %v2945_v31 = vld [vmem:[%s7114_s7 + $0x3e8] sm:$0xff] }
0x21cb   :  { %4415 = vmatpush3.bf16.msra.mxu1 %v4414_v49  ;;  %v4454_v49 = vpack.c.bf16 %v2893_v63, %v2892_v7  ;;  %v4492_v7 = vpack.c.bf16 %v2945_v31, %v2944_v23  ;;  %v2928_v63 = vld [vmem:[%s7114_s7 + $0x360] sm:$0xff] }
0x21cc   :  { %4417 = vmatprep.subr.bf16.mxu1 %v4416_v18  ;;  %v4456_v18 = vpack.c.bf16 %v2911_v39, %v2910_v6  ;;  %v2929_v6 = vld [vmem:[%s7114_s7 + $0x368] sm:$0xff] }
0x21cf   :  { %4419 = vmatpush3.bf16.msra.mxu1 %v4418_v43  ;;  %v4458_v43 = vpack.c.bf16 %v2895_v27, %v2894_v24  ;;  %v4494_v24 = vpack.c.bf16 %v2929_v6, %v2928_v63 }
0x21d0   :  { %4421 = vmatprep.subr.bf16.mxu1 %v4420_v25  ;;  %v4460_v25 = vpack.c.bf16 %v2913_v40, %v2912_v47  ;;  %v2930_v40 = vld [vmem:[%s7114_s7 + $0x370] sm:$0xff] }
0x21d3   :  { %4423 = vmatpush3.bf16.msra.mxu1 %v4422_v58  ;;  %v4462_v58 = vpack.c.bf16 %v2897_v44, %v2896_v30  ;;  %v3257_v30 = vld [vmem:[%s7115_s9] sm:$0xff]  ;;  %v3258_v44 = vld [vmem:[%s7115_s9 + $0x8] sm:$0xff] }
0x21d4   :  { %4425 = vmatprep.subr.bf16.mxu1 %v4424_v45  ;;  %v4500_v54 = vpack.c.bf16 %v3258_v44, %v3257_v30  ;;  %v4832_v30 = vld [vmem:[#allocation3 + $0x28] sm:$0xff]  ;;  %v4833_v44 = vld [vmem:[#allocation3 + $0x20] sm:$0xff] }
0x21d7   :  { %4427 = vmatpush3.bf16.msra.mxu1 %v4426_v35  ;;  %v2932_v35 = vld [vmem:[%s7114_s7 + $0x380] sm:$0xff] }
0x21d8   :  { %4429 = vmatprep.subr.bf16.mxu1 %v4428_v8  ;;  %v2933_v8 = vld [vmem:[%s7114_s7 + $0x388] sm:$0xff] }
0x21d9   :  { %v4468_v10 = vpack.c.bf16 %v2933_v8, %v2932_v35  ;;  %v3263_v35 = vld [vmem:[%s7115_s9 + $0x30] sm:$0xff]  ;;  %v3264_v8 = vld [vmem:[%s7115_s9 + $0x38] sm:$0xff] }
0x21db   :  { %4431 = vmatpush3.bf16.msra.mxu1 %v4430_v3  ;;  %v2655_v13 = vpop.f32.mrb[4].mxu1  ;;  %v2917_v3 = vld [vmem:[%s7114_s7 + $0x308] sm:$0xff] }
0x21dc   :  { %4433 = vmatprep.subr.bf16.mxu1 %v4432_v4  ;;  %v2657_v32 = vpop.f32.mrb[5].mxu1  ;;  %v4470_v16 = vpack.c.bf16 %v2917_v3, %v2916_v42 }
0x21dd   :  { %3094 = vmatprep.mubr.f32.mxu1 %v2657_v32  ;;  %v2936_v32 = vld [vmem:[%s7114_s7 + $0x3a0] sm:$0xff] }
0x21df   :  { %4435 = vmatpush3.bf16.msra.mxu1 %v4434_v46  ;;  %v2661_v28 = vpop.f32.mrb[6].mxu1  ;;  %v2919_v46 = vld [vmem:[%s7114_s7 + $0x318] sm:$0xff] }
0x21e0   :  { %4437 = vmatprep.subr.bf16.mxu1 %v4436_v11  ;;  %v2663_v21 = vpop.f32.mrb[7].mxu1  ;;  %v2937_v11 = vld [vmem:[%s7114_s7 + $0x3a8] sm:$0xff] }
0x21e1   :  { %v4476_v12 = vpack.c.bf16 %v2937_v11, %v2936_v32  ;;  %v3436_v32 = vld [vmem:[%s7116_s11 + $0x10] sm:$0xff] }
0x21e2   :  { %3095 = vmatmul.mubr.f32.vlgmr.msra.gmra.mrb[20].mxu1 %v2655_v13  ;;  %v2918_v13 = vld [vmem:[%s7114_s7 + $0x310] sm:$0xff] }
0x21e3   :  { %4439 = vmatpush3.bf16.msra.mxu1 %v4438_v37  ;;  %3099 = vmatprep.mubr.f32.mxu1 %v2663_v21  ;;  %v4474_v0 = vpack.c.bf16 %v2919_v46, %v2918_v13  ;;  %v2939_v37 = vld [vmem:[%s7114_s7 + $0x3b8] sm:$0xff]  ;;  %v4478_v21 = vpack.c.bf16 %v2921_v26, %v2920_v41  ;;  %v3434_v13 = vld [vmem:[%s7116_s11] sm:$0xff]  ;;  %v3435_v46 = vld [vmem:[%s7116_s11 + $0x8] sm:$0xff] }
0x21e4   :  { %4441 = vmatprep.subr.bf16.mxu1 %v4440_v20  ;;  %v4544_v11 = vpack.c.bf16 %v3435_v46, %v3434_v13  ;;  %v3438_v41 = vld [vmem:[%s7116_s11 + $0x20] sm:$0xff]  ;;  %v3439_v26 = vld [vmem:[%s7116_s11 + $0x28] sm:$0xff] }
0x21e6   :  { %3100 = vmatmul.mubr.f32.gmra.mrb[22].mxu1 %v2661_v28  ;;  %v2938_v28 = vld [vmem:[%s7114_s7 + $0x3b0] sm:$0xff]  ;;  %4545 = vmatprep.subr.bf16.mxu0 %v4544_v11 }
0x21e7   :  { %4443 = vmatpush3.bf16.msra.mxu1 %v4442_v1  ;;  %v4480_v20 = vpack.c.bf16 %v2939_v37, %v2938_v28  ;;  %v4482_v1 = vpack.c.bf16 %v2923_v36, %v2922_v22  ;;  %4547 = vmatpush3.bf16.msra.mxu0 %v4544_v11  ;;  %v4552_v28 = vpack.c.bf16 %v3439_v26, %v3438_v41  ;;  %v3714_v37 = vld [vmem:[%s7117_s8] ss:$0 sm:$0xff] }
0x21e8   :  { %4445 = vmatprep.subr.bf16.mxu1 %v4444_v48  ;;  %v4484_v48 = vpack.c.bf16 %v2941_v38, %v2940_v52 }
0x21eb   :  { %4447 = vmatpush3.bf16.msra.mxu1 %v4446_v61  ;;  %v4486_v61 = vpack.c.bf16 %v2925_v55, %v2924_v17 }
0x21ec   :  { %4449 = vmatprep.subr.bf16.mxu1 %v4448_v62  ;;  %v4488_v62 = vpack.c.bf16 %v2943_v60, %v2942_v57 }
0x21ef   :  { %4451 = vmatpush3.bf16.msra.mxu1 %v4450_v33  ;;  %v4490_v33 = vpack.c.bf16 %v2927_v14, %v2926_v51 }
0x21f0   :  { %4453 = vmatprep.subr.bf16.mxu1 %v4452_v19 }
0x21f3   :  { %4455 = vmatpush3.bf16.msra.mxu1 %v4454_v49  ;;  %v2946_v49 = vld [vmem:[%s7114_s7 + $0x3f0] sm:$0xff] }
0x21f4   :  { %4457 = vmatprep.subr.bf16.mxu1 %v4456_v18  ;;  %v2947_v18 = vld [vmem:[%s7114_s7 + $0x3f8] sm:$0xff] }
0x21f5   :  { %v4496_v47 = vpack.c.bf16 %v2947_v18, %v2946_v49 }
0x21f7   :  { %4459 = vmatpush3.bf16.msra.mxu1 %v4458_v43  ;;  %v2732_v45 = vpop.f32.mrb[8].mxu1  ;;  %v2931_v43 = vld [vmem:[%s7114_s7 + $0x378] sm:$0xff] }
0x21f8   :  { %4461 = vmatprep.subr.bf16.mxu1 %v4460_v25  ;;  %v2734_v9 = vpop.f32.mrb[9].mxu1  ;;  %v4498_v50 = vpack.c.bf16 %v2931_v43, %v2930_v40  ;;  %v4830_v40 = vld [vmem:[#allocation3 + $0x18] sm:$0xff]  ;;  %v4831_v43 = vld [vmem:[#allocation3 + $0x10] sm:$0xff] }
0x21f9   :  { %3169 = vmatprep.mubr.f32.mxu1 %v2734_v9  ;;  %v4508_v9 = vpack.c.bf16 %v3262_v15, %v3261_v53  ;;  %v4837_v53 = vld [vmem:[#allocation3 + $0x40] sm:$0xff] }
0x21fb   :  { %4463 = vmatpush3.bf16.msra.mxu1 %v4462_v58  ;;  %v2738_v59 = vpop.f32.mrb[10].mxu1  ;;  %v3259_v58 = vld [vmem:[%s7115_s9 + $0x10] sm:$0xff] }
0x21fc   :  { %4465 = vmatprep.subr.bf16.mxu1 %v4464_v56  ;;  %v2740_v4 = vpop.f32.mrb[11].mxu1 }
0x21ff   :  { %4467 = vmatpush3.bf16.msra.mxu1 %v4466_v2  ;;  %v4512_v2 = vpack.c.bf16 %v3264_v8, %v3263_v35  ;;  %v4839_v35 = vld [vmem:[#allocation3 + $0x50] sm:$0xff] }
0x2200   :  { %4469 = vmatprep.subr.bf16.mxu1 %v4468_v10  ;;  %v4829_v10 = vld [vmem:[#allocation3] sm:$0xff] }
0x2202   :  { %3170 = vmatmul.mubr.f32.vlgmr.msra.gmra.mrb[24].mxu1 %v2732_v45  ;;  %v3260_v45 = vld [vmem:[%s7115_s9 + $0x18] sm:$0xff] }
0x2203   :  { %4471 = vmatpush3.bf16.msra.mxu1 %v4470_v16  ;;  %3174 = vmatprep.mubr.f32.mxu1 %v2740_v4  ;;  %v4504_v56 = vpack.c.bf16 %v3260_v45, %v3259_v58  ;;  %v4835_v58 = vld [vmem:[#allocation3 + $0x30] sm:$0xff] }
0x2204   :  { %4473 = vmatprep.subr.bf16.mxu1 %v4472_v29 }
0x2206   :  { %3175 = vmatmul.mubr.f32.gmra.mrb[26].mxu1 %v2738_v59  ;;  %v4828_v59 = vld [vmem:[#allocation3 + $0x8] sm:$0xff] }
0x2207   :  { %4475 = vmatpush3.bf16.msra.mxu1 %v4474_v0  ;;  %v4516_v42 = vpack.c.bf16 %v4828_v59, %v4829_v10  ;;  %v3437_v0 = vld [vmem:[%s7116_s11 + $0x18] sm:$0xff]  ;;  %v4841_v59 = vld [vmem:[#allocation3 + $0x68] sm:$0xff] }
0x2208   :  { %4477 = vmatprep.subr.bf16.mxu1 %v4476_v12  ;;  %v4548_v12 = vpack.c.bf16 %v3437_v0, %v3436_v32  ;;  %v3720_v32 = vld [vmem:[%s7120_s12] ss:$0 sm:$0xff] }
0x220a   :  { %4549 = vmatprep.subr.bf16.mxu0 %v4548_v12 }
0x220b   :  { %4479 = vmatpush3.bf16.msra.mxu1 %v4478_v21  ;;  %4551 = vmatpush3.bf16.msra.mxu0 %v4548_v12 }
0x220c   :  { %4481 = vmatprep.subr.bf16.mxu1 %v4480_v20  ;;  %4553 = vmatprep.subr.bf16.mxu0 %v4552_v28 }
0x220f   :  { %4483 = vmatpush3.bf16.msra.mxu1 %v4482_v1  ;;  %4555 = vmatpush3.bf16.msra.mxu0 %v4552_v28 }
0x2210   :  { %4485 = vmatprep.subr.bf16.mxu1 %v4484_v48 }
0x2213   :  { %4487 = vmatpush3.bf16.msra.mxu1 %v4486_v61  ;;  %v2809_v19 = vpop.f32.mrb[12].mxu1 }
0x2214   :  { %4489 = vmatprep.subr.bf16.mxu1 %v4488_v62  ;;  %v2811_v39 = vpop.f32.mrb[13].mxu1 }
0x2215   :  { %3244 = vmatprep.mubr.f32.mxu1 %v2811_v39 }
0x2217   :  { %4491 = vmatpush3.bf16.msra.mxu1 %v4490_v33  ;;  %v2815_v27 = vpop.f32.mrb[14].mxu1 }
0x2218   :  { %4493 = vmatprep.subr.bf16.mxu1 %v4492_v7  ;;  %v2817_v25 = vpop.f32.mrb[15].mxu1 }
0x221b   :  { %4495 = vmatpush3.bf16.msra.mxu1 %v4494_v24 }
0x221c   :  { %4497 = vmatprep.subr.bf16.mxu1 %v4496_v47  ;;  %v1862_v47 = vld [vmem:[%s7118_s3] sm:$0xff] }
0x221f   :  { %4499 = vmatpush3.bf16.msra.mxu1 %v4498_v50  ;;  %v4524_v50 = vpack.c.bf16 %v4832_v30, %v4833_v44 }
0x2220   :  { %4501 = vmatprep.subr.bf16.mxu1 %v4500_v54 }
0x2222   :  { %3245 = vmatmul.mubr.f32.vlgmr.msra.gmra.mrb[28].mxu1 %v2809_v19 }
0x2223   :  { %4503 = vmatpush3.bf16.msra.mxu1 %v4500_v54  ;;  %3249 = vmatprep.mubr.f32.mxu1 %v2817_v25  ;;  %v4520_v25 = vpack.c.bf16 %v4830_v40, %v4831_v43  ;;  %v4834_v54 = vld [vmem:[#allocation3 + $0x38] sm:$0xff] }
0x2224   :  { %4505 = vmatprep.subr.bf16.mxu1 %v4504_v56  ;;  %v4528_v45 = vpack.c.bf16 %v4834_v54, %v4835_v58 }
0x2226   :  { %3250 = vmatmul.mubr.f32.gmra.mrb[30].mxu1 %v2815_v27 }
0x2227   :  { %4507 = vmatpush3.bf16.msra.mxu1 %v4504_v56  ;;  %v4836_v56 = vld [vmem:[#allocation3 + $0x48] sm:$0xff] }
0x2228   :  { %4509 = vmatprep.subr.bf16.mxu1 %v4508_v9  ;;  %v4532_v15 = vpack.c.bf16 %v4836_v56, %v4837_v53 }
0x222b   :  { %4511 = vmatpush3.bf16.msra.mxu1 %v4508_v9  ;;  %v4838_v9 = vld [vmem:[#allocation3 + $0x58] sm:$0xff] }
0x222c   :  { %4513 = vmatprep.subr.bf16.mxu1 %v4512_v2  ;;  %v4536_v8 = vpack.c.bf16 %v4838_v9, %v4839_v35 }
0x222f   :  { %4515 = vmatpush3.bf16.msra.mxu1 %v4512_v2  ;;  %v4840_v2 = vld [vmem:[#allocation3 + $0x60] sm:$0xff] }
0x2230   :  { %4517 = vmatprep.subr.bf16.mxu1 %v4516_v42  ;;  %v4540_v10 = vpack.c.bf16 %v4841_v59, %v4840_v2 }
0x2295   :  { %v3755_v3 = vpop.f32.mrb[16].mxu1 }
0x2296   :  { %v3756_v4 = vpop.f32.mrb[17].mxu1 }
0x2297   :  { %v3757_v5 = vadd.f32 %v3756_v4, %v3755_v3  ;;  %v3440_v3 = vld [vmem:[%s7116_s11 + $0x30] sm:$0xff]  ;;  %v3441_v4 = vld [vmem:[%s7116_s11 + $0x38] sm:$0xff] }
0x2299   :  { %v3758_v34 = vpop.f32.mrb[18].mxu1  ;;  %v3022_v22 = vadd.f32 %v3757_v5, %v3714_v37  ;;  %v4556_v5 = vpack.c.bf16 %v3441_v4, %v3440_v3 }
0x229a   :  { %v3759_v16 = vpop.f32.mrb[19].mxu1 }
0x229b   :  { %v3760_v29 = vadd.f32 %v3759_v16, %v3758_v34  ;;  %4557 = vmatprep.subr.bf16.mxu0 %v4556_v5  ;;  %v3715_v34 = vld [vmem:[%s7119_s10] ss:$0 sm:$0xff] }
0x229c   :  { %4559 = vmatpush3.bf16.msra.mxu0 %v4556_v5 }
0x229d   :  { %v3027_v48 = vadd.f32 %v3760_v29, %v3714_v37 }
0x22b5   :  { %v3793_v21 = vpop.f32.mrb[20].mxu1 }
0x22b6   :  { %v3794_v20 = vpop.f32.mrb[21].mxu1 }
0x22b7   :  { %v3795_v36 = vadd.f32 %v3794_v20, %v3793_v21 }
0x22b9   :  { %v3097_v52 = vadd.f32 %v3795_v36, %v3022_v22  ;;  %v3796_v38 = vpop.f32.mrb[22].mxu1 }
0x22ba   :  { %v3797_v1 = vpop.f32.mrb[23].mxu1 }
0x22bb   :  { %v3798_v17 = vadd.f32 %v3797_v1, %v3796_v38 }
0x22bd   :  { %v3102_v55 = vadd.f32 %v3798_v17, %v3027_v48 }
0x22d5   :  { %v3831_v57 = vpop.f32.mrb[24].mxu1 }
0x22d6   :  { %v3832_v60 = vpop.f32.mrb[25].mxu1 }
0x22d7   :  { %v3833_v61 = vadd.f32 %v3832_v60, %v3831_v57 }
0x22d9   :  { %v3172_v62 = vadd.f32 %v3833_v61, %v3097_v52  ;;  %v3834_v51 = vpop.f32.mrb[26].mxu1 }
0x22da   :  { %v3835_v14 = vpop.f32.mrb[27].mxu1 }
0x22db   :  { %v3836_v23 = vadd.f32 %v3835_v14, %v3834_v51 }
0x22dd   :  { %v3177_v31 = vadd.f32 %v3836_v23, %v3102_v55 }
0x22f5   :  { %v3869_v33 = vpop.f32.mrb[28].mxu1 }
0x22f6   :  { %v3870_v19 = vpop.f32.mrb[29].mxu1 }
0x22f7   :  { %v3871_v7 = vadd.f32 %v3870_v19, %v3869_v33 }
0x22f9   :  { %v3247_v63 = vadd.f32 %v3871_v7, %v3172_v62  ;;  %v3872_v6 = vpop.f32.mrb[30].mxu1 }
0x22fa   :  { %v3873_v39 = vpop.f32.mrb[31].mxu1 }
0x22fb   :  { %v3255_v49 = vmax.f32 %v3247_v63, 0.0  ;;  %v3874_v18 = vadd.f32 %v3873_v39, %v3872_v6 }
0x22fd   :  { %v3252_v24 = vadd.f32 %v3874_v18, %v3177_v31  ;;  %3927 = vmatprep.mubr.msk.f32.mxu1 %vm7450_vm14, %v3255_v49 }
0x22ff   :  { %v3256_v27 = vmax.f32 %v3252_v24, 0.0 }
0x2301   :  { %3928 = vmatmul.mubr.msk.f32.vlgmr.msra.gmra.mrb[32].mxu1 %vm7451_vm9, %v3256_v27 }
0x2302   :  { %4519 = vmatpush3.bf16.msra.mxu1 %v4516_v42  ;;  %3958 = vmatprep.mubr.msk.f32.mxu1 %vm7452_vm13, %v1862_v47  ;;  %v1863_v42 = vld [vmem:[%s7118_s3 + $0x8] sm:$0x3f] }
0x2303   :  { %4521 = vmatprep.subr.bf16.mxu1 %v4520_v25 }
0x2306   :  { %4523 = vmatpush3.bf16.msra.mxu1 %v4520_v25 }
0x2307   :  { %4525 = vmatprep.subr.bf16.mxu1 %v4524_v50 }
0x230a   :  { %4527 = vmatpush3.bf16.msra.mxu1 %v4524_v50 }
0x230b   :  { %4529 = vmatprep.subr.bf16.mxu1 %v4528_v45 }
0x230e   :  { %4531 = vmatpush3.bf16.msra.mxu1 %v4528_v45 }
0x230f   :  { %4533 = vmatprep.subr.bf16.mxu1 %v4532_v15 }
0x2312   :  { %4535 = vmatpush3.bf16.msra.mxu1 %v4532_v15 }
0x2313   :  { %4537 = vmatprep.subr.bf16.mxu1 %v4536_v8 }
0x2316   :  { %4539 = vmatpush3.bf16.msra.mxu1 %v4536_v8 }
0x2317   :  { %4541 = vmatprep.subr.bf16.mxu1 %v4540_v10 }
0x231a   :  { %4543 = vmatpush3.bf16.msra.mxu1 %v4540_v10 }
0x231d   :  { %3959 = vmatmul.mubr.msk.f32.vlgmr.msra.gmra.mrb[32].mxu1 %vm7453_vm6, %v1863_v42 }
0x23f0   :  { %v3960_v16 = vpop.f32.mrb[32].mxu1 }
0x23f1   :  { %v3425_v29 = vpop.f32.mrb[33].mxu1  ;;  %v4588_v46 = vadd.f32 %v3960_v16, %v3715_v34 }
0x23f2   :  { %v4589_v13 = vadd.f32 %v3715_v34, %v3425_v29 }
0x23f4   :  { %3977 = vmatprep.mubr.msk.f32.mxu0 %vm7454_vm12, %v4589_v13 }
0x23f5   :  { %3978 = vmatmul.mubr.msk.f32.vlgmr.msra.gmra.mrb[28].mxu0 %vm7455_vm11, %v4588_v46 }
0x24c8   :  { %v3979_v11 = vpop.f32.mrb[28].mxu0 }
0x24c9   :  { %v3527_v0 = vadd.f32 %v3979_v11, %v3720_v32  ;;  %v3521_v12 = vpop.f32.mrb[29].mxu0 }
0x24ca   :  { %v3522_v41 = vadd.f32 %v3720_v32, %v3521_v12 }
0x24cb   :  { %3531 = vst [vmem:[%s7121_s13 + $0x8] sm:$0x3f] %v3527_v0 }
0x24cc   :  { %3530 = vst [vmem:[%s7121_s13] sm:$0xff] %v3522_v41 }

</bundles_post_ra>
